<compile_context>
chip_gen: v7x
topology: tpu7x:2x2x1
jax: 0.10.0
libtpu: 0.0.40
codegen_flags: <defaults>
</compile_context>

<pallas_src>
import functools

import jax
import jax.numpy as jnp
import numpy as np
from jax.experimental import pallas as pl
from jax.experimental.pallas import tpu as pltpu

_VMEM_LIMIT_BYTES = 32 * 1024 * 1024          # safe on v5e/v6e/v7x
_INTERMEDIATE_BUDGET_BYTES = 12 * 1024 * 1024  # compiler-managed in-kernel intermediates


def _round_up(x, m):
    return ((x + m - 1) // m) * m


def _choose_batch_block(n, max_block):
    """Batch-block size: multiple of 8, capped by VMEM budget, >=2 blocks when possible."""
    n8 = _round_up(max(n, 1), 8)
    if n8 <= max_block:
        if n8 >= 16:                       # give both v7x TensorCores a block
            return _round_up((n8 + 1) // 2, 8)
        return n8
    return max_block


# ----------------------------------------------------------------------------
# Fused encoder kernel: one grid step per batch block.
# ----------------------------------------------------------------------------
def _encoder_kernel(geom, x_ref, w1_ref, b1_ref, w2_ref, b2_ref,
                    wfc_ref, bfc_ref, g_ref, beta_ref, o_ref, *, mxu_dtype):
    """
    x_ref  : (Hs2d*Ws2d*B, 4*Cin)  space-to-depth(2) input block, rows ordered (spatial, sample)
    w1_ref : (4*Cin, 4*NF)         conv1 tap-stacked (2x2 s1 on s2d layout), /255 folded in
    b1_ref : (1, NF)
    w2_ref : (NF, 9*NF)            conv2 tap-stacked (3x3 s1)
    b2_ref : (1, NF)
    wfc_ref: (Ho2*Wo2*NF, Fdim)    fc weight, rows ordered (spatial, channel) to match kernel layout
    bfc_ref, g_ref, beta_ref : (1, Fdim)
    o_ref  : (B, Fdim)             tanh(LayerNorm(fc)) output block
    """
    (bblk, ws2d, ho1, wo1, ho2, wo2, nf, fdim) = geom

    # ---- conv1: ONE tap-stacked GEMM over the whole batch block (M = S1*B) ----
    y1 = jnp.dot(x_ref[...], w1_ref[...], preferred_element_type=jnp.float32)  # (S1*B, 4*NF)
    b1 = b1_ref[...]

    a1_rows = []
    for p in range(ho1):                       # combine the 4 taps with shifted adds
        acc = None
        for dy in range(2):
            for dx in range(2):
                tap = dy * 2 + dx
                start = ((p + dy) * ws2d + dx) * bblk          # sublane-aligned (B % 8 == 0)
                part = y1[start:start + wo1 * bblk, tap * nf:(tap + 1) * nf]
                acc = part if acc is None else acc + part
        a1_rows.append(jnp.maximum(acc + b1, 0.0))             # (Wo1*B, NF) f32
    # conv1 activation, rows ordered (spatial, sample); cast to MXU dtype ONCE (hoisted).
    a1 = jnp.concatenate(a1_rows, axis=0).astype(mxu_dtype)    # (Ho1*Wo1*B, NF)

    # ---- conv2: ONE tap-stacked GEMM (M = S2*B, N = 9*NF lane-dense) ----
    y2 = jnp.dot(a1, w2_ref[...], preferred_element_type=jnp.float32)          # (S2*B, 9*NF)
    b2 = b2_ref[...]

    # ---- head: fc -> LayerNorm -> tanh, fused on the VMEM-resident conv2 output ----
    fc = jnp.zeros((bblk, fdim), jnp.float32)
    for r in range(ho2):
        acc = None
        for ky in range(3):
            for kx in range(3):
                tap = ky * 3 + kx
                start = ((r + ky) * wo1 + kx) * bblk
                part = y2[start:start + wo2 * bblk, tap * nf:(tap + 1) * nf]
                acc = part if acc is None else acc + part
        a2_r = jnp.maximum(acc + b2, 0.0).astype(mxu_dtype)    # conv2 output row r: (Wo2*B, NF)
        for s in range(wo2):                                   # GEMM-accumulate straight into fc
            k = (r * wo2 + s) * nf
            fc = fc + jnp.dot(a2_r[s * bblk:(s + 1) * bblk, :],
                              wfc_ref[k:k + nf, :],
                              preferred_element_type=jnp.float32)
    fc = fc + bfc_ref[...]

    mean = jnp.mean(fc, axis=-1, keepdims=True)
    var = jnp.mean((fc - mean) ** 2, axis=-1, keepdims=True)   # biased, like PyTorch LN
    normed = (fc - mean) * jax.lax.rsqrt(var + 1e-5)
    o_ref[...] = jnp.tanh(normed * g_ref[...] + beta_ref[...])


def fused_encoder_forward(x_blocks, params, geom):
    nb = x_blocks.shape[0]
    (bblk, ws2d, ho1, wo1, ho2, wo2, nf, fdim) = geom
    w1, b1, w2, b2, wfc, bfc, gamma, beta = params
    kernel = functools.partial(_encoder_kernel, geom, mxu_dtype=w1.dtype)
    return pl.pallas_call(
        kernel,
        out_shape=jax.ShapeDtypeStruct((nb, bblk, fdim), jnp.float32),
        grid=(nb,),
        in_specs=[
            pl.BlockSpec((None,) + x_blocks.shape[1:], lambda i: (i, 0, 0)),
            # Weights/biases: constant index_map -> resident in VMEM across all grid steps.
            pl.BlockSpec(w1.shape, lambda i: (0, 0)),
            pl.BlockSpec(b1.shape, lambda i: (0, 0)),
            pl.BlockSpec(w2.shape, lambda i: (0, 0)),
            pl.BlockSpec(b2.shape, lambda i: (0, 0)),
            pl.BlockSpec(wfc.shape, lambda i: (0, 0)),
            pl.BlockSpec(bfc.shape, lambda i: (0, 0)),
            pl.BlockSpec(gamma.shape, lambda i: (0, 0)),
            pl.BlockSpec(beta.shape, lambda i: (0, 0)),
        ],
        out_specs=pl.BlockSpec((None, bblk, fdim), lambda i: (i, 0, 0)),
        compiler_params=pltpu.CompilerParams(
            dimension_semantics=("parallel",),        # batch blocks independent -> 2 TCs on v7x
            vmem_limit_bytes=_VMEM_LIMIT_BYTES,
        ),
    )(x_blocks, w1, b1, w2, b2, wfc, bfc, gamma, beta)


# ----------------------------------------------------------------------------
# PixelEncoder with deterministic synthetic parameters
# ----------------------------------------------------------------------------
class PixelEncoderPallas:
    def __init__(self, obs_shape, feature_dim, num_layers=2, num_filters=32,
                 key=None, mxu_dtype=jnp.bfloat16, max_batch_block=64):
        assert num_layers == 2, "fused Pallas encoder implements the default 2-conv stack"
        C, H, W = obs_shape
        assert H % 2 == 0 and W % 2 == 0, "space-to-depth(2) needs even spatial dims"
        self.obs_shape = obs_shape
        self.feature_dim = feature_dim
        self.num_layers = num_layers
        self.num_filters = num_filters
        self.mxu_dtype = mxu_dtype

        key = jax.random.PRNGKey(42) if key is None else key
        keys = jax.random.split(key, 2 * num_layers + 2)

        # Original-layout parameters (PyTorch semantics; also used by the pure-JAX reference).
        self.conv_w, self.conv_b = [], []
        cin, out = C, H
        for i in range(num_layers):
            stride = 2 if i == 0 else 1
            w = 0.05 * jax.random.normal(keys[2 * i], (3, 3, cin, num_filters), jnp.float32)
            b = 0.05 * jax.random.normal(keys[2 * i + 1], (1, num_filters), jnp.float32)
            self.conv_w.append(w)
            self.conv_b.append(b)
            cin = num_filters
            out = (out - 3) // stride + 1
        self.out_dim = out

        fin = num_filters * out * out
        self.fc_w = 0.02 * jax.random.normal(keys[-2], (feature_dim, fin), jnp.float32)
        self.fc_b = 0.02 * jax.random.normal(keys[-1], (1, feature_dim), jnp.float32)
        self.ln_gamma = jnp.ones((1, feature_dim), jnp.float32)
        self.ln_beta = jnp.zeros((1, feature_dim), jnp.float32)

        # Geometry.
        self.hs2d, self.ws2d = H // 2, W // 2
        self.ho1 = (H - 3) // 2 + 1
        self.wo1 = (W - 3) // 2 + 1
        self.ho2 = self.ho1 - 2
        self.wo2 = self.wo1 - 2
        assert self.ho2 == out and self.wo2 == out

        # Batch-block cap derived from the dominant in-kernel intermediates (v7x-safe).
        s1, s2, nf = self.hs2d * self.ws2d, self.ho1 * self.wo1, num_filters
        per_sample = 4 * (s1 * 4 * C + s1 * 4 * nf + s2 * nf + s2 * _round_up(9 * nf, 128))
        mb = (_INTERMEDIATE_BUDGET_BYTES // max(per_sample, 1)) // 8 * 8
        self.max_batch_block = max(8, min(max_batch_block, max(mb, 8)))

        # --- Kernel-layout parameters (built once at init; zero per-forward cost) ---
        # conv1 (3x3 stride 2) recast as a 2x2 stride-1 conv on the space-to-depth layout,
        # tap-stacked along the output lanes, with obs/255 folded into the weight.
        w1_np = np.asarray(self.conv_w[0])                                    # (3,3,C,NF)
        w1s = np.zeros((2, 2, 2, 2, C, num_filters), np.float32)              # (dy,dx,sy,sx,c,f)
        for dy in range(2):
            for dx in range(2):
                for sy in range(2):
                    for sx in range(2):
                        ky, kx = 2 * dy + sy, 2 * dx + sx
                        if ky < 3 and kx < 3:
                            w1s[dy, dx, sy, sx] = w1_np[ky, kx]
        w1s = w1s.transpose(2, 3, 4, 0, 1, 5).reshape(4 * C, 4 * num_filters) / 255.0
        self.k_w1 = jnp.asarray(w1s, dtype=mxu_dtype)                         # (4C, 4NF)
        self.k_b1 = self.conv_b[0]                                            # f32
        # conv2 tap-stacked: (NF, 9*NF), column group = ky*3+kx.
        w2_np = np.asarray(self.conv_w[1])                                    # (3,3,NF,NF)
        self.k_w2 = jnp.asarray(
            w2_np.transpose(2, 0, 1, 3).reshape(num_filters, 9 * num_filters), dtype=mxu_dtype)
        self.k_b2 = self.conv_b[1]                                            # f32
        # fc weight rows permuted so the head consumes the kernel's (h, w, c) activation slabs
        # directly (absorbs the PyTorch NCHW flatten; no per-forward transpose).
        wf = np.asarray(self.fc_w).reshape(feature_dim, num_filters, out, out)
        wf = wf.transpose(2, 3, 1, 0).reshape(fin, feature_dim)
        self.k_fcw = jnp.asarray(wf, dtype=mxu_dtype)                         # (out*out*NF, Fdim)
        self.k_fcb = self.fc_b                                                # f32

    def _prepare_input_blocks(self, obs, bblk):
        # (N, C, H, W) -> (nb, Hs2d*Ws2d*bblk, 4*C): space-to-depth(2) + batch-block layout,
        # rows ordered (spatial, sample), channels ordered (sy, sx, c).  One XLA transpose.
        # TODO(synk): accept native uint8 observations to quarter the input HBM read.
        N, C, H, W = obs.shape
        n_pad = _round_up(N, bblk)
        if n_pad != N:
            obs = jnp.concatenate(
                [obs, jnp.zeros((n_pad - N, C, H, W), obs.dtype)], axis=0)
        nb = n_pad // bblk
        hs, ws = H // 2, W // 2
        x = obs.reshape(nb, bblk, C, hs, 2, ws, 2)
        x = jnp.transpose(x, (0, 3, 5, 1, 4, 6, 2))           # (nb, P, Q, b, sy, sx, c)
        x = x.reshape(nb, hs * ws * bblk, 4 * C)
        return x.astype(self.mxu_dtype), nb

    def __call__(self, obs):
        # obs: (N, C, H, W) float32, same contract as the PyTorch module.
        N = obs.shape[0]
        bblk = _choose_batch_block(N, self.max_batch_block)
        x_blocks, nb = self._prepare_input_blocks(obs, bblk)
        geom = (bblk, self.ws2d, self.ho1, self.wo1, self.ho2, self.wo2,
                self.num_filters, self.feature_dim)
        params = (self.k_w1, self.k_b1, self.k_w2, self.k_b2,
                  self.k_fcw, self.k_fcb, self.ln_gamma, self.ln_beta)
        out = fused_encoder_forward(x_blocks, params, geom)
        return out.reshape(nb * bblk, self.feature_dim)[:N]


# ----------------------------------------------------------------------------
# Pure-JAX reference (for correctness check only)
# ----------------------------------------------------------------------------
def reference_forward(enc, obs):
    x = obs / 255.0  # NCHW
    for i in range(enc.num_layers):
        stride = 2 if i == 0 else 1
        w_oihw = jnp.transpose(enc.conv_w[i], (3, 2, 0, 1))  # (Cout, Cin, k, k)
        x = jax.lax.conv_general_dilated(
            x, w_oihw, window_strides=(stride, stride), padding="VALID",
            dimension_numbers=("NCHW", "OIHW", "NCHW"))
        x = jax.nn.relu(x + enc.conv_b[i].reshape(1, -1, 1, 1))
    h = x.reshape(x.shape[0], -1)
    fc = h @ enc.fc_w.T + enc.fc_b
    mean = jnp.mean(fc, axis=-1, keepdims=True)
    var = jnp.mean((fc - mean) ** 2, axis=-1, keepdims=True)
    normed = (fc - mean) / jnp.sqrt(var + 1e-5)
    return jnp.tanh(normed * enc.ln_gamma + enc.ln_beta)


if __name__ == "__main__":
    obs_shape = (4, 16, 16)   # (C, H, W)
    feature_dim = 32
    batch = 2

    key = jax.random.PRNGKey(0)
    obs = jax.random.uniform(key, (batch, *obs_shape), jnp.float32, 0.0, 255.0)

    # Exact-precision mode (f32 MXU operands): matches the PyTorch-style reference tightly.
    enc32 = PixelEncoderPallas(obs_shape, feature_dim, num_layers=2, num_filters=32,
                               key=jax.random.PRNGKey(42), mxu_dtype=jnp.float32)
    out32 = jax.block_until_ready(jax.jit(enc32.__call__)(obs))
    ref = jax.block_until_ready(reference_forward(enc32, obs))
    np.testing.assert_allclose(np.asarray(out32), np.asarray(ref), atol=3e-3, rtol=3e-3)
    assert out32.shape == (batch, feature_dim)

    # Default fast mode (bf16 MXU operands, f32 accumulation/epilogues).
    enc16 = PixelEncoderPallas(obs_shape, feature_dim, num_layers=2, num_filters=32,
                               key=jax.random.PRNGKey(42))
    out16 = jax.block_until_ready(jax.jit(enc16.__call__)(obs))
    np.testing.assert_allclose(np.asarray(out16), np.asarray(ref), atol=6e-2, rtol=6e-2)
    assert out16.shape == (batch, feature_dim)

    print("KERNEL_OK")
</pallas_src>

<mosaic_0001>
module attributes {stable_mosaic.version = 11 : i64} {
  func.func @_encoder_kernel(%arg0: i32, %arg1: memref<1x512x16xf32, #tpu.memory_space<vmem>>, %arg2: memref<16x128xf32, #tpu.memory_space<vmem>>, %arg3: memref<1x32xf32, #tpu.memory_space<vmem>>, %arg4: memref<32x288xf32, #tpu.memory_space<vmem>>, %arg5: memref<1x32xf32, #tpu.memory_space<vmem>>, %arg6: memref<800x32xf32, #tpu.memory_space<vmem>>, %arg7: memref<1x32xf32, #tpu.memory_space<vmem>>, %arg8: memref<1x32xf32, #tpu.memory_space<vmem>>, %arg9: memref<1x32xf32, #tpu.memory_space<vmem>>, %arg10: memref<1x8x32xf32, #tpu.memory_space<vmem>>) attributes {dimension_semantics = [#tpu.dimension_semantics<parallel>], iteration_bounds = array<i64: 1>, scalar_prefetch = 0 : i64, scratch_operands = 0 : i64, tpu.core_type = #tpu.core_type<tc>, window_params = [{transform_indices = @transform_0, window_bounds = array<i64: 1, 512, 16>}, {pipeline_mode = #tpu.pipeline_mode<synchronous>, transform_indices = @transform_1, window_bounds = array<i64: 16, 128>}, {pipeline_mode = #tpu.pipeline_mode<synchronous>, transform_indices = @transform_2, window_bounds = array<i64: 1, 32>}, {pipeline_mode = #tpu.pipeline_mode<synchronous>, transform_indices = @transform_3, window_bounds = array<i64: 32, 288>}, {pipeline_mode = #tpu.pipeline_mode<synchronous>, transform_indices = @transform_4, window_bounds = array<i64: 1, 32>}, {pipeline_mode = #tpu.pipeline_mode<synchronous>, transform_indices = @transform_5, window_bounds = array<i64: 800, 32>}, {pipeline_mode = #tpu.pipeline_mode<synchronous>, transform_indices = @transform_6, window_bounds = array<i64: 1, 32>}, {pipeline_mode = #tpu.pipeline_mode<synchronous>, transform_indices = @transform_7, window_bounds = array<i64: 1, 32>}, {pipeline_mode = #tpu.pipeline_mode<synchronous>, transform_indices = @transform_8, window_bounds = array<i64: 1, 32>}, {transform_indices = @transform_9, window_bounds = array<i64: 1, 8, 32>}]} {
    %c0 = arith.constant 0 : index
    %c0_0 = arith.constant 0 : index
    %c0_1 = arith.constant 0 : index
    %0 = vector.load %arg1[%c0, %c0_0, %c0_1] : memref<1x512x16xf32, #tpu.memory_space<vmem>>, vector<1x512x16xf32>
    %1 = vector.shape_cast %0 : vector<1x512x16xf32> to vector<512x16xf32>
    %c0_2 = arith.constant 0 : index
    %c0_3 = arith.constant 0 : index
    %2 = vector.load %arg2[%c0_2, %c0_3] : memref<16x128xf32, #tpu.memory_space<vmem>>, vector<16x128xf32>
    %cst = arith.constant dense<0.000000e+00> : vector<512x128xf32>
    %3 = tpu.matmul %1, %2, %cst {dimension_numbers = #tpu.dot_dimension_numbers<[1], [0], [0], [1], [0, 0, 1, 1], [], []>} : vector<512x16xf32>, vector<16x128xf32>, vector<512x128xf32> -> vector<512x128xf32>
    %c0_4 = arith.constant 0 : index
    %c0_5 = arith.constant 0 : index
    %4 = vector.load %arg3[%c0_4, %c0_5] : memref<1x32xf32, #tpu.memory_space<vmem>>, vector<1x32xf32>
    %5 = vector.extract_strided_slice %3 {offsets = [0, 0], sizes = [56, 32], strides = [1, 1]} : vector<512x128xf32> to vector<56x32xf32>
    %6 = vector.extract_strided_slice %3 {offsets = [8, 32], sizes = [56, 32], strides = [1, 1]} : vector<512x128xf32> to vector<56x32xf32>
    %7 = arith.addf %5, %6 : vector<56x32xf32>
    %8 = vector.extract_strided_slice %3 {offsets = [64, 64], sizes = [56, 32], strides = [1, 1]} : vector<512x128xf32> to vector<56x32xf32>
    %9 = arith.addf %7, %8 : vector<56x32xf32>
    %10 = vector.extract_strided_slice %3 {offsets = [72, 96], sizes = [56, 32], strides = [1, 1]} : vector<512x128xf32> to vector<56x32xf32>
    %11 = arith.addf %9, %10 : vector<56x32xf32>
    %12 = vector.broadcast %4 : vector<1x32xf32> to vector<56x32xf32>
    %13 = arith.addf %11, %12 : vector<56x32xf32>
    %cst_6 = arith.constant 0.000000e+00 : f32
    %14 = vector.broadcast %cst_6 : f32 to vector<56x32xf32>
    %15 = arith.maximumf %13, %14 : vector<56x32xf32>
    %16 = vector.extract_strided_slice %3 {offsets = [64, 0], sizes = [56, 32], strides = [1, 1]} : vector<512x128xf32> to vector<56x32xf32>
    %17 = vector.extract_strided_slice %3 {offsets = [72, 32], sizes = [56, 32], strides = [1, 1]} : vector<512x128xf32> to vector<56x32xf32>
    %18 = arith.addf %16, %17 : vector<56x32xf32>
    %19 = vector.extract_strided_slice %3 {offsets = [128, 64], sizes = [56, 32], strides = [1, 1]} : vector<512x128xf32> to vector<56x32xf32>
    %20 = arith.addf %18, %19 : vector<56x32xf32>
    %21 = vector.extract_strided_slice %3 {offsets = [136, 96], sizes = [56, 32], strides = [1, 1]} : vector<512x128xf32> to vector<56x32xf32>
    %22 = arith.addf %20, %21 : vector<56x32xf32>
    %23 = vector.broadcast %4 : vector<1x32xf32> to vector<56x32xf32>
    %24 = arith.addf %22, %23 : vector<56x32xf32>
    %cst_7 = arith.constant 0.000000e+00 : f32
    %25 = vector.broadcast %cst_7 : f32 to vector<56x32xf32>
    %26 = arith.maximumf %24, %25 : vector<56x32xf32>
    %27 = vector.extract_strided_slice %3 {offsets = [128, 0], sizes = [56, 32], strides = [1, 1]} : vector<512x128xf32> to vector<56x32xf32>
    %28 = vector.extract_strided_slice %3 {offsets = [136, 32], sizes = [56, 32], strides = [1, 1]} : vector<512x128xf32> to vector<56x32xf32>
    %29 = arith.addf %27, %28 : vector<56x32xf32>
    %30 = vector.extract_strided_slice %3 {offsets = [192, 64], sizes = [56, 32], strides = [1, 1]} : vector<512x128xf32> to vector<56x32xf32>
    %31 = arith.addf %29, %30 : vector<56x32xf32>
    %32 = vector.extract_strided_slice %3 {offsets = [200, 96], sizes = [56, 32], strides = [1, 1]} : vector<512x128xf32> to vector<56x32xf32>
    %33 = arith.addf %31, %32 : vector<56x32xf32>
    %34 = vector.broadcast %4 : vector<1x32xf32> to vector<56x32xf32>
    %35 = arith.addf %33, %34 : vector<56x32xf32>
    %cst_8 = arith.constant 0.000000e+00 : f32
    %36 = vector.broadcast %cst_8 : f32 to vector<56x32xf32>
    %37 = arith.maximumf %35, %36 : vector<56x32xf32>
    %38 = vector.extract_strided_slice %3 {offsets = [192, 0], sizes = [56, 32], strides = [1, 1]} : vector<512x128xf32> to vector<56x32xf32>
    %39 = vector.extract_strided_slice %3 {offsets = [200, 32], sizes = [56, 32], strides = [1, 1]} : vector<512x128xf32> to vector<56x32xf32>
    %40 = arith.addf %38, %39 : vector<56x32xf32>
    %41 = vector.extract_strided_slice %3 {offsets = [256, 64], sizes = [56, 32], strides = [1, 1]} : vector<512x128xf32> to vector<56x32xf32>
    %42 = arith.addf %40, %41 : vector<56x32xf32>
    %43 = vector.extract_strided_slice %3 {offsets = [264, 96], sizes = [56, 32], strides = [1, 1]} : vector<512x128xf32> to vector<56x32xf32>
    %44 = arith.addf %42, %43 : vector<56x32xf32>
    %45 = vector.broadcast %4 : vector<1x32xf32> to vector<56x32xf32>
    %46 = arith.addf %44, %45 : vector<56x32xf32>
    %cst_9 = arith.constant 0.000000e+00 : f32
    %47 = vector.broadcast %cst_9 : f32 to vector<56x32xf32>
    %48 = arith.maximumf %46, %47 : vector<56x32xf32>
    %49 = vector.extract_strided_slice %3 {offsets = [256, 0], sizes = [56, 32], strides = [1, 1]} : vector<512x128xf32> to vector<56x32xf32>
    %50 = vector.extract_strided_slice %3 {offsets = [264, 32], sizes = [56, 32], strides = [1, 1]} : vector<512x128xf32> to vector<56x32xf32>
    %51 = arith.addf %49, %50 : vector<56x32xf32>
    %52 = vector.extract_strided_slice %3 {offsets = [320, 64], sizes = [56, 32], strides = [1, 1]} : vector<512x128xf32> to vector<56x32xf32>
    %53 = arith.addf %51, %52 : vector<56x32xf32>
    %54 = vector.extract_strided_slice %3 {offsets = [328, 96], sizes = [56, 32], strides = [1, 1]} : vector<512x128xf32> to vector<56x32xf32>
    %55 = arith.addf %53, %54 : vector<56x32xf32>
    %56 = vector.broadcast %4 : vector<1x32xf32> to vector<56x32xf32>
    %57 = arith.addf %55, %56 : vector<56x32xf32>
    %cst_10 = arith.constant 0.000000e+00 : f32
    %58 = vector.broadcast %cst_10 : f32 to vector<56x32xf32>
    %59 = arith.maximumf %57, %58 : vector<56x32xf32>
    %60 = vector.extract_strided_slice %3 {offsets = [320, 0], sizes = [56, 32], strides = [1, 1]} : vector<512x128xf32> to vector<56x32xf32>
    %61 = vector.extract_strided_slice %3 {offsets = [328, 32], sizes = [56, 32], strides = [1, 1]} : vector<512x128xf32> to vector<56x32xf32>
    %62 = arith.addf %60, %61 : vector<56x32xf32>
    %63 = vector.extract_strided_slice %3 {offsets = [384, 64], sizes = [56, 32], strides = [1, 1]} : vector<512x128xf32> to vector<56x32xf32>
    %64 = arith.addf %62, %63 : vector<56x32xf32>
    %65 = vector.extract_strided_slice %3 {offsets = [392, 96], sizes = [56, 32], strides = [1, 1]} : vector<512x128xf32> to vector<56x32xf32>
    %66 = arith.addf %64, %65 : vector<56x32xf32>
    %67 = vector.broadcast %4 : vector<1x32xf32> to vector<56x32xf32>
    %68 = arith.addf %66, %67 : vector<56x32xf32>
    %cst_11 = arith.constant 0.000000e+00 : f32
    %69 = vector.broadcast %cst_11 : f32 to vector<56x32xf32>
    %70 = arith.maximumf %68, %69 : vector<56x32xf32>
    %71 = vector.extract_strided_slice %3 {offsets = [384, 0], sizes = [56, 32], strides = [1, 1]} : vector<512x128xf32> to vector<56x32xf32>
    %72 = vector.extract_strided_slice %3 {offsets = [392, 32], sizes = [56, 32], strides = [1, 1]} : vector<512x128xf32> to vector<56x32xf32>
    %73 = arith.addf %71, %72 : vector<56x32xf32>
    %74 = vector.extract_strided_slice %3 {offsets = [448, 64], sizes = [56, 32], strides = [1, 1]} : vector<512x128xf32> to vector<56x32xf32>
    %75 = arith.addf %73, %74 : vector<56x32xf32>
    %76 = vector.extract_strided_slice %3 {offsets = [456, 96], sizes = [56, 32], strides = [1, 1]} : vector<512x128xf32> to vector<56x32xf32>
    %77 = arith.addf %75, %76 : vector<56x32xf32>
    %78 = vector.broadcast %4 : vector<1x32xf32> to vector<56x32xf32>
    %79 = arith.addf %77, %78 : vector<56x32xf32>
    %cst_12 = arith.constant 0.000000e+00 : f32
    %80 = vector.broadcast %cst_12 : f32 to vector<56x32xf32>
    %81 = arith.maximumf %79, %80 : vector<56x32xf32>
    %82 = tpu.concatenate %15, %26, %37, %48, %59, %70, %81 in 0 : vector<56x32xf32>, vector<56x32xf32>, vector<56x32xf32>, vector<56x32xf32>, vector<56x32xf32>, vector<56x32xf32>, vector<56x32xf32> -> vector<392x32xf32>
    %c0_13 = arith.constant 0 : index
    %c0_14 = arith.constant 0 : index
    %83 = vector.load %arg4[%c0_13, %c0_14] : memref<32x288xf32, #tpu.memory_space<vmem>>, vector<32x288xf32>
    %cst_15 = arith.constant dense<0.000000e+00> : vector<392x288xf32>
    %84 = tpu.matmul %82, %83, %cst_15 {dimension_numbers = #tpu.dot_dimension_numbers<[1], [0], [0], [1], [0, 0, 1, 1], [], []>} : vector<392x32xf32>, vector<32x288xf32>, vector<392x288xf32> -> vector<392x288xf32>
    %c0_16 = arith.constant 0 : index
    %c0_17 = arith.constant 0 : index
    %85 = vector.load %arg5[%c0_16, %c0_17] : memref<1x32xf32, #tpu.memory_space<vmem>>, vector<1x32xf32>
    %cst_18 = arith.constant 0.000000e+00 : f32
    %86 = vector.broadcast %cst_18 : f32 to vector<8x32xf32>
    %87 = vector.extract_strided_slice %84 {offsets = [0, 0], sizes = [40, 32], strides = [1, 1]} : vector<392x288xf32> to vector<40x32xf32>
    %88 = vector.extract_strided_slice %84 {offsets = [8, 32], sizes = [40, 32], strides = [1, 1]} : vector<392x288xf32> to vector<40x32xf32>
    %89 = arith.addf %87, %88 : vector<40x32xf32>
    %90 = vector.extract_strided_slice %84 {offsets = [16, 64], sizes = [40, 32], strides = [1, 1]} : vector<392x288xf32> to vector<40x32xf32>
    %91 = arith.addf %89, %90 : vector<40x32xf32>
    %92 = vector.extract_strided_slice %84 {offsets = [56, 96], sizes = [40, 32], strides = [1, 1]} : vector<392x288xf32> to vector<40x32xf32>
    %93 = arith.addf %91, %92 : vector<40x32xf32>
    %94 = vector.extract_strided_slice %84 {offsets = [64, 128], sizes = [40, 32], strides = [1, 1]} : vector<392x288xf32> to vector<40x32xf32>
    %95 = arith.addf %93, %94 : vector<40x32xf32>
    %96 = vector.extract_strided_slice %84 {offsets = [72, 160], sizes = [40, 32], strides = [1, 1]} : vector<392x288xf32> to vector<40x32xf32>
    %97 = arith.addf %95, %96 : vector<40x32xf32>
    %98 = vector.extract_strided_slice %84 {offsets = [112, 192], sizes = [40, 32], strides = [1, 1]} : vector<392x288xf32> to vector<40x32xf32>
    %99 = arith.addf %97, %98 : vector<40x32xf32>
    %100 = vector.extract_strided_slice %84 {offsets = [120, 224], sizes = [40, 32], strides = [1, 1]} : vector<392x288xf32> to vector<40x32xf32>
    %101 = arith.addf %99, %100 : vector<40x32xf32>
    %102 = vector.extract_strided_slice %84 {offsets = [128, 256], sizes = [40, 32], strides = [1, 1]} : vector<392x288xf32> to vector<40x32xf32>
    %103 = arith.addf %101, %102 : vector<40x32xf32>
    %104 = vector.broadcast %85 : vector<1x32xf32> to vector<40x32xf32>
    %105 = arith.addf %103, %104 : vector<40x32xf32>
    %cst_19 = arith.constant 0.000000e+00 : f32
    %106 = vector.broadcast %cst_19 : f32 to vector<40x32xf32>
    %107 = arith.maximumf %105, %106 : vector<40x32xf32>
    %108 = vector.extract_strided_slice %107 {offsets = [0, 0], sizes = [8, 32], strides = [1, 1]} : vector<40x32xf32> to vector<8x32xf32>
    %c0_20 = arith.constant 0 : index
    %c0_21 = arith.constant 0 : index
    %109 = vector.load %arg6[%c0_20, %c0_21] : memref<800x32xf32, #tpu.memory_space<vmem>>, vector<32x32xf32>
    %cst_22 = arith.constant dense<0.000000e+00> : vector<8x32xf32>
    %110 = tpu.matmul %108, %109, %cst_22 {dimension_numbers = #tpu.dot_dimension_numbers<[1], [0], [0], [1], [0, 0, 1, 1], [], []>} : vector<8x32xf32>, vector<32x32xf32>, vector<8x32xf32> -> vector<8x32xf32>
    %111 = arith.addf %86, %110 : vector<8x32xf32>
    %112 = vector.extract_strided_slice %107 {offsets = [8, 0], sizes = [8, 32], strides = [1, 1]} : vector<40x32xf32> to vector<8x32xf32>
    %c32 = arith.constant 32 : index
    %c0_23 = arith.constant 0 : index
    %113 = vector.load %arg6[%c32, %c0_23] : memref<800x32xf32, #tpu.memory_space<vmem>>, vector<32x32xf32>
    %cst_24 = arith.constant dense<0.000000e+00> : vector<8x32xf32>
    %114 = tpu.matmul %112, %113, %cst_24 {dimension_numbers = #tpu.dot_dimension_numbers<[1], [0], [0], [1], [0, 0, 1, 1], [], []>} : vector<8x32xf32>, vector<32x32xf32>, vector<8x32xf32> -> vector<8x32xf32>
    %115 = arith.addf %111, %114 : vector<8x32xf32>
    %116 = vector.extract_strided_slice %107 {offsets = [16, 0], sizes = [8, 32], strides = [1, 1]} : vector<40x32xf32> to vector<8x32xf32>
    %c64 = arith.constant 64 : index
    %c0_25 = arith.constant 0 : index
    %117 = vector.load %arg6[%c64, %c0_25] : memref<800x32xf32, #tpu.memory_space<vmem>>, vector<32x32xf32>
    %cst_26 = arith.constant dense<0.000000e+00> : vector<8x32xf32>
    %118 = tpu.matmul %116, %117, %cst_26 {dimension_numbers = #tpu.dot_dimension_numbers<[1], [0], [0], [1], [0, 0, 1, 1], [], []>} : vector<8x32xf32>, vector<32x32xf32>, vector<8x32xf32> -> vector<8x32xf32>
    %119 = arith.addf %115, %118 : vector<8x32xf32>
    %120 = vector.extract_strided_slice %107 {offsets = [24, 0], sizes = [8, 32], strides = [1, 1]} : vector<40x32xf32> to vector<8x32xf32>
    %c96 = arith.constant 96 : index
    %c0_27 = arith.constant 0 : index
    %121 = vector.load %arg6[%c96, %c0_27] : memref<800x32xf32, #tpu.memory_space<vmem>>, vector<32x32xf32>
    %cst_28 = arith.constant dense<0.000000e+00> : vector<8x32xf32>
    %122 = tpu.matmul %120, %121, %cst_28 {dimension_numbers = #tpu.dot_dimension_numbers<[1], [0], [0], [1], [0, 0, 1, 1], [], []>} : vector<8x32xf32>, vector<32x32xf32>, vector<8x32xf32> -> vector<8x32xf32>
    %123 = arith.addf %119, %122 : vector<8x32xf32>
    %124 = vector.extract_strided_slice %107 {offsets = [32, 0], sizes = [8, 32], strides = [1, 1]} : vector<40x32xf32> to vector<8x32xf32>
    %c128 = arith.constant 128 : index
    %c0_29 = arith.constant 0 : index
    %125 = vector.load %arg6[%c128, %c0_29] : memref<800x32xf32, #tpu.memory_space<vmem>>, vector<32x32xf32>
    %cst_30 = arith.constant dense<0.000000e+00> : vector<8x32xf32>
    %126 = tpu.matmul %124, %125, %cst_30 {dimension_numbers = #tpu.dot_dimension_numbers<[1], [0], [0], [1], [0, 0, 1, 1], [], []>} : vector<8x32xf32>, vector<32x32xf32>, vector<8x32xf32> -> vector<8x32xf32>
    %127 = arith.addf %123, %126 : vector<8x32xf32>
    %128 = vector.extract_strided_slice %84 {offsets = [56, 0], sizes = [40, 32], strides = [1, 1]} : vector<392x288xf32> to vector<40x32xf32>
    %129 = vector.extract_strided_slice %84 {offsets = [64, 32], sizes = [40, 32], strides = [1, 1]} : vector<392x288xf32> to vector<40x32xf32>
    %130 = arith.addf %128, %129 : vector<40x32xf32>
    %131 = vector.extract_strided_slice %84 {offsets = [72, 64], sizes = [40, 32], strides = [1, 1]} : vector<392x288xf32> to vector<40x32xf32>
    %132 = arith.addf %130, %131 : vector<40x32xf32>
    %133 = vector.extract_strided_slice %84 {offsets = [112, 96], sizes = [40, 32], strides = [1, 1]} : vector<392x288xf32> to vector<40x32xf32>
    %134 = arith.addf %132, %133 : vector<40x32xf32>
    %135 = vector.extract_strided_slice %84 {offsets = [120, 128], sizes = [40, 32], strides = [1, 1]} : vector<392x288xf32> to vector<40x32xf32>
    %136 = arith.addf %134, %135 : vector<40x32xf32>
    %137 = vector.extract_strided_slice %84 {offsets = [128, 160], sizes = [40, 32], strides = [1, 1]} : vector<392x288xf32> to vector<40x32xf32>
    %138 = arith.addf %136, %137 : vector<40x32xf32>
    %139 = vector.extract_strided_slice %84 {offsets = [168, 192], sizes = [40, 32], strides = [1, 1]} : vector<392x288xf32> to vector<40x32xf32>
    %140 = arith.addf %138, %139 : vector<40x32xf32>
    %141 = vector.extract_strided_slice %84 {offsets = [176, 224], sizes = [40, 32], strides = [1, 1]} : vector<392x288xf32> to vector<40x32xf32>
    %142 = arith.addf %140, %141 : vector<40x32xf32>
    %143 = vector.extract_strided_slice %84 {offsets = [184, 256], sizes = [40, 32], strides = [1, 1]} : vector<392x288xf32> to vector<40x32xf32>
    %144 = arith.addf %142, %143 : vector<40x32xf32>
    %145 = vector.broadcast %85 : vector<1x32xf32> to vector<40x32xf32>
    %146 = arith.addf %144, %145 : vector<40x32xf32>
    %cst_31 = arith.constant 0.000000e+00 : f32
    %147 = vector.broadcast %cst_31 : f32 to vector<40x32xf32>
    %148 = arith.maximumf %146, %147 : vector<40x32xf32>
    %149 = vector.extract_strided_slice %148 {offsets = [0, 0], sizes = [8, 32], strides = [1, 1]} : vector<40x32xf32> to vector<8x32xf32>
    %c160 = arith.constant 160 : index
    %c0_32 = arith.constant 0 : index
    %150 = vector.load %arg6[%c160, %c0_32] : memref<800x32xf32, #tpu.memory_space<vmem>>, vector<32x32xf32>
    %cst_33 = arith.constant dense<0.000000e+00> : vector<8x32xf32>
    %151 = tpu.matmul %149, %150, %cst_33 {dimension_numbers = #tpu.dot_dimension_numbers<[1], [0], [0], [1], [0, 0, 1, 1], [], []>} : vector<8x32xf32>, vector<32x32xf32>, vector<8x32xf32> -> vector<8x32xf32>
    %152 = arith.addf %127, %151 : vector<8x32xf32>
    %153 = vector.extract_strided_slice %148 {offsets = [8, 0], sizes = [8, 32], strides = [1, 1]} : vector<40x32xf32> to vector<8x32xf32>
    %c192 = arith.constant 192 : index
    %c0_34 = arith.constant 0 : index
    %154 = vector.load %arg6[%c192, %c0_34] : memref<800x32xf32, #tpu.memory_space<vmem>>, vector<32x32xf32>
    %cst_35 = arith.constant dense<0.000000e+00> : vector<8x32xf32>
    %155 = tpu.matmul %153, %154, %cst_35 {dimension_numbers = #tpu.dot_dimension_numbers<[1], [0], [0], [1], [0, 0, 1, 1], [], []>} : vector<8x32xf32>, vector<32x32xf32>, vector<8x32xf32> -> vector<8x32xf32>
    %156 = arith.addf %152, %155 : vector<8x32xf32>
    %157 = vector.extract_strided_slice %148 {offsets = [16, 0], sizes = [8, 32], strides = [1, 1]} : vector<40x32xf32> to vector<8x32xf32>
    %c224 = arith.constant 224 : index
    %c0_36 = arith.constant 0 : index
    %158 = vector.load %arg6[%c224, %c0_36] : memref<800x32xf32, #tpu.memory_space<vmem>>, vector<32x32xf32>
    %cst_37 = arith.constant dense<0.000000e+00> : vector<8x32xf32>
    %159 = tpu.matmul %157, %158, %cst_37 {dimension_numbers = #tpu.dot_dimension_numbers<[1], [0], [0], [1], [0, 0, 1, 1], [], []>} : vector<8x32xf32>, vector<32x32xf32>, vector<8x32xf32> -> vector<8x32xf32>
    %160 = arith.addf %156, %159 : vector<8x32xf32>
    %161 = vector.extract_strided_slice %148 {offsets = [24, 0], sizes = [8, 32], strides = [1, 1]} : vector<40x32xf32> to vector<8x32xf32>
    %c256 = arith.constant 256 : index
    %c0_38 = arith.constant 0 : index
    %162 = vector.load %arg6[%c256, %c0_38] : memref<800x32xf32, #tpu.memory_space<vmem>>, vector<32x32xf32>
    %cst_39 = arith.constant dense<0.000000e+00> : vector<8x32xf32>
    %163 = tpu.matmul %161, %162, %cst_39 {dimension_numbers = #tpu.dot_dimension_numbers<[1], [0], [0], [1], [0, 0, 1, 1], [], []>} : vector<8x32xf32>, vector<32x32xf32>, vector<8x32xf32> -> vector<8x32xf32>
    %164 = arith.addf %160, %163 : vector<8x32xf32>
    %165 = vector.extract_strided_slice %148 {offsets = [32, 0], sizes = [8, 32], strides = [1, 1]} : vector<40x32xf32> to vector<8x32xf32>
    %c288 = arith.constant 288 : index
    %c0_40 = arith.constant 0 : index
    %166 = vector.load %arg6[%c288, %c0_40] : memref<800x32xf32, #tpu.memory_space<vmem>>, vector<32x32xf32>
    %cst_41 = arith.constant dense<0.000000e+00> : vector<8x32xf32>
    %167 = tpu.matmul %165, %166, %cst_41 {dimension_numbers = #tpu.dot_dimension_numbers<[1], [0], [0], [1], [0, 0, 1, 1], [], []>} : vector<8x32xf32>, vector<32x32xf32>, vector<8x32xf32> -> vector<8x32xf32>
    %168 = arith.addf %164, %167 : vector<8x32xf32>
    %169 = vector.extract_strided_slice %84 {offsets = [112, 0], sizes = [40, 32], strides = [1, 1]} : vector<392x288xf32> to vector<40x32xf32>
    %170 = vector.extract_strided_slice %84 {offsets = [120, 32], sizes = [40, 32], strides = [1, 1]} : vector<392x288xf32> to vector<40x32xf32>
    %171 = arith.addf %169, %170 : vector<40x32xf32>
    %172 = vector.extract_strided_slice %84 {offsets = [128, 64], sizes = [40, 32], strides = [1, 1]} : vector<392x288xf32> to vector<40x32xf32>
    %173 = arith.addf %171, %172 : vector<40x32xf32>
    %174 = vector.extract_strided_slice %84 {offsets = [168, 96], sizes = [40, 32], strides = [1, 1]} : vector<392x288xf32> to vector<40x32xf32>
    %175 = arith.addf %173, %174 : vector<40x32xf32>
    %176 = vector.extract_strided_slice %84 {offsets = [176, 128], sizes = [40, 32], strides = [1, 1]} : vector<392x288xf32> to vector<40x32xf32>
    %177 = arith.addf %175, %176 : vector<40x32xf32>
    %178 = vector.extract_strided_slice %84 {offsets = [184, 160], sizes = [40, 32], strides = [1, 1]} : vector<392x288xf32> to vector<40x32xf32>
    %179 = arith.addf %177, %178 : vector<40x32xf32>
    %180 = vector.extract_strided_slice %84 {offsets = [224, 192], sizes = [40, 32], strides = [1, 1]} : vector<392x288xf32> to vector<40x32xf32>
    %181 = arith.addf %179, %180 : vector<40x32xf32>
    %182 = vector.extract_strided_slice %84 {offsets = [232, 224], sizes = [40, 32], strides = [1, 1]} : vector<392x288xf32> to vector<40x32xf32>
    %183 = arith.addf %181, %182 : vector<40x32xf32>
    %184 = vector.extract_strided_slice %84 {offsets = [240, 256], sizes = [40, 32], strides = [1, 1]} : vector<392x288xf32> to vector<40x32xf32>
    %185 = arith.addf %183, %184 : vector<40x32xf32>
    %186 = vector.broadcast %85 : vector<1x32xf32> to vector<40x32xf32>
    %187 = arith.addf %185, %186 : vector<40x32xf32>
    %cst_42 = arith.constant 0.000000e+00 : f32
    %188 = vector.broadcast %cst_42 : f32 to vector<40x32xf32>
    %189 = arith.maximumf %187, %188 : vector<40x32xf32>
    %190 = vector.extract_strided_slice %189 {offsets = [0, 0], sizes = [8, 32], strides = [1, 1]} : vector<40x32xf32> to vector<8x32xf32>
    %c320 = arith.constant 320 : index
    %c0_43 = arith.constant 0 : index
    %191 = vector.load %arg6[%c320, %c0_43] : memref<800x32xf32, #tpu.memory_space<vmem>>, vector<32x32xf32>
    %cst_44 = arith.constant dense<0.000000e+00> : vector<8x32xf32>
    %192 = tpu.matmul %190, %191, %cst_44 {dimension_numbers = #tpu.dot_dimension_numbers<[1], [0], [0], [1], [0, 0, 1, 1], [], []>} : vector<8x32xf32>, vector<32x32xf32>, vector<8x32xf32> -> vector<8x32xf32>
    %193 = arith.addf %168, %192 : vector<8x32xf32>
    %194 = vector.extract_strided_slice %189 {offsets = [8, 0], sizes = [8, 32], strides = [1, 1]} : vector<40x32xf32> to vector<8x32xf32>
    %c352 = arith.constant 352 : index
    %c0_45 = arith.constant 0 : index
    %195 = vector.load %arg6[%c352, %c0_45] : memref<800x32xf32, #tpu.memory_space<vmem>>, vector<32x32xf32>
    %cst_46 = arith.constant dense<0.000000e+00> : vector<8x32xf32>
    %196 = tpu.matmul %194, %195, %cst_46 {dimension_numbers = #tpu.dot_dimension_numbers<[1], [0], [0], [1], [0, 0, 1, 1], [], []>} : vector<8x32xf32>, vector<32x32xf32>, vector<8x32xf32> -> vector<8x32xf32>
    %197 = arith.addf %193, %196 : vector<8x32xf32>
    %198 = vector.extract_strided_slice %189 {offsets = [16, 0], sizes = [8, 32], strides = [1, 1]} : vector<40x32xf32> to vector<8x32xf32>
    %c384 = arith.constant 384 : index
    %c0_47 = arith.constant 0 : index
    %199 = vector.load %arg6[%c384, %c0_47] : memref<800x32xf32, #tpu.memory_space<vmem>>, vector<32x32xf32>
    %cst_48 = arith.constant dense<0.000000e+00> : vector<8x32xf32>
    %200 = tpu.matmul %198, %199, %cst_48 {dimension_numbers = #tpu.dot_dimension_numbers<[1], [0], [0], [1], [0, 0, 1, 1], [], []>} : vector<8x32xf32>, vector<32x32xf32>, vector<8x32xf32> -> vector<8x32xf32>
    %201 = arith.addf %197, %200 : vector<8x32xf32>
    %202 = vector.extract_strided_slice %189 {offsets = [24, 0], sizes = [8, 32], strides = [1, 1]} : vector<40x32xf32> to vector<8x32xf32>
    %c416 = arith.constant 416 : index
    %c0_49 = arith.constant 0 : index
    %203 = vector.load %arg6[%c416, %c0_49] : memref<800x32xf32, #tpu.memory_space<vmem>>, vector<32x32xf32>
    %cst_50 = arith.constant dense<0.000000e+00> : vector<8x32xf32>
    %204 = tpu.matmul %202, %203, %cst_50 {dimension_numbers = #tpu.dot_dimension_numbers<[1], [0], [0], [1], [0, 0, 1, 1], [], []>} : vector<8x32xf32>, vector<32x32xf32>, vector<8x32xf32> -> vector<8x32xf32>
    %205 = arith.addf %201, %204 : vector<8x32xf32>
    %206 = vector.extract_strided_slice %189 {offsets = [32, 0], sizes = [8, 32], strides = [1, 1]} : vector<40x32xf32> to vector<8x32xf32>
    %c448 = arith.constant 448 : index
    %c0_51 = arith.constant 0 : index
    %207 = vector.load %arg6[%c448, %c0_51] : memref<800x32xf32, #tpu.memory_space<vmem>>, vector<32x32xf32>
    %cst_52 = arith.constant dense<0.000000e+00> : vector<8x32xf32>
    %208 = tpu.matmul %206, %207, %cst_52 {dimension_numbers = #tpu.dot_dimension_numbers<[1], [0], [0], [1], [0, 0, 1, 1], [], []>} : vector<8x32xf32>, vector<32x32xf32>, vector<8x32xf32> -> vector<8x32xf32>
    %209 = arith.addf %205, %208 : vector<8x32xf32>
    %210 = vector.extract_strided_slice %84 {offsets = [168, 0], sizes = [40, 32], strides = [1, 1]} : vector<392x288xf32> to vector<40x32xf32>
    %211 = vector.extract_strided_slice %84 {offsets = [176, 32], sizes = [40, 32], strides = [1, 1]} : vector<392x288xf32> to vector<40x32xf32>
    %212 = arith.addf %210, %211 : vector<40x32xf32>
    %213 = vector.extract_strided_slice %84 {offsets = [184, 64], sizes = [40, 32], strides = [1, 1]} : vector<392x288xf32> to vector<40x32xf32>
    %214 = arith.addf %212, %213 : vector<40x32xf32>
    %215 = vector.extract_strided_slice %84 {offsets = [224, 96], sizes = [40, 32], strides = [1, 1]} : vector<392x288xf32> to vector<40x32xf32>
    %216 = arith.addf %214, %215 : vector<40x32xf32>
    %217 = vector.extract_strided_slice %84 {offsets = [232, 128], sizes = [40, 32], strides = [1, 1]} : vector<392x288xf32> to vector<40x32xf32>
    %218 = arith.addf %216, %217 : vector<40x32xf32>
    %219 = vector.extract_strided_slice %84 {offsets = [240, 160], sizes = [40, 32], strides = [1, 1]} : vector<392x288xf32> to vector<40x32xf32>
    %220 = arith.addf %218, %219 : vector<40x32xf32>
    %221 = vector.extract_strided_slice %84 {offsets = [280, 192], sizes = [40, 32], strides = [1, 1]} : vector<392x288xf32> to vector<40x32xf32>
    %222 = arith.addf %220, %221 : vector<40x32xf32>
    %223 = vector.extract_strided_slice %84 {offsets = [288, 224], sizes = [40, 32], strides = [1, 1]} : vector<392x288xf32> to vector<40x32xf32>
    %224 = arith.addf %222, %223 : vector<40x32xf32>
    %225 = vector.extract_strided_slice %84 {offsets = [296, 256], sizes = [40, 32], strides = [1, 1]} : vector<392x288xf32> to vector<40x32xf32>
    %226 = arith.addf %224, %225 : vector<40x32xf32>
    %227 = vector.broadcast %85 : vector<1x32xf32> to vector<40x32xf32>
    %228 = arith.addf %226, %227 : vector<40x32xf32>
    %cst_53 = arith.constant 0.000000e+00 : f32
    %229 = vector.broadcast %cst_53 : f32 to vector<40x32xf32>
    %230 = arith.maximumf %228, %229 : vector<40x32xf32>
    %231 = vector.extract_strided_slice %230 {offsets = [0, 0], sizes = [8, 32], strides = [1, 1]} : vector<40x32xf32> to vector<8x32xf32>
    %c480 = arith.constant 480 : index
    %c0_54 = arith.constant 0 : index
    %232 = vector.load %arg6[%c480, %c0_54] : memref<800x32xf32, #tpu.memory_space<vmem>>, vector<32x32xf32>
    %cst_55 = arith.constant dense<0.000000e+00> : vector<8x32xf32>
    %233 = tpu.matmul %231, %232, %cst_55 {dimension_numbers = #tpu.dot_dimension_numbers<[1], [0], [0], [1], [0, 0, 1, 1], [], []>} : vector<8x32xf32>, vector<32x32xf32>, vector<8x32xf32> -> vector<8x32xf32>
    %234 = arith.addf %209, %233 : vector<8x32xf32>
    %235 = vector.extract_strided_slice %230 {offsets = [8, 0], sizes = [8, 32], strides = [1, 1]} : vector<40x32xf32> to vector<8x32xf32>
    %c512 = arith.constant 512 : index
    %c0_56 = arith.constant 0 : index
    %236 = vector.load %arg6[%c512, %c0_56] : memref<800x32xf32, #tpu.memory_space<vmem>>, vector<32x32xf32>
    %cst_57 = arith.constant dense<0.000000e+00> : vector<8x32xf32>
    %237 = tpu.matmul %235, %236, %cst_57 {dimension_numbers = #tpu.dot_dimension_numbers<[1], [0], [0], [1], [0, 0, 1, 1], [], []>} : vector<8x32xf32>, vector<32x32xf32>, vector<8x32xf32> -> vector<8x32xf32>
    %238 = arith.addf %234, %237 : vector<8x32xf32>
    %239 = vector.extract_strided_slice %230 {offsets = [16, 0], sizes = [8, 32], strides = [1, 1]} : vector<40x32xf32> to vector<8x32xf32>
    %c544 = arith.constant 544 : index
    %c0_58 = arith.constant 0 : index
    %240 = vector.load %arg6[%c544, %c0_58] : memref<800x32xf32, #tpu.memory_space<vmem>>, vector<32x32xf32>
    %cst_59 = arith.constant dense<0.000000e+00> : vector<8x32xf32>
    %241 = tpu.matmul %239, %240, %cst_59 {dimension_numbers = #tpu.dot_dimension_numbers<[1], [0], [0], [1], [0, 0, 1, 1], [], []>} : vector<8x32xf32>, vector<32x32xf32>, vector<8x32xf32> -> vector<8x32xf32>
    %242 = arith.addf %238, %241 : vector<8x32xf32>
    %243 = vector.extract_strided_slice %230 {offsets = [24, 0], sizes = [8, 32], strides = [1, 1]} : vector<40x32xf32> to vector<8x32xf32>
    %c576 = arith.constant 576 : index
    %c0_60 = arith.constant 0 : index
    %244 = vector.load %arg6[%c576, %c0_60] : memref<800x32xf32, #tpu.memory_space<vmem>>, vector<32x32xf32>
    %cst_61 = arith.constant dense<0.000000e+00> : vector<8x32xf32>
    %245 = tpu.matmul %243, %244, %cst_61 {dimension_numbers = #tpu.dot_dimension_numbers<[1], [0], [0], [1], [0, 0, 1, 1], [], []>} : vector<8x32xf32>, vector<32x32xf32>, vector<8x32xf32> -> vector<8x32xf32>
    %246 = arith.addf %242, %245 : vector<8x32xf32>
    %247 = vector.extract_strided_slice %230 {offsets = [32, 0], sizes = [8, 32], strides = [1, 1]} : vector<40x32xf32> to vector<8x32xf32>
    %c608 = arith.constant 608 : index
    %c0_62 = arith.constant 0 : index
    %248 = vector.load %arg6[%c608, %c0_62] : memref<800x32xf32, #tpu.memory_space<vmem>>, vector<32x32xf32>
    %cst_63 = arith.constant dense<0.000000e+00> : vector<8x32xf32>
    %249 = tpu.matmul %247, %248, %cst_63 {dimension_numbers = #tpu.dot_dimension_numbers<[1], [0], [0], [1], [0, 0, 1, 1], [], []>} : vector<8x32xf32>, vector<32x32xf32>, vector<8x32xf32> -> vector<8x32xf32>
    %250 = arith.addf %246, %249 : vector<8x32xf32>
    %251 = vector.extract_strided_slice %84 {offsets = [224, 0], sizes = [40, 32], strides = [1, 1]} : vector<392x288xf32> to vector<40x32xf32>
    %252 = vector.extract_strided_slice %84 {offsets = [232, 32], sizes = [40, 32], strides = [1, 1]} : vector<392x288xf32> to vector<40x32xf32>
    %253 = arith.addf %251, %252 : vector<40x32xf32>
    %254 = vector.extract_strided_slice %84 {offsets = [240, 64], sizes = [40, 32], strides = [1, 1]} : vector<392x288xf32> to vector<40x32xf32>
    %255 = arith.addf %253, %254 : vector<40x32xf32>
    %256 = vector.extract_strided_slice %84 {offsets = [280, 96], sizes = [40, 32], strides = [1, 1]} : vector<392x288xf32> to vector<40x32xf32>
    %257 = arith.addf %255, %256 : vector<40x32xf32>
    %258 = vector.extract_strided_slice %84 {offsets = [288, 128], sizes = [40, 32], strides = [1, 1]} : vector<392x288xf32> to vector<40x32xf32>
    %259 = arith.addf %257, %258 : vector<40x32xf32>
    %260 = vector.extract_strided_slice %84 {offsets = [296, 160], sizes = [40, 32], strides = [1, 1]} : vector<392x288xf32> to vector<40x32xf32>
    %261 = arith.addf %259, %260 : vector<40x32xf32>
    %262 = vector.extract_strided_slice %84 {offsets = [336, 192], sizes = [40, 32], strides = [1, 1]} : vector<392x288xf32> to vector<40x32xf32>
    %263 = arith.addf %261, %262 : vector<40x32xf32>
    %264 = vector.extract_strided_slice %84 {offsets = [344, 224], sizes = [40, 32], strides = [1, 1]} : vector<392x288xf32> to vector<40x32xf32>
    %265 = arith.addf %263, %264 : vector<40x32xf32>
    %266 = vector.extract_strided_slice %84 {offsets = [352, 256], sizes = [40, 32], strides = [1, 1]} : vector<392x288xf32> to vector<40x32xf32>
    %267 = arith.addf %265, %266 : vector<40x32xf32>
    %268 = vector.broadcast %85 : vector<1x32xf32> to vector<40x32xf32>
    %269 = arith.addf %267, %268 : vector<40x32xf32>
    %cst_64 = arith.constant 0.000000e+00 : f32
    %270 = vector.broadcast %cst_64 : f32 to vector<40x32xf32>
    %271 = arith.maximumf %269, %270 : vector<40x32xf32>
    %272 = vector.extract_strided_slice %271 {offsets = [0, 0], sizes = [8, 32], strides = [1, 1]} : vector<40x32xf32> to vector<8x32xf32>
    %c640 = arith.constant 640 : index
    %c0_65 = arith.constant 0 : index
    %273 = vector.load %arg6[%c640, %c0_65] : memref<800x32xf32, #tpu.memory_space<vmem>>, vector<32x32xf32>
    %cst_66 = arith.constant dense<0.000000e+00> : vector<8x32xf32>
    %274 = tpu.matmul %272, %273, %cst_66 {dimension_numbers = #tpu.dot_dimension_numbers<[1], [0], [0], [1], [0, 0, 1, 1], [], []>} : vector<8x32xf32>, vector<32x32xf32>, vector<8x32xf32> -> vector<8x32xf32>
    %275 = arith.addf %250, %274 : vector<8x32xf32>
    %276 = vector.extract_strided_slice %271 {offsets = [8, 0], sizes = [8, 32], strides = [1, 1]} : vector<40x32xf32> to vector<8x32xf32>
    %c672 = arith.constant 672 : index
    %c0_67 = arith.constant 0 : index
    %277 = vector.load %arg6[%c672, %c0_67] : memref<800x32xf32, #tpu.memory_space<vmem>>, vector<32x32xf32>
    %cst_68 = arith.constant dense<0.000000e+00> : vector<8x32xf32>
    %278 = tpu.matmul %276, %277, %cst_68 {dimension_numbers = #tpu.dot_dimension_numbers<[1], [0], [0], [1], [0, 0, 1, 1], [], []>} : vector<8x32xf32>, vector<32x32xf32>, vector<8x32xf32> -> vector<8x32xf32>
    %279 = arith.addf %275, %278 : vector<8x32xf32>
    %280 = vector.extract_strided_slice %271 {offsets = [16, 0], sizes = [8, 32], strides = [1, 1]} : vector<40x32xf32> to vector<8x32xf32>
    %c704 = arith.constant 704 : index
    %c0_69 = arith.constant 0 : index
    %281 = vector.load %arg6[%c704, %c0_69] : memref<800x32xf32, #tpu.memory_space<vmem>>, vector<32x32xf32>
    %cst_70 = arith.constant dense<0.000000e+00> : vector<8x32xf32>
    %282 = tpu.matmul %280, %281, %cst_70 {dimension_numbers = #tpu.dot_dimension_numbers<[1], [0], [0], [1], [0, 0, 1, 1], [], []>} : vector<8x32xf32>, vector<32x32xf32>, vector<8x32xf32> -> vector<8x32xf32>
    %283 = arith.addf %279, %282 : vector<8x32xf32>
    %284 = vector.extract_strided_slice %271 {offsets = [24, 0], sizes = [8, 32], strides = [1, 1]} : vector<40x32xf32> to vector<8x32xf32>
    %c736 = arith.constant 736 : index
    %c0_71 = arith.constant 0 : index
    %285 = vector.load %arg6[%c736, %c0_71] : memref<800x32xf32, #tpu.memory_space<vmem>>, vector<32x32xf32>
    %cst_72 = arith.constant dense<0.000000e+00> : vector<8x32xf32>
    %286 = tpu.matmul %284, %285, %cst_72 {dimension_numbers = #tpu.dot_dimension_numbers<[1], [0], [0], [1], [0, 0, 1, 1], [], []>} : vector<8x32xf32>, vector<32x32xf32>, vector<8x32xf32> -> vector<8x32xf32>
    %287 = arith.addf %283, %286 : vector<8x32xf32>
    %288 = vector.extract_strided_slice %271 {offsets = [32, 0], sizes = [8, 32], strides = [1, 1]} : vector<40x32xf32> to vector<8x32xf32>
    %c768 = arith.constant 768 : index
    %c0_73 = arith.constant 0 : index
    %289 = vector.load %arg6[%c768, %c0_73] : memref<800x32xf32, #tpu.memory_space<vmem>>, vector<32x32xf32>
    %cst_74 = arith.constant dense<0.000000e+00> : vector<8x32xf32>
    %290 = tpu.matmul %288, %289, %cst_74 {dimension_numbers = #tpu.dot_dimension_numbers<[1], [0], [0], [1], [0, 0, 1, 1], [], []>} : vector<8x32xf32>, vector<32x32xf32>, vector<8x32xf32> -> vector<8x32xf32>
    %291 = arith.addf %287, %290 : vector<8x32xf32>
    %c0_75 = arith.constant 0 : index
    %c0_76 = arith.constant 0 : index
    %292 = vector.load %arg7[%c0_75, %c0_76] : memref<1x32xf32, #tpu.memory_space<vmem>>, vector<1x32xf32>
    %293 = vector.broadcast %292 : vector<1x32xf32> to vector<8x32xf32>
    %294 = arith.addf %291, %293 : vector<8x32xf32>
    %cst_77 = arith.constant dense<0.000000e+00> : vector<8xf32>
    %295 = vector.multi_reduction <add>, %294, %cst_77 [1] : vector<8x32xf32> to vector<8xf32>
    %296 = vector.shape_cast %295 : vector<8xf32> to vector<8x1xf32>
    %cst_78 = arith.constant 3.200000e+01 : f32
    %297 = vector.broadcast %cst_78 : f32 to vector<8x1xf32>
    %298 = arith.divf %296, %297 : vector<8x1xf32>
    %299 = vector.broadcast %298 : vector<8x1xf32> to vector<8x32xf32>
    %300 = arith.subf %294, %299 : vector<8x32xf32>
    %301 = arith.mulf %300, %300 : vector<8x32xf32>
    %cst_79 = arith.constant dense<0.000000e+00> : vector<8xf32>
    %302 = vector.multi_reduction <add>, %301, %cst_79 [1] : vector<8x32xf32> to vector<8xf32>
    %303 = vector.shape_cast %302 : vector<8xf32> to vector<8x1xf32>
    %cst_80 = arith.constant 3.200000e+01 : f32
    %304 = vector.broadcast %cst_80 : f32 to vector<8x1xf32>
    %305 = arith.divf %303, %304 : vector<8x1xf32>
    %306 = vector.broadcast %298 : vector<8x1xf32> to vector<8x32xf32>
    %307 = arith.subf %294, %306 : vector<8x32xf32>
    %cst_81 = arith.constant 9.99999974E-6 : f32
    %308 = vector.broadcast %cst_81 : f32 to vector<8x1xf32>
    %309 = arith.addf %305, %308 : vector<8x1xf32>
    %310 = math.rsqrt %309 : vector<8x1xf32>
    %311 = vector.broadcast %310 : vector<8x1xf32> to vector<8x32xf32>
    %312 = arith.mulf %307, %311 : vector<8x32xf32>
    %c0_82 = arith.constant 0 : index
    %c0_83 = arith.constant 0 : index
    %313 = vector.load %arg8[%c0_82, %c0_83] : memref<1x32xf32, #tpu.memory_space<vmem>>, vector<1x32xf32>
    %314 = vector.broadcast %313 : vector<1x32xf32> to vector<8x32xf32>
    %315 = arith.mulf %312, %314 : vector<8x32xf32>
    %c0_84 = arith.constant 0 : index
    %c0_85 = arith.constant 0 : index
    %316 = vector.load %arg9[%c0_84, %c0_85] : memref<1x32xf32, #tpu.memory_space<vmem>>, vector<1x32xf32>
    %317 = vector.broadcast %316 : vector<1x32xf32> to vector<8x32xf32>
    %318 = arith.addf %315, %317 : vector<8x32xf32>
    %319 = math.tanh %318 : vector<8x32xf32>
    %c0_86 = arith.constant 0 : index
    %c0_87 = arith.constant 0 : index
    %c0_88 = arith.constant 0 : index
    %320 = vector.load %arg10[%c0_86, %c0_87, %c0_88] : memref<1x8x32xf32, #tpu.memory_space<vmem>>, vector<1x8x32xf32>
    %321 = vector.shape_cast %320 : vector<1x8x32xf32> to vector<8x32xf32>
    %322 = vector.shape_cast %319 : vector<8x32xf32> to vector<1x8x32xf32>
    tpu.vector_store %arg10[%c0_86, %c0_87, %c0_88], %322 {strides = array<i32>} : memref<1x8x32xf32, #tpu.memory_space<vmem>>, vector<1x8x32xf32>,
    return
  }
  func.func @transform_0(%arg0: i32) -> (i32, i32, i32) {
    %c0_i32 = arith.constant 0 : i32
    %c0_i32_0 = arith.constant 0 : i32
    %c0_i32_1 = arith.constant 0 : i32
    return %arg0, %c0_i32, %c0_i32_0 : i32, i32, i32
  }
  func.func @transform_1(%arg0: i32) -> (i32, i32) {
    %c0_i32 = arith.constant 0 : i32
    %c0_i32_0 = arith.constant 0 : i32
    %c0_i32_1 = arith.constant 0 : i32
    return %c0_i32, %c0_i32_0 : i32, i32
  }
  func.func @transform_2(%arg0: i32) -> (i32, i32) {
    %c0_i32 = arith.constant 0 : i32
    %c0_i32_0 = arith.constant 0 : i32
    %c0_i32_1 = arith.constant 0 : i32
    return %c0_i32, %c0_i32_0 : i32, i32
  }
  func.func @transform_3(%arg0: i32) -> (i32, i32) {
    %c0_i32 = arith.constant 0 : i32
    %c0_i32_0 = arith.constant 0 : i32
    %c0_i32_1 = arith.constant 0 : i32
    return %c0_i32, %c0_i32_0 : i32, i32
  }
  func.func @transform_4(%arg0: i32) -> (i32, i32) {
    %c0_i32 = arith.constant 0 : i32
    %c0_i32_0 = arith.constant 0 : i32
    %c0_i32_1 = arith.constant 0 : i32
    return %c0_i32, %c0_i32_0 : i32, i32
  }
  func.func @transform_5(%arg0: i32) -> (i32, i32) {
    %c0_i32 = arith.constant 0 : i32
    %c0_i32_0 = arith.constant 0 : i32
    %c0_i32_1 = arith.constant 0 : i32
    return %c0_i32, %c0_i32_0 : i32, i32
  }
  func.func @transform_6(%arg0: i32) -> (i32, i32) {
    %c0_i32 = arith.constant 0 : i32
    %c0_i32_0 = arith.constant 0 : i32
    %c0_i32_1 = arith.constant 0 : i32
    return %c0_i32, %c0_i32_0 : i32, i32
  }
  func.func @transform_7(%arg0: i32) -> (i32, i32) {
    %c0_i32 = arith.constant 0 : i32
    %c0_i32_0 = arith.constant 0 : i32
    %c0_i32_1 = arith.constant 0 : i32
    return %c0_i32, %c0_i32_0 : i32, i32
  }
  func.func @transform_8(%arg0: i32) -> (i32, i32) {
    %c0_i32 = arith.constant 0 : i32
    %c0_i32_0 = arith.constant 0 : i32
    %c0_i32_1 = arith.constant 0 : i32
    return %c0_i32, %c0_i32_0 : i32, i32
  }
  func.func @transform_9(%arg0: i32) -> (i32, i32, i32) {
    %c0_i32 = arith.constant 0 : i32
    %c0_i32_0 = arith.constant 0 : i32
    %c0_i32_1 = arith.constant 0 : i32
    return %arg0, %c0_i32, %c0_i32_0 : i32, i32, i32
  }
}

</mosaic_0001>

<bundles_post_ra>
// kernel: a_call__.1
= control target key start
LH: loop header
LB: loop body
LE: loop exit
PB: predicated region body
PF: predicated region fallthrough
CT: control target
= control target key end

     0   :  { %vm98_vm0 = vcmask 130048   ;;  %s6142_s30 = smov 96   ;;  %vm6145_vm1 = vmmov 0   ;;  %s6147_s11 = smov 32   ;;  %vm1444_vm2 = vcmask 261120   ;;  %s8649_s1 = inlined_call_operand.vmem [shape: f32[16,128], index: 1, kind: input, shape index: {}]   ;;  %s8650_s0 = inlined_call_operand.vmem [shape: f32[1,512,16], index: 0, kind: input, shape index: {}]   ;;  %s8651_s3 = inlined_call_operand.vmem [shape: f32[32,288], index: 3, kind: input, shape index: {}]   ;;  %s8652_s2 = inlined_call_operand.vmem [shape: f32[1,32], index: 2, kind: input, shape index: {}]   ;;  %s8653_s5 = inlined_call_operand.vmem [shape: f32[800,32], index: 5, kind: input, shape index: {}]   ;;  %s8654_s4 = inlined_call_operand.vmem [shape: f32[1,32], index: 4, kind: input, shape index: {}]   ;;  %s8655_s6 = inlined_call_operand.vmem [shape: f32[1,32], index: 6, kind: input, shape index: {}]   ;;  %s8656_s7 = inlined_call_operand.vmem [shape: f32[1,32], index: 7, kind: input, shape index: {}]   ;;  %s8657_s8 = inlined_call_operand.vmem [shape: f32[1,32], index: 8, kind: input, shape index: {}]   ;;  %s8658_s9 = inlined_call_operand.vmem [shape: f32[1,8,32], index: 9, kind: output, shape index: {}]  }
   0x1   :  { %v96_v0 = vld [vmem:[%s8649_s1] sm:$0xff]  ;;  %v97_v1 = vld [vmem:[%s8649_s1 + $0x8] sm:$0xff]  ;;  %v34_v5 = vld [vmem:[%s8650_s0 + $0x10] sm:$0xff] }
   0x2   :  { %v32_v2 = vld [vmem:[%s8650_s0] sm:$0xff]  ;;  %v5962_v3 = vpack.c.bf16 %v97_v1, %v96_v0  ;;  %v33_v4 = vld [vmem:[%s8650_s0 + $0x8] sm:$0xff]  ;;  %v35_v6 = vld [vmem:[%s8650_s0 + $0x18] sm:$0xff] }
   0x3   :  { %5436 = vmatprep.mubr.msk.f32.mxu0 %vm98_vm0, %v32_v2  ;;  %v36_v7 = vld [vmem:[%s8650_s0 + $0x20] sm:$0xff]  ;;  %v37_v8 = vld [vmem:[%s8650_s0 + $0x28] sm:$0xff]  ;;  %v38_v9 = vld [vmem:[%s8650_s0 + $0x30] sm:$0xff] }
   0x4   :  { %5963 = vmatprep.subr.bf16.mxu0 %v5962_v3  ;;  %v39_v10 = vld [vmem:[%s8650_s0 + $0x38] sm:$0xff]  ;;  %v40_v11 = vld [vmem:[%s8650_s0 + $0x40] sm:$0xff]  ;;  %v41_v12 = vld [vmem:[%s8650_s0 + $0x48] sm:$0xff] }
   0x5   :  { %5965 = vmatpush3.bf16.msra.mxu0 %v5962_v3  ;;  %v42_v13 = vld [vmem:[%s8650_s0 + $0x50] sm:$0xff]  ;;  %v43_v14 = vld [vmem:[%s8650_s0 + $0x58] sm:$0xff]  ;;  %v44_v15 = vld [vmem:[%s8650_s0 + $0x60] sm:$0xff] }
   0x6   :  { %v45_v16 = vld [vmem:[%s8650_s0 + $0x68] sm:$0xff]  ;;  %v46_v17 = vld [vmem:[%s8650_s0 + $0x70] sm:$0xff]  ;;  %v47_v18 = vld [vmem:[%s8650_s0 + $0x78] sm:$0xff] }
   0x7   :  { %v48_v19 = vld [vmem:[%s8650_s0 + $0x80] sm:$0xff]  ;;  %v49_v20 = vld [vmem:[%s8650_s0 + $0x88] sm:$0xff]  ;;  %v50_v21 = vld [vmem:[%s8650_s0 + $0x90] sm:$0xff] }
   0x8   :  { %5437 = vmatmul.mubr.msk.f32.vlgmr.msra.gmra.mrb[0].mxu0 %vm98_vm0, %v33_v4  ;;  %v51_v22 = vld [vmem:[%s8650_s0 + $0x98] sm:$0xff]  ;;  %v52_v23 = vld [vmem:[%s8650_s0 + $0xa0] sm:$0xff]  ;;  %v53_v24 = vld [vmem:[%s8650_s0 + $0xa8] sm:$0xff] }
   0x9   :  { %5439 = vmatprep.mubr.msk.f32.mxu0 %vm98_vm0, %v34_v5  ;;  %v54_v25 = vld [vmem:[%s8650_s0 + $0xb0] sm:$0xff]  ;;  %v55_v26 = vld [vmem:[%s8650_s0 + $0xb8] sm:$0xff]  ;;  %v56_v27 = vld [vmem:[%s8650_s0 + $0xc0] sm:$0xff] }
   0xa   :  { %v57_v28 = vld [vmem:[%s8650_s0 + $0xc8] sm:$0xff]  ;;  %v58_v29 = vld [vmem:[%s8650_s0 + $0xd0] sm:$0xff]  ;;  %v59_v30 = vld [vmem:[%s8650_s0 + $0xd8] sm:$0xff] }
   0xb   :  { %v60_v31 = vld [vmem:[%s8650_s0 + $0xe0] sm:$0xff]  ;;  %v61_v32 = vld [vmem:[%s8650_s0 + $0xe8] sm:$0xff]  ;;  %v62_v33 = vld [vmem:[%s8650_s0 + $0xf0] sm:$0xff] }
   0xc   :  { %5440 = vmatmul.mubr.msk.f32.gmra.mrb[2].mxu0 %vm98_vm0, %v35_v6  ;;  %v63_v34 = vld [vmem:[%s8650_s0 + $0xf8] sm:$0xff]  ;;  %v64_v35 = vld [vmem:[%s8650_s0 + $0x100] sm:$0xff]  ;;  %v65_v36 = vld [vmem:[%s8650_s0 + $0x108] sm:$0xff] }
   0xd   :  { %5442 = vmatprep.mubr.msk.f32.mxu0 %vm98_vm0, %v36_v7  ;;  %v66_v37 = vld [vmem:[%s8650_s0 + $0x110] sm:$0xff]  ;;  %v67_v38 = vld [vmem:[%s8650_s0 + $0x118] sm:$0xff]  ;;  %v68_v39 = vld [vmem:[%s8650_s0 + $0x120] sm:$0xff] }
   0xe   :  { %v69_v40 = vld [vmem:[%s8650_s0 + $0x128] sm:$0xff]  ;;  %v70_v41 = vld [vmem:[%s8650_s0 + $0x130] sm:$0xff]  ;;  %v71_v42 = vld [vmem:[%s8650_s0 + $0x138] sm:$0xff] }
   0xf   :  { %v72_v43 = vld [vmem:[%s8650_s0 + $0x140] sm:$0xff]  ;;  %v73_v44 = vld [vmem:[%s8650_s0 + $0x148] sm:$0xff]  ;;  %v74_v45 = vld [vmem:[%s8650_s0 + $0x150] sm:$0xff] }
  0x10   :  { %5443 = vmatmul.mubr.msk.f32.gmra.mrb[4].mxu0 %vm98_vm0, %v37_v8  ;;  %v75_v46 = vld [vmem:[%s8650_s0 + $0x158] sm:$0xff]  ;;  %v76_v47 = vld [vmem:[%s8650_s0 + $0x160] sm:$0xff]  ;;  %v77_v48 = vld [vmem:[%s8650_s0 + $0x168] sm:$0xff] }
  0x11   :  { %5445 = vmatprep.mubr.msk.f32.mxu0 %vm98_vm0, %v38_v9  ;;  %v78_v49 = vld [vmem:[%s8650_s0 + $0x170] sm:$0xff]  ;;  %v79_v50 = vld [vmem:[%s8650_s0 + $0x178] sm:$0xff]  ;;  %v80_v51 = vld [vmem:[%s8650_s0 + $0x180] sm:$0xff] }
  0x12   :  { %v81_v52 = vld [vmem:[%s8650_s0 + $0x188] sm:$0xff]  ;;  %v82_v53 = vld [vmem:[%s8650_s0 + $0x190] sm:$0xff]  ;;  %v83_v54 = vld [vmem:[%s8650_s0 + $0x198] sm:$0xff] }
  0x13   :  { %v84_v55 = vld [vmem:[%s8650_s0 + $0x1a0] sm:$0xff]  ;;  %v85_v56 = vld [vmem:[%s8650_s0 + $0x1a8] sm:$0xff]  ;;  %v86_v57 = vld [vmem:[%s8650_s0 + $0x1b0] sm:$0xff] }
  0x14   :  { %5446 = vmatmul.mubr.msk.f32.gmra.mrb[6].mxu0 %vm98_vm0, %v39_v10  ;;  %v87_v58 = vld [vmem:[%s8650_s0 + $0x1b8] sm:$0xff]  ;;  %v88_v59 = vld [vmem:[%s8650_s0 + $0x1c0] sm:$0xff]  ;;  %v89_v60 = vld [vmem:[%s8650_s0 + $0x1c8] sm:$0xff] }
  0x15   :  { %5448 = vmatprep.mubr.msk.f32.mxu0 %vm98_vm0, %v40_v11  ;;  %v90_v61 = vld [vmem:[%s8650_s0 + $0x1d0] sm:$0xff]  ;;  %v91_v62 = vld [vmem:[%s8650_s0 + $0x1d8] sm:$0xff]  ;;  %v92_v63 = vld [vmem:[%s8650_s0 + $0x1e0] sm:$0xff] }
  0x16   :  { %v93_v0 = vld [vmem:[%s8650_s0 + $0x1e8] sm:$0xff]  ;;  %v94_v1 = vld [vmem:[%s8650_s0 + $0x1f0] sm:$0xff]  ;;  %v95_v2 = vld [vmem:[%s8650_s0 + $0x1f8] sm:$0xff] }
  0x17   :  { %v1433_v7 = vld [vmem:[%s8651_s3 + $0x8] sm:$0xff]  ;;  %v1436_v8 = vld [vmem:[%s8651_s3 + $0x20] sm:$0xff]  ;;  %v1435_v11 = vld [vmem:[%s8651_s3 + $0x18] sm:$0xff] }
  0x18   :  { %5449 = vmatmul.mubr.msk.f32.gmra.mrb[8].mxu0 %vm98_vm0, %v41_v12  ;;  %v5966_v9 = vpack.c.bf16 %v1436_v8, %v1433_v7  ;;  %v1432_v10 = vld [vmem:[%s8651_s3] sm:$0xff]  ;;  %v1434_v12 = vld [vmem:[%s8651_s3 + $0x10] sm:$0xff] }
  0x19   :  { %5451 = vmatprep.mubr.msk.f32.mxu0 %vm98_vm0, %v42_v13 }
  0x1a   :  { %5967 = vmatprep.subr.bf16.mxu1 %v5966_v9 }
  0x1c   :  { %5452 = vmatmul.mubr.msk.f32.gmra.mrb[10].mxu0 %vm98_vm0, %v43_v14  ;;  %v5968_v14 = vpack.c.bf16 %v1435_v11, %v1432_v10 }
  0x1d   :  { %5454 = vmatprep.mubr.msk.f32.mxu0 %vm98_vm0, %v44_v15  ;;  %v1437_v15 = vld [vmem:[%s8651_s3 + $0x28] sm:$0xff] }
  0x1e   :  { %5969 = vmatpush1.bf16.msra.mxu1 %v5968_v14 }
  0x20   :  { %5455 = vmatmul.mubr.msk.f32.gmra.mrb[12].mxu0 %vm98_vm0, %v45_v16 }
  0x21   :  { %5457 = vmatprep.mubr.msk.f32.mxu0 %vm98_vm0, %v46_v17  ;;  %v5975_v17 = vpack.c.bf16 %v1437_v15, %v1434_v12 }
  0x24   :  { %5458 = vmatmul.mubr.msk.f32.gmra.mrb[14].mxu0 %vm98_vm0, %v47_v18  ;;  %v8659_v18 = vmov 0.0|0.0  }
  0x25   :  { %5460 = vmatprep.mubr.msk.f32.mxu0 %vm98_vm0, %v48_v19  ;;  %5974 = vmatprep.subr.bf16.mxu0 %v8659_v18  ;;  %v1439_v19 = vld [vmem:[%s8651_s3 + $0x38] sm:$0xff] }
  0x26   :  { %5976 = vmatpush3.bf16.msra.mxu0 %v5975_v17 }
  0x27   :  { %5977 = vmatprep.subr.bf16.mxu0 %v8659_v18 }
  0x28   :  { %5461 = vmatmul.mubr.msk.f32.gmra.mrb[16].mxu0 %vm98_vm0, %v49_v20  ;;  %v1442_v20 = vld [vmem:[%s8651_s3 + $0x50] sm:$0xff] }
  0x29   :  { %5463 = vmatprep.mubr.msk.f32.mxu0 %vm98_vm0, %v50_v21  ;;  %v5970_v21 = vpack.c.bf16 %v1442_v20, %v1439_v19 }
  0x2b   :  { %5971 = vmatprep.subr.bf16.mxu1 %v5970_v21 }
  0x2c   :  { %5464 = vmatmul.mubr.msk.f32.gmra.mrb[18].mxu0 %vm98_vm0, %v51_v22  ;;  %v1438_v22 = vld [vmem:[%s8651_s3 + $0x30] sm:$0xff] }
  0x2d   :  { %5466 = vmatprep.mubr.msk.f32.mxu0 %vm98_vm0, %v52_v23  ;;  %v1441_v23 = vld [vmem:[%s8651_s3 + $0x48] sm:$0xff] }
  0x30   :  { %5467 = vmatmul.mubr.msk.f32.gmra.mrb[20].mxu0 %vm98_vm0, %v53_v24  ;;  %v1440_v24 = vld [vmem:[%s8651_s3 + $0x40] sm:$0xff] }
  0x31   :  { %5469 = vmatprep.mubr.msk.f32.mxu0 %vm98_vm0, %v54_v25 }
  0x34   :  { %5470 = vmatmul.mubr.msk.f32.gmra.mrb[22].mxu0 %vm98_vm0, %v55_v26  ;;  %v5972_v26 = vpack.c.bf16 %v1441_v23, %v1438_v22 }
  0x35   :  { %5472 = vmatprep.mubr.msk.f32.mxu0 %vm98_vm0, %v56_v27  ;;  %v1443_v27 = vld [vmem:[%s8651_s3 + $0x58] sm:$0xff]  ;;  %s6146_s3 = smov 64  }
  0x36   :  { %5973 = vmatpush1.bf16.msra.mxu1 %v5972_v26 }
  0x37   :  { %5980 = vmatprep.subr.bf16.mxu1 %v8659_v18 }
  0x38   :  { %5473 = vmatmul.mubr.msk.f32.gmra.mrb[24].mxu0 %vm98_vm0, %v57_v28 }
  0x39   :  { %5475 = vmatprep.mubr.msk.f32.mxu0 %vm98_vm0, %v58_v29  ;;  %v5978_v29 = vpack.c.bf16 %v1443_v27, %v1440_v24 }
  0x3b   :  { %5979 = vmatpush3.bf16.msra.mxu0 %v5978_v29 }
  0x3c   :  { %5476 = vmatmul.mubr.msk.f32.gmra.mrb[26].mxu0 %vm98_vm0, %v59_v30  ;;  %6076 = vmatprep.subr.bf16.mxu0 %v8659_v18 }
  0x3d   :  { %5478 = vmatprep.mubr.msk.f32.mxu0 %vm98_vm0, %v60_v31  ;;  %v8661_v31 = vmov 0.0  }
  0x3e   :  { %1656 = vmatprep.mubr.f32.mxu1 %v8661_v31 }
  0x40   :  { %5479 = vmatmul.mubr.msk.f32.gmra.mrb[28].mxu0 %vm98_vm0, %v61_v32 }
  0x41   :  { %5481 = vmatprep.mubr.msk.f32.mxu0 %vm98_vm0, %v62_v33 }
  0x44   :  { %5482 = vmatmul.mubr.msk.f32.gmra.mrb[30].mxu0 %vm98_vm0, %v63_v34 }
  0x45   :  { %5484 = vmatprep.mubr.msk.f32.mxu0 %vm98_vm0, %v64_v35 }
  0x48   :  { %5485 = vmatmul.mubr.msk.f32.gmra.mrb[32].mxu0 %vm98_vm0, %v65_v36 }
  0x49   :  { %5487 = vmatprep.mubr.msk.f32.mxu0 %vm98_vm0, %v66_v37 }
  0x4c   :  { %5488 = vmatmul.mubr.msk.f32.gmra.mrb[34].mxu0 %vm98_vm0, %v67_v38 }
  0x4d   :  { %5490 = vmatprep.mubr.msk.f32.mxu0 %vm98_vm0, %v68_v39 }
  0x50   :  { %5491 = vmatmul.mubr.msk.f32.gmra.mrb[36].mxu0 %vm98_vm0, %v69_v40 }
  0x51   :  { %5493 = vmatprep.mubr.msk.f32.mxu0 %vm98_vm0, %v70_v41 }
  0x54   :  { %5494 = vmatmul.mubr.msk.f32.gmra.mrb[38].mxu0 %vm98_vm0, %v71_v42 }
  0x55   :  { %5496 = vmatprep.mubr.msk.f32.mxu0 %vm98_vm0, %v72_v43 }
  0x58   :  { %5497 = vmatmul.mubr.msk.f32.gmra.mrb[40].mxu0 %vm98_vm0, %v73_v44 }
  0x59   :  { %5499 = vmatprep.mubr.msk.f32.mxu0 %vm98_vm0, %v74_v45 }
  0x5c   :  { %5500 = vmatmul.mubr.msk.f32.gmra.mrb[42].mxu0 %vm98_vm0, %v75_v46 }
  0x5d   :  { %5502 = vmatprep.mubr.msk.f32.mxu0 %vm98_vm0, %v76_v47 }
  0x60   :  { %5503 = vmatmul.mubr.msk.f32.gmra.mrb[44].mxu0 %vm98_vm0, %v77_v48 }
  0x61   :  { %5505 = vmatprep.mubr.msk.f32.mxu0 %vm98_vm0, %v78_v49 }
  0x64   :  { %5506 = vmatmul.mubr.msk.f32.gmra.mrb[46].mxu0 %vm98_vm0, %v79_v50 }
  0x65   :  { %5508 = vmatprep.mubr.msk.f32.mxu0 %vm98_vm0, %v80_v51 }
  0x68   :  { %5509 = vmatmul.mubr.msk.f32.gmra.mrb[48].mxu0 %vm98_vm0, %v81_v52 }
  0x69   :  { %5511 = vmatprep.mubr.msk.f32.mxu0 %vm98_vm0, %v82_v53 }
  0x6c   :  { %5512 = vmatmul.mubr.msk.f32.gmra.mrb[50].mxu0 %vm98_vm0, %v83_v54 }
  0x6d   :  { %5514 = vmatprep.mubr.msk.f32.mxu0 %vm98_vm0, %v84_v55 }
  0x70   :  { %5515 = vmatmul.mubr.msk.f32.gmra.mrb[52].mxu0 %vm98_vm0, %v85_v56 }
  0x71   :  { %5517 = vmatprep.mubr.msk.f32.mxu0 %vm98_vm0, %v86_v57 }
  0x74   :  { %5518 = vmatmul.mubr.msk.f32.gmra.mrb[54].mxu0 %vm98_vm0, %v87_v58 }
  0x75   :  { %5520 = vmatprep.mubr.msk.f32.mxu0 %vm98_vm0, %v88_v59 }
  0x78   :  { %5521 = vmatmul.mubr.msk.f32.gmra.mrb[56].mxu0 %vm98_vm0, %v89_v60 }
  0x79   :  { %5523 = vmatprep.mubr.msk.f32.mxu0 %vm98_vm0, %v90_v61 }
  0x7c   :  { %5524 = vmatmul.mubr.msk.f32.gmra.mrb[58].mxu0 %vm98_vm0, %v91_v62 }
  0x7d   :  { %5526 = vmatprep.mubr.msk.f32.mxu0 %vm98_vm0, %v92_v63 }
  0x80   :  { %5527 = vmatmul.mubr.msk.f32.gmra.mrb[60].mxu0 %vm98_vm0, %v93_v0 }
  0x81   :  { %5529 = vmatprep.mubr.msk.f32.mxu0 %vm98_vm0, %v94_v1 }
  0x84   :  { %5530 = vmatmul.mubr.msk.f32.gmra.mrb[62].mxu0 %vm98_vm0, %v95_v2 }
  0x85   :  { %5540 = vmatprep.mubr.msk.f32.mxu0 %vm6145_vm1, %v8661_v31 }
  0xdb   :  { %v6460_v3 = vpop.f32.mrb[0].mxu0 }
  0xdc   :  { %684 = vrot.lane.b32.xlu0 %v6460_v3, %s6142_s30  ;;  %v6464_v4 = vpop.f32.mrb[1].mxu0 }
  0xdf   :  { %v6466_v5 = vpop.f32.mrb[2].mxu0 }
  0xe0   :  { %688 = vrot.lane.b32.xlu1 %v6466_v5, %s6142_s30  ;;  %v6470_v6 = vpop.f32.mrb[3].mxu0 }
  0xe3   :  { %v6487_v13 = vpop.f32.mrb[4].mxu0 }
  0xe4   :  { %686 = vrot.lane.b32.xlu1 %v6470_v6, %s6142_s30  ;;  %v6494_v16 = vpop.f32.mrb[5].mxu0 }
  0xe5   :  { %690 = vrot.lane.b32.xlu0 %v6494_v16, %s6142_s30 }
  0xe7   :  { %v5447_v25 = vpop.f32.mrb[6].mxu0 }
  0xe8   :  { %692 = vrot.lane.b32.xlu1 %v6487_v13, %s6142_s30  ;;  %v6520_v28 = vpop.f32.mrb[7].mxu0 }
  0xe9   :  { %694 = vrot.lane.b32.xlu0 %v6520_v28, %s6142_s30 }
  0xeb   :  { %v6524_v30 = vpop.f32.mrb[8].mxu0 }
  0xec   :  { %696 = vrot.lane.b32.xlu1 %v5447_v25, %s6142_s30  ;;  %v6530_v32 = vpop.f32.mrb[9].mxu0 }
  0xed   :  { %721 = vrot.lane.b32.xlu0 %v6524_v30, %s6146_s3 }
  0xef   :  { %v6536_v33 = vpop.f32.mrb[10].mxu0 }
  0xf0   :  { %748 = vrot.lane.b32.xlu1 %v6524_v30, %s6147_s11  ;;  %v6540_v34 = vpop.f32.mrb[11].mxu0 }
  0xf1   :  { %719 = vrot.lane.b32.xlu0 %v6530_v32, %s6146_s3 }
  0xf3   :  { %v6544_v35 = vpop.f32.mrb[12].mxu0 }
  0xf4   :  { %796 = vrot.lane.b32.xlu1 %v6524_v30, %s6142_s30  ;;  %v6548_v36 = vpop.f32.mrb[13].mxu0 }
  0xf5   :  { %725 = vrot.lane.b32.xlu0 %v6536_v33, %s6146_s3 }
  0xf7   :  { %v5459_v37 = vpop.f32.mrb[14].mxu0 }
  0xf8   :  { %752 = vrot.lane.b32.xlu1 %v6536_v33, %s6147_s11  ;;  %v6554_v38 = vpop.f32.mrb[15].mxu0 }
  0xf9   :  { %800 = vrot.lane.b32.xlu0 %v6536_v33, %s6142_s30 }
  0xfb   :  { %v6558_v39 = vpop.f32.mrb[16].mxu0 }
  0xfc   :  { %723 = vrot.lane.b32.xlu1 %v6540_v34, %s6146_s3  ;;  %v6562_v40 = vpop.f32.mrb[17].mxu0 }
  0xfd   :  { %750 = vrot.lane.b32.xlu0 %v6540_v34, %s6147_s11 }
  0xff   :  { %v6566_v41 = vpop.f32.mrb[18].mxu0 }
 0x100   :  { %798 = vrot.lane.b32.xlu1 %v6540_v34, %s6142_s30  ;;  %v6570_v42 = vpop.f32.mrb[19].mxu0 }
 0x101   :  { %729 = vrot.lane.b32.xlu0 %v6544_v35, %s6146_s3 }
 0x103   :  { %v6574_v43 = vpop.f32.mrb[20].mxu0 }
 0x104   :  { %756 = vrot.lane.b32.xlu1 %v6544_v35, %s6147_s11  ;;  %v6578_v44 = vpop.f32.mrb[21].mxu0 }
 0x105   :  { %804 = vrot.lane.b32.xlu0 %v6544_v35, %s6142_s30 }
 0x107   :  { %v5471_v45 = vpop.f32.mrb[22].mxu0 }
 0x108   :  { %727 = vrot.lane.b32.xlu1 %v6548_v36, %s6146_s3  ;;  %v6584_v46 = vpop.f32.mrb[23].mxu0 }
 0x109   :  { %754 = vrot.lane.b32.xlu0 %v6548_v36, %s6147_s11 }
 0x10b   :  { %v6588_v47 = vpop.f32.mrb[24].mxu0 }
 0x10c   :  { %8684 = vst [vmem:[#allocation2_spill] sm:$0xff] %v6588_v47  ;;  %802 = vrot.lane.b32.xlu1 %v6548_v36, %s6142_s30  ;;  %v6592_v48 = vpop.f32.mrb[25].mxu0 }
 0x10d   :  { %8685 = vst [vmem:[#allocation3_spill] sm:$0xff] %v6592_v48  ;;  %760 = vrot.lane.b32.xlu0 %v5459_v37, %s6147_s11 }
 0x10f   :  { %v6595_v49 = vpop.f32.mrb[26].mxu0 }
 0x110   :  { %8686 = vst [vmem:[#allocation4_spill] sm:$0xff] %v6595_v49  ;;  %731 = vrot.lane.b32.xlu1 %v6554_v38, %s6146_s3  ;;  %v6599_v50 = vpop.f32.mrb[27].mxu0 }
 0x111   :  { %8687 = vst [vmem:[#allocation5_spill] sm:$0xff] %v6599_v50  ;;  %808 = vrot.lane.b32.xlu0 %v5459_v37, %s6142_s30 }
 0x113   :  { %v6602_v51 = vpop.f32.mrb[28].mxu0 }
 0x114   :  { %8688 = vst [vmem:[#allocation6_spill] sm:$0xff] %v6602_v51  ;;  %806 = vrot.lane.b32.xlu1 %v6554_v38, %s6142_s30  ;;  %v6606_v52 = vpop.f32.mrb[29].mxu0 }
 0x115   :  { %8689 = vst [vmem:[#allocation7_spill] sm:$0xff] %v6606_v52  ;;  %758 = vrot.lane.b32.xlu0 %v6554_v38, %s6147_s11 }
 0x117   :  { %v6610_v53 = vpop.f32.mrb[30].mxu0 }
 0x118   :  { %833 = vrot.lane.b32.xlu1 %v6558_v39, %s6146_s3  ;;  %v6614_v54 = vpop.f32.mrb[31].mxu0 }
 0x119   :  { %8690 = vst [vmem:[#allocation8_spill] sm:$0xff] %v6614_v54  ;;  %860 = vrot.lane.b32.xlu0 %v6558_v39, %s6147_s11 }
 0x11b   :  { %v6618_v55 = vpop.f32.mrb[32].mxu0 }
 0x11c   :  { %8691 = vst [vmem:[#allocation9_spill] sm:$0xff] %v6618_v55  ;;  %837 = vrot.lane.b32.xlu1 %v6566_v41, %s6146_s3  ;;  %v6622_v56 = vpop.f32.mrb[33].mxu0 }
 0x11d   :  { %902 = vrot.lane.b32.xlu0 %v6558_v39, %s6142_s30 }
 0x11f   :  { %v6626_v57 = vpop.f32.mrb[34].mxu0 }
 0x120   :  { %906 = vrot.lane.b32.xlu1 %v6566_v41, %s6142_s30  ;;  %v6630_v58 = vpop.f32.mrb[35].mxu0 }
 0x121   :  { %831 = vrot.lane.b32.xlu0 %v6562_v40, %s6146_s3 }
 0x123   :  { %v6634_v59 = vpop.f32.mrb[36].mxu0 }
 0x124   :  { %862 = vrot.lane.b32.xlu1 %v6570_v42, %s6147_s11  ;;  %v6638_v60 = vpop.f32.mrb[37].mxu0 }
 0x125   :  { %864 = vrot.lane.b32.xlu0 %v6566_v41, %s6147_s11 }
 0x127   :  { %v6642_v61 = vpop.f32.mrb[38].mxu0 }
 0x128   :  { %841 = vrot.lane.b32.xlu1 %v6574_v43, %s6146_s3  ;;  %v6646_v62 = vpop.f32.mrb[39].mxu0 }
 0x129   :  { %835 = vrot.lane.b32.xlu0 %v6570_v42, %s6146_s3 }
 0x12b   :  { %v6650_v63 = vpop.f32.mrb[40].mxu0 }
 0x12c   :  { %866 = vrot.lane.b32.xlu1 %v6578_v44, %s6147_s11  ;;  %v6654_v0 = vpop.f32.mrb[41].mxu0 }
 0x12d   :  { %904 = vrot.lane.b32.xlu0 %v6570_v42, %s6142_s30 }
 0x12f   :  { %v6658_v1 = vpop.f32.mrb[42].mxu0 }
 0x130   :  { %908 = vrot.lane.b32.xlu1 %v6578_v44, %s6142_s30  ;;  %v6662_v2 = vpop.f32.mrb[43].mxu0 }
 0x131   :  { %868 = vrot.lane.b32.xlu0 %v6574_v43, %s6147_s11 }
 0x133   :  { %v6666_v7 = vpop.f32.mrb[44].mxu0 }
 0x134   :  { %872 = vrot.lane.b32.xlu1 %v5471_v45, %s6147_s11  ;;  %v6669_v8 = vpop.f32.mrb[45].mxu0 }
 0x135   :  { %910 = vrot.lane.b32.xlu0 %v6574_v43, %s6142_s30 }
 0x137   :  { %v6673_v9 = vpop.f32.mrb[46].mxu0 }
 0x138   :  { %914 = vrot.lane.b32.xlu1 %v5471_v45, %s6142_s30  ;;  %v6676_v10 = vpop.f32.mrb[47].mxu0 }
 0x139   :  { %839 = vrot.lane.b32.xlu0 %v6578_v44, %s6146_s3 }
 0x13b   :  { %v6686_v11 = vpop.f32.mrb[48].mxu0 }
 0x13c   :  { %870 = vrot.lane.b32.xlu1 %v6584_v46, %s6147_s11  ;;  %v6690_v12 = vpop.f32.mrb[49].mxu0 }
 0x13d   :  { %843 = vrot.lane.b32.xlu0 %v6584_v46, %s6146_s3 }
 0x13f   :  { %v6694_v14 = vpop.f32.mrb[50].mxu0 }
 0x140   :  { %966 = vrot.lane.b32.xlu1 %v6588_v47, %s6147_s11  ;;  %v6704_v15 = vpop.f32.mrb[51].mxu0 }
 0x141   :  { %912 = vrot.lane.b32.xlu0 %v6584_v46, %s6142_s30 }
 0x143   :  { %v6708_v17 = vpop.f32.mrb[52].mxu0 }
 0x144   :  { %1008 = vrot.lane.b32.xlu1 %v6588_v47, %s6142_s30  ;;  %v6722_v23 = vpop.f32.mrb[53].mxu0 }
 0x145   :  { %939 = vrot.lane.b32.xlu0 %v6588_v47, %s6146_s3 }
 0x147   :  { %v6732_v26 = vpop.f32.mrb[54].mxu0 }
 0x148   :  { %937 = vrot.lane.b32.xlu1 %v6592_v48, %s6146_s3  ;;  %v6740_v37 = vpop.f32.mrb[55].mxu0  ;;  %v8696_v48 = vmov 0.0  }
 0x149   :  { %970 = vrot.lane.b32.xlu0 %v6595_v49, %s6147_s11  ;;  %8692 = vst [vmem:[#allocation10_spill] sm:$0xff] %v6740_v37 }
 0x14c   :  { %1012 = vrot.lane.b32.xlu1 %v6595_v49, %s6142_s30 }
 0x14d   :  { %943 = vrot.lane.b32.xlu0 %v6595_v49, %s6146_s3  ;;  %v6747_v49 = vpop.f32.mrb[56].mxu0 }
 0x14e   :  { %v685_v20 = vpop.permute.xlu0 %684  ;;  %8693 = vst [vmem:[#allocation11_spill] sm:$0xff] %v6747_v49 }
 0x14f   :  { %v705_v45 = vadd.f32 %v685_v20, %v6464_v4 }
 0x150   :  { %941 = vrot.lane.b32.xlu1 %v6599_v50, %s6146_s3 }
 0x151   :  { %968 = vrot.lane.b32.xlu0 %v6599_v50, %s6147_s11 }
 0x152   :  { %v689_v19 = vpop.permute.xlu1 %688 }
 0x154   :  { %1010 = vrot.lane.b32.xlu1 %v6599_v50, %s6142_s30  ;;  %v6752_v50 = vld [vmem:[%s8652_s2] ss:$0 sm:$0xff] }
 0x155   :  { %947 = vrot.lane.b32.xlu0 %v6602_v51, %s6146_s3 }
 0x156   :  { %v687_v21 = vpop.permute.xlu1 %686 }
 0x157   :  { %v6718_v22 = vpop.permute.xlu0 %690 }
 0x158   :  { %974 = vrot.lane.b32.xlu1 %v6602_v51, %s6147_s11 }
 0x159   :  { %1014 = vrot.lane.b32.xlu0 %v6606_v52, %s6142_s30 }
 0x15a   :  { %v6726_v24 = vpop.permute.xlu1 %692 }
 0x15b   :  { %v6728_v25 = vpop.permute.xlu0 %694 }
 0x15c   :  { %1016 = vrot.lane.b32.xlu1 %v6602_v51, %s6142_s30 }
 0x15d   :  { %978 = vrot.lane.b32.xlu0 %v6610_v53, %s6147_s11 }
 0x15e   :  { %v6736_v27 = vpop.permute.xlu1 %696 }
 0x15f   :  { %v722_v29 = vpop.permute.xlu0 %721 }
 0x160   :  { %972 = vrot.lane.b32.xlu1 %v6606_v52, %s6147_s11 }
 0x161   :  { %1020 = vrot.lane.b32.xlu0 %v6610_v53, %s6142_s30 }
 0x162   :  { %v749_v18 = vpop.permute.xlu1 %748 }
 0x163   :  { %v720_v31 = vpop.permute.xlu0 %719 }
 0x164   :  { %v740_v51 = vadd.f32 %v720_v31, %v705_v45  ;;  %945 = vrot.lane.b32.xlu1 %v6606_v52, %s6146_s3  ;;  %v6761_v31 = vpop.f32.mrb[57].mxu0 }
 0x165   :  { %976 = vrot.lane.b32.xlu0 %v6614_v54, %s6147_s11  ;;  %8694 = vst [vmem:[#allocation12_spill] sm:$0xff] %v6761_v31 }
 0x166   :  { %v769_v47 = vadd.f32 %v749_v18, %v740_v51  ;;  %v6756_v53 = vpop.permute.xlu1 %796  ;;  %v706_v18 = vadd.f32 %v6460_v3, %v687_v21  ;;  %v707_v51 = vadd.f32 %v689_v19, %v6470_v6 }
 0x167   :  { %v726_v4 = vpop.permute.xlu0 %725 }
 0x168   :  { %v782_v20 = vadd.f32 %v6752_v50, %v769_v47  ;;  %949 = vrot.lane.b32.xlu1 %v6614_v54, %s6146_s3  ;;  %v6770_v47 = vpop.f32.mrb[58].mxu0 }
 0x169   :  { %1072 = vrot.lane.b32.xlu0 %v6618_v55, %s6147_s11  ;;  %8695 = vst [vmem:[#allocation13_spill] sm:$0xff] %v6770_v47  ;;  %v6780_v37 = vpop.f32.mrb[59].mxu0 }
 0x16a   :  { %v789_v45 = vmax.f32 %v782_v20, 0.0  ;;  %v753_v52 = vpop.permute.xlu1 %752  ;;  %v741_v20 = vadd.f32 %v722_v29, %v706_v18 }
 0x16b   :  { %v6765_v49 = vpop.permute.xlu0 %800 }
 0x16c   :  { %5061 = vmatmul.mubr.msk.f32.vlgmr.msra.gmra.mrb[0].mxu1 %vm1444_vm2, %v789_v45  ;;  %5541 = vmatmul.mubr.msk.f32.vlgmr.msra.gmra.mrb[64].mxu0 %vm1444_vm2, %v789_v45 }
 0x16d   :  { %1018 = vrot.lane.b32.xlu1 %v6614_v54, %s6142_s30  ;;  %1114 = vrot.lane.b32.xlu0 %v6618_v55, %s6142_s30 }
 0x16e   :  { %v724_v31 = vpop.permute.xlu1 %723  ;;  %1661 = vmatprep.mubr.f32.mxu1 %v8696_v48  ;;  %5543 = vmatprep.mubr.msk.f32.mxu0 %vm6145_vm1, %v8696_v48 }
 0x16f   :  { %v742_v3 = vadd.f32 %v724_v31, %v707_v51  ;;  %v751_v21 = vpop.permute.xlu0 %750  ;;  %v6790_v31 = vpop.f32.mrb[60].mxu0 }
 0x170   :  { %v770_v45 = vadd.f32 %v751_v21, %v741_v20  ;;  %v708_v20 = vadd.f32 %v6466_v5, %v6718_v22  ;;  %v709_v21 = vadd.f32 %v6726_v24, %v6494_v16 }
 0x171   :  { %v771_v47 = vadd.f32 %v753_v52, %v742_v3  ;;  %1045 = vrot.lane.b32.xlu1 %v6618_v55, %s6146_s3  ;;  %1043 = vrot.lane.b32.xlu0 %v6622_v56, %s6146_s3 }
 0x172   :  { %v783_v6 = vadd.f32 %v6752_v50, %v770_v45  ;;  %v6787_v19 = vpop.permute.xlu1 %798 }
 0x173   :  { %v730_v29 = vpop.permute.xlu0 %729  ;;  %v784_v18 = vadd.f32 %v6752_v50, %v771_v47  ;;  %v6803_v47 = vpop.f32.mrb[61].mxu0 }
 0x174   :  { %v790_v54 = vmax.f32 %v783_v6, 0.0  ;;  %v6818_v5 = vpop.f32.mrb[62].mxu0 }
 0x175   :  { %1076 = vrot.lane.b32.xlu1 %v6626_v57, %s6147_s11  ;;  %1118 = vrot.lane.b32.xlu0 %v6626_v57, %s6142_s30  ;;  %v791_v3 = vmax.f32 %v784_v18, 0.0  ;;  %v6820_v22 = vpop.f32.mrb[63].mxu0 }
 0x176   :  { %5062 = vmatmul.mubr.msk.f32.gmra.mrb[2].mxu1 %vm1444_vm2, %v790_v54  ;;  %5544 = vmatmul.mubr.msk.f32.gmra.mrb[66].mxu0 %vm1444_vm2, %v790_v54  ;;  %v757_v52 = vpop.permute.xlu1 %756  ;;  %v743_v54 = vadd.f32 %v726_v4, %v708_v20 }
 0x177   :  { %v6798_v51 = vpop.permute.xlu0 %804  ;;  %1666 = vmatprep.mubr.f32.mxu1 %v8696_v48  ;;  %5546 = vmatprep.mubr.msk.f32.mxu0 %vm6145_vm1, %v8696_v48 }
 0x179   :  { %1049 = vrot.lane.b32.xlu1 %v6626_v57, %s6146_s3  ;;  %1074 = vrot.lane.b32.xlu0 %v6630_v58, %s6147_s11 }
 0x17a   :  { %5063 = vmatmul.mubr.msk.f32.gmra.mrb[4].mxu1 %vm1444_vm2, %v791_v3  ;;  %5547 = vmatmul.mubr.msk.f32.gmra.mrb[68].mxu0 %vm1444_vm2, %v791_v3  ;;  %v728_v45 = vpop.permute.xlu1 %727 }
 0x17b   :  { %v744_v6 = vadd.f32 %v728_v45, %v709_v21  ;;  %v755_v55 = vpop.permute.xlu0 %754  ;;  %1671 = vmatprep.mubr.f32.mxu1 %v8696_v48  ;;  %5549 = vmatprep.mubr.msk.f32.mxu0 %vm6145_vm1, %v8696_v48  ;;  %v710_v45 = vadd.f32 %v6487_v13, %v6728_v25 }
 0x17c   :  { %v772_v16 = vadd.f32 %v755_v55, %v743_v54  ;;  %v711_v55 = vadd.f32 %v6736_v27, %v6520_v28 }
 0x17d   :  { %v773_v24 = vadd.f32 %v757_v52, %v744_v6  ;;  %1053 = vrot.lane.b32.xlu1 %v6634_v59, %s6146_s3  ;;  %1047 = vrot.lane.b32.xlu0 %v6630_v58, %s6146_s3  ;;  %v745_v28 = vadd.f32 %v730_v29, %v710_v45  ;;  %v817_v45 = vadd.f32 %v6756_v53, %v6530_v32 }
 0x17e   :  { %v785_v4 = vadd.f32 %v6752_v50, %v772_v16  ;;  %v6827_v18 = vpop.permute.xlu1 %802 }
 0x17f   :  { %v761_v20 = vpop.permute.xlu0 %760  ;;  %v786_v3 = vadd.f32 %v6752_v50, %v773_v24 }
 0x180   :  { %v792_v21 = vmax.f32 %v785_v4, 0.0 }
 0x181   :  { %1122 = vrot.lane.b32.xlu1 %v6634_v59, %s6142_s30  ;;  %1116 = vrot.lane.b32.xlu0 %v6630_v58, %s6142_s30  ;;  %v793_v6 = vmax.f32 %v786_v3, 0.0 }
 0x182   :  { %5064 = vmatmul.mubr.msk.f32.gmra.mrb[6].mxu1 %vm1444_vm2, %v792_v21  ;;  %5550 = vmatmul.mubr.msk.f32.gmra.mrb[70].mxu0 %vm1444_vm2, %v792_v21  ;;  %v732_v52 = vpop.permute.xlu1 %731 }
 0x183   :  { %v6838_v54 = vpop.permute.xlu0 %808  ;;  %1676 = vmatprep.mubr.f32.mxu1 %v8696_v48  ;;  %5552 = vmatprep.mubr.msk.f32.mxu0 %vm6145_vm1, %v8696_v48  ;;  %v746_v16 = vadd.f32 %v732_v52, %v711_v55 }
 0x185   :  { %1084 = vrot.lane.b32.xlu1 %v6642_v61, %s6147_s11  ;;  %1080 = vrot.lane.b32.xlu0 %v6634_v59, %s6147_s11  ;;  %v775_v13 = vadd.f32 %v761_v20, %v746_v16  ;;  %v818_v16 = vadd.f32 %v6524_v30, %v6787_v19  ;;  %v819_v19 = vadd.f32 %v6765_v49, %v6540_v34 }
 0x186   :  { %5065 = vmatmul.mubr.msk.f32.gmra.mrb[8].mxu1 %vm1444_vm2, %v793_v6  ;;  %5553 = vmatmul.mubr.msk.f32.gmra.mrb[72].mxu0 %vm1444_vm2, %v793_v6  ;;  %v6851_v27 = vpop.permute.xlu1 %806 }
 0x187   :  { %v759_v24 = vpop.permute.xlu0 %758  ;;  %1681 = vmatprep.mubr.f32.mxu1 %v8696_v48  ;;  %5555 = vmatprep.mubr.msk.f32.mxu0 %vm6145_vm1, %v8696_v48  ;;  %v788_v21 = vadd.f32 %v6752_v50, %v775_v13 }
 0x188   :  { %v774_v25 = vadd.f32 %v759_v24, %v745_v28 }
 0x189   :  { %1126 = vrot.lane.b32.xlu1 %v6642_v61, %s6142_s30  ;;  %1078 = vrot.lane.b32.xlu0 %v6638_v60, %s6147_s11  ;;  %v795_v52 = vmax.f32 %v788_v21, 0.0 }
 0x18a   :  { %v787_v29 = vadd.f32 %v6752_v50, %v774_v25  ;;  %v834_v4 = vpop.permute.xlu1 %833 }
 0x18b   :  { %v861_v3 = vpop.permute.xlu0 %860  ;;  %v853_v13 = vadd.f32 %v834_v4, %v818_v16 }
 0x18c   :  { %v794_v55 = vmax.f32 %v787_v29, 0.0 }
 0x18d   :  { %1082 = vrot.lane.b32.xlu1 %v6646_v62, %s6147_s11  ;;  %1051 = vrot.lane.b32.xlu0 %v6638_v60, %s6146_s3 }
 0x18e   :  { %5066 = vmatmul.mubr.msk.f32.gmra.mrb[10].mxu1 %vm1444_vm2, %v794_v55  ;;  %5556 = vmatmul.mubr.msk.f32.gmra.mrb[74].mxu0 %vm1444_vm2, %v794_v55  ;;  %v838_v61 = vpop.permute.xlu1 %837 }
 0x18f   :  { %v6868_v20 = vpop.permute.xlu0 %902  ;;  %1686 = vmatprep.mubr.f32.mxu1 %v8696_v48  ;;  %5558 = vmatprep.mubr.msk.f32.mxu0 %vm6145_vm1, %v8696_v48 }
 0x191   :  { %1178 = vrot.lane.b32.xlu1 %v6650_v63, %s6147_s11  ;;  %1120 = vrot.lane.b32.xlu0 %v6638_v60, %s6142_s30 }
 0x192   :  { %5067 = vmatmul.mubr.msk.f32.gmra.mrb[12].mxu1 %vm1444_vm2, %v795_v52  ;;  %5559 = vmatmul.mubr.msk.f32.gmra.mrb[76].mxu0 %vm1444_vm2, %v795_v52  ;;  %v6881_v6 = vpop.permute.xlu1 %906 }
 0x193   :  { %v832_v28 = vpop.permute.xlu0 %831  ;;  %1691 = vmatprep.mubr.f32.mxu1 %v8696_v48  ;;  %5561 = vmatprep.mubr.msk.f32.mxu0 %vm6145_vm1, %v8696_v48 }
 0x194   :  { %v852_v24 = vadd.f32 %v832_v28, %v817_v45 }
 0x195   :  { %1220 = vrot.lane.b32.xlu1 %v6650_v63, %s6142_s30  ;;  %1055 = vrot.lane.b32.xlu0 %v6646_v62, %s6146_s3 }
 0x196   :  { %v881_v32 = vadd.f32 %v861_v3, %v852_v24  ;;  %v863_v53 = vpop.permute.xlu1 %862  ;;  %v820_v3 = vadd.f32 %v6536_v33, %v6827_v18 }
 0x197   :  { %v882_v25 = vadd.f32 %v863_v53, %v853_v13  ;;  %v865_v29 = vpop.permute.xlu0 %864 }
 0x198   :  { %v888_v30 = vadd.f32 %v6752_v50, %v881_v32  ;;  %v855_v16 = vadd.f32 %v838_v61, %v820_v3 }
 0x199   :  { %1149 = vrot.lane.b32.xlu1 %v6654_v0, %s6146_s3  ;;  %1124 = vrot.lane.b32.xlu0 %v6646_v62, %s6142_s30  ;;  %v889_v21 = vadd.f32 %v6752_v50, %v882_v25 }
 0x19a   :  { %v895_v4 = vmax.f32 %v888_v30, 0.0  ;;  %v842_v55 = vpop.permute.xlu1 %841 }
 0x19b   :  { %v836_v52 = vpop.permute.xlu0 %835  ;;  %v896_v34 = vmax.f32 %v889_v21, 0.0  ;;  %v822_v21 = vadd.f32 %v6544_v35, %v6851_v27 }
 0x19c   :  { %v854_v45 = vadd.f32 %v836_v52, %v819_v19  ;;  %5068 = vmatmul.mubr.msk.f32.gmra.mrb[14].mxu1 %vm1444_vm2, %v895_v4  ;;  %5562 = vmatmul.mubr.msk.f32.gmra.mrb[78].mxu0 %vm1444_vm2, %v895_v4  ;;  %v821_v19 = vadd.f32 %v6798_v51, %v6548_v36  ;;  %v823_v36 = vadd.f32 %v6838_v54, %v6554_v38 }
 0x19d   :  { %1182 = vrot.lane.b32.xlu1 %v6658_v1, %s6147_s11  ;;  %1151 = vrot.lane.b32.xlu0 %v6650_v63, %s6146_s3 }
 0x19e   :  { %v883_v49 = vadd.f32 %v865_v29, %v854_v45  ;;  %v867_v28 = vpop.permute.xlu1 %866  ;;  %1696 = vmatprep.mubr.f32.mxu1 %v8696_v48  ;;  %5564 = vmatprep.mubr.msk.f32.mxu0 %vm6145_vm1, %v8696_v48  ;;  %v857_v45 = vadd.f32 %v842_v55, %v822_v21 }
 0x19f   :  { %v884_v33 = vadd.f32 %v867_v28, %v855_v16  ;;  %v6911_v18 = vpop.permute.xlu0 %904 }
 0x1a0   :  { %v890_v24 = vadd.f32 %v6752_v50, %v883_v49  ;;  %5069 = vmatmul.mubr.msk.f32.gmra.mrb[16].mxu1 %vm1444_vm2, %v896_v34  ;;  %5565 = vmatmul.mubr.msk.f32.gmra.mrb[80].mxu0 %vm1444_vm2, %v896_v34 }
 0x1a1   :  { %1180 = vrot.lane.b32.xlu1 %v6662_v2, %s6147_s11  ;;  %1155 = vrot.lane.b32.xlu0 %v6658_v1, %s6146_s3  ;;  %v891_v13 = vadd.f32 %v6752_v50, %v884_v33 }
 0x1a2   :  { %v897_v61 = vmax.f32 %v890_v24, 0.0  ;;  %v6921_v32 = vpop.permute.xlu1 %908  ;;  %1702 = vmatprep.mubr.f32.mxu1 %v8696_v48  ;;  %5567 = vmatprep.mubr.msk.f32.mxu0 %vm6145_vm1, %v8696_v48 }
 0x1a3   :  { %v869_v53 = vpop.permute.xlu0 %868  ;;  %v898_v25 = vmax.f32 %v891_v13, 0.0 }
 0x1a4   :  { %5070 = vmatmul.mubr.msk.f32.gmra.mrb[18].mxu1 %vm1444_vm2, %v897_v61  ;;  %5568 = vmatmul.mubr.msk.f32.gmra.mrb[82].mxu0 %vm1444_vm2, %v897_v61 }
 0x1a5   :  { %1153 = vrot.lane.b32.xlu1 %v6662_v2, %s6146_s3  ;;  %1224 = vrot.lane.b32.xlu0 %v6658_v1, %s6142_s30 }
 0x1a6   :  { %v873_v29 = vpop.permute.xlu1 %872  ;;  %1708 = vmatprep.mubr.f32.mxu1 %v8696_v48  ;;  %5570 = vmatprep.mubr.msk.f32.mxu0 %vm6145_vm1, %v8696_v48 }
 0x1a7   :  { %v6935_v30 = vpop.permute.xlu0 %910 }
 0x1a8   :  { %5071 = vmatmul.mubr.msk.f32.gmra.mrb[20].mxu1 %vm1444_vm2, %v898_v25  ;;  %5571 = vmatmul.mubr.msk.f32.gmra.mrb[84].mxu0 %vm1444_vm2, %v898_v25  ;;  %v923_v25 = vadd.f32 %v6868_v20, %v6562_v40 }
 0x1a9   :  { %1222 = vrot.lane.b32.xlu1 %v6662_v2, %s6142_s30  ;;  %1159 = vrot.lane.b32.xlu0 %v6666_v7, %s6146_s3 }
 0x1aa   :  { %v6945_v4 = vpop.permute.xlu1 %914  ;;  %1714 = vmatprep.mubr.f32.mxu1 %v8696_v48  ;;  %5573 = vmatprep.mubr.msk.f32.mxu0 %vm6145_vm1, %v8696_v48 }
 0x1ab   :  { %v840_v3 = vpop.permute.xlu0 %839 }
 0x1ac   :  { %v856_v52 = vadd.f32 %v840_v3, %v821_v19 }
 0x1ad   :  { %1186 = vrot.lane.b32.xlu1 %v6666_v7, %s6147_s11  ;;  %1228 = vrot.lane.b32.xlu0 %v6666_v7, %s6142_s30 }
 0x1ae   :  { %v885_v51 = vadd.f32 %v869_v53, %v856_v52  ;;  %v871_v16 = vpop.permute.xlu1 %870 }
 0x1af   :  { %v886_v34 = vadd.f32 %v871_v16, %v857_v45  ;;  %v844_v49 = vpop.permute.xlu0 %843  ;;  %v924_v45 = vadd.f32 %v6558_v39, %v6911_v18 }
 0x1b0   :  { %v892_v28 = vadd.f32 %v6752_v50, %v885_v51  ;;  %v858_v33 = vadd.f32 %v844_v49, %v823_v36  ;;  %v925_v36 = vadd.f32 %v6881_v6, %v6570_v42 }
 0x1b1   :  { %1157 = vrot.lane.b32.xlu1 %v6669_v8, %s6146_s3  ;;  %1184 = vrot.lane.b32.xlu0 %v6669_v8, %s6147_s11  ;;  %v893_v27 = vadd.f32 %v6752_v50, %v886_v34 }
 0x1b2   :  { %v899_v35 = vmax.f32 %v892_v28, 0.0  ;;  %v887_v55 = vadd.f32 %v873_v29, %v858_v33  ;;  %v967_v24 = vpop.permute.xlu1 %966 }
 0x1b3   :  { %v6964_v61 = vpop.permute.xlu0 %912  ;;  %v900_v38 = vmax.f32 %v893_v27, 0.0 }
 0x1b4   :  { %5072 = vmatmul.mubr.msk.f32.gmra.mrb[22].mxu1 %vm1444_vm2, %v899_v35  ;;  %5574 = vmatmul.mubr.msk.f32.gmra.mrb[86].mxu0 %vm1444_vm2, %v899_v35  ;;  %v894_v54 = vadd.f32 %v6752_v50, %v887_v55 }
 0x1b5   :  { %1226 = vrot.lane.b32.xlu1 %v6669_v8, %s6142_s30  ;;  %1190 = vrot.lane.b32.xlu0 %v6673_v9, %s6147_s11 }
 0x1b6   :  { %v6973_v13 = vpop.permute.xlu1 %1008  ;;  %1720 = vmatprep.mubr.f32.mxu1 %v8696_v48  ;;  %5576 = vmatprep.mubr.msk.f32.mxu0 %vm6145_vm1, %v8696_v48  ;;  %v901_v29 = vmax.f32 %v894_v54, 0.0 }
 0x1b7   :  { %v940_v53 = vpop.permute.xlu0 %939 }
 0x1b8   :  { %5073 = vmatmul.mubr.msk.f32.gmra.mrb[24].mxu1 %vm1444_vm2, %v900_v38  ;;  %5577 = vmatmul.mubr.msk.f32.gmra.mrb[88].mxu0 %vm1444_vm2, %v900_v38  ;;  %v959_v16 = vadd.f32 %v940_v53, %v924_v45  ;;  %v926_v53 = vadd.f32 %v6566_v41, %v6921_v32  ;;  %v927_v41 = vadd.f32 %v6935_v30, %v6578_v44 }
 0x1b9   :  { %1161 = vrot.lane.b32.xlu1 %v6676_v10, %s6146_s3  ;;  %1232 = vrot.lane.b32.xlu0 %v6673_v9, %s6142_s30  ;;  %v928_v32 = vadd.f32 %v6574_v43, %v6964_v61 }
 0x1ba   :  { %v938_v19 = vpop.permute.xlu1 %937  ;;  %1726 = vmatprep.mubr.f32.mxu1 %v8696_v48  ;;  %5579 = vmatprep.mubr.msk.f32.mxu0 %vm6145_vm1, %v8696_v48 }
 0x1bb   :  { %v958_v21 = vadd.f32 %v938_v19, %v923_v25  ;;  %v971_v3 = vpop.permute.xlu0 %970 }
 0x1bc   :  { %5074 = vmatmul.mubr.msk.f32.gmra.mrb[26].mxu1 %vm1444_vm2, %v901_v29  ;;  %5580 = vmatmul.mubr.msk.f32.gmra.mrb[90].mxu0 %vm1444_vm2, %v901_v29 }
 0x1bd   :  { %v987_v40 = vadd.f32 %v967_v24, %v958_v21  ;;  %1230 = vrot.lane.b32.xlu1 %v6676_v10, %s6142_s30  ;;  %1188 = vrot.lane.b32.xlu0 %v6676_v10, %s6147_s11 }
 0x1be   :  { %v6995_v9 = vpop.permute.xlu1 %1012  ;;  %1732 = vmatprep.mubr.f32.mxu1 %v8696_v48  ;;  %5582 = vmatprep.mubr.msk.f32.mxu0 %vm6145_vm1, %v8696_v48 }
 0x1bf   :  { %v994_v20 = vadd.f32 %v6752_v50, %v987_v40  ;;  %v944_v52 = vpop.permute.xlu0 %943 }
 0x1c0   :  { %v961_v29 = vadd.f32 %v944_v52, %v926_v53 }
 0x1c1   :  { %v1001_v51 = vmax.f32 %v994_v20, 0.0  ;;  %1257 = vrot.lane.b32.xlu1 %v6686_v11, %s6146_s3  ;;  %1284 = vrot.lane.b32.xlu0 %v6686_v11, %s6147_s11 }
 0x1c2   :  { %v942_v34 = vpop.permute.xlu1 %941 }
 0x1c3   :  { %v960_v49 = vadd.f32 %v942_v34, %v925_v36  ;;  %5075 = vmatmul.mubr.msk.f32.gmra.mrb[28].mxu1 %vm1444_vm2, %v1001_v51  ;;  %5583 = vmatmul.mubr.msk.f32.gmra.mrb[92].mxu0 %vm1444_vm2, %v1001_v51  ;;  %v969_v28 = vpop.permute.xlu0 %968 }
 0x1c4   :  { %v988_v33 = vadd.f32 %v969_v28, %v959_v16  ;;  %1738 = vmatprep.mubr.f32.mxu1 %v8696_v48  ;;  %5585 = vmatprep.mubr.msk.f32.mxu0 %vm6145_vm1, %v8696_v48  ;;  %v929_v16 = vadd.f32 %v6945_v4, %v6584_v46 }
 0x1c5   :  { %v989_v39 = vadd.f32 %v971_v3, %v960_v49  ;;  %1261 = vrot.lane.b32.xlu1 %v6694_v14, %s6146_s3  ;;  %1326 = vrot.lane.b32.xlu0 %v6686_v11, %s6142_s30 }
 0x1c6   :  { %v995_v42 = vadd.f32 %v6752_v50, %v988_v33  ;;  %v7019_v6 = vpop.permute.xlu1 %1010 }
 0x1c7   :  { %v948_v18 = vpop.permute.xlu0 %947  ;;  %v996_v35 = vadd.f32 %v6752_v50, %v989_v39 }
 0x1c8   :  { %v1002_v27 = vmax.f32 %v995_v42, 0.0  ;;  %v963_v52 = vadd.f32 %v948_v18, %v928_v32  ;;  %v8700_v32 = vld [vmem:[#allocation2_spill] sm:$0xff] }
 0x1c9   :  { %1330 = vrot.lane.b32.xlu1 %v6694_v14, %s6142_s30  ;;  %1255 = vrot.lane.b32.xlu0 %v6690_v12, %s6146_s3  ;;  %v1003_v38 = vmax.f32 %v996_v35, 0.0  ;;  %v8697_v35 = vld [vmem:[#allocation10_spill] sm:$0xff] }
 0x1ca   :  { %5076 = vmatmul.mubr.msk.f32.gmra.mrb[30].mxu1 %vm1444_vm2, %v1002_v27  ;;  %5586 = vmatmul.mubr.msk.f32.gmra.mrb[94].mxu0 %vm1444_vm2, %v1002_v27  ;;  %v975_v55 = vpop.permute.xlu1 %974  ;;  %v8698_v27 = vld [vmem:[#allocation3_spill] sm:$0xff] }
 0x1cb   :  { %v7028_v24 = vpop.permute.xlu0 %1014  ;;  %1744 = vmatprep.mubr.f32.mxu1 %v8696_v48  ;;  %5588 = vmatprep.mubr.msk.f32.mxu0 %vm6145_vm1, %v8696_v48 }
 0x1cd   :  { %1286 = vrot.lane.b32.xlu1 %v6704_v15, %s6147_s11  ;;  %1288 = vrot.lane.b32.xlu0 %v6694_v14, %s6147_s11 }
 0x1ce   :  { %5077 = vmatmul.mubr.msk.f32.gmra.mrb[32].mxu1 %vm1444_vm2, %v1003_v38  ;;  %5589 = vmatmul.mubr.msk.f32.gmra.mrb[96].mxu0 %vm1444_vm2, %v1003_v38  ;;  %v7039_v54 = vpop.permute.xlu1 %1016 }
 0x1cf   :  { %v979_v25 = vpop.permute.xlu0 %978  ;;  %1750 = vmatprep.mubr.f32.mxu1 %v8696_v48  ;;  %5591 = vmatprep.mubr.msk.f32.mxu0 %vm6145_vm1, %v8696_v48 }
 0x1d1   :  { %1265 = vrot.lane.b32.xlu1 %v6708_v17, %s6146_s3  ;;  %1259 = vrot.lane.b32.xlu0 %v6704_v15, %s6146_s3 }
 0x1d2   :  { %v973_v19 = vpop.permute.xlu1 %972 }
 0x1d3   :  { %v990_v21 = vadd.f32 %v973_v19, %v961_v29  ;;  %v7050_v3 = vpop.permute.xlu0 %1020  ;;  %v8699_v19 = vld [vmem:[#allocation11_spill] sm:$0xff] }
 0x1d5   :  { %v997_v40 = vadd.f32 %v6752_v50, %v990_v21  ;;  %1334 = vrot.lane.b32.xlu1 %v6708_v17, %s6142_s30  ;;  %1328 = vrot.lane.b32.xlu0 %v6704_v15, %s6142_s30 }
 0x1d6   :  { %v946_v20 = vpop.permute.xlu1 %945 }
 0x1d7   :  { %v1004_v45 = vmax.f32 %v997_v40, 0.0  ;;  %v962_v36 = vadd.f32 %v946_v20, %v927_v41  ;;  %v977_v51 = vpop.permute.xlu0 %976  ;;  %v1030_v40 = vadd.f32 %v8700_v32, %v7019_v6  ;;  %v8702_v6 = vld [vmem:[#allocation13_spill] sm:$0xff]  ;;  %v8706_v32 = vld [vmem:[#allocation6_spill] sm:$0xff] }
 0x1d8   :  { %v992_v30 = vadd.f32 %v977_v51, %v963_v52  ;;  %v8701_v52 = vld [vmem:[#allocation12_spill] sm:$0xff] }
 0x1d9   :  { %v991_v44 = vadd.f32 %v975_v55, %v962_v36  ;;  %1290 = vrot.lane.b32.xlu1 %v6722_v23, %s6147_s11  ;;  %5078 = vmatmul.mubr.msk.f32.gmra.mrb[34].mxu1 %vm1444_vm2, %v1004_v45  ;;  %v1029_v55 = vadd.f32 %v6973_v13, %v8698_v27 }
 0x1da   :  { %5592 = vmatmul.mubr.msk.f32.gmra.mrb[98].mxu0 %vm1444_vm2, %v1004_v45  ;;  %1292 = vrot.lane.b32.xlu0 %v6708_v17, %s6147_s11  ;;  %v950_v43 = vpop.permute.xlu1 %949  ;;  %v999_v4 = vadd.f32 %v6752_v50, %v992_v30 }
 0x1db   :  { %v998_v61 = vadd.f32 %v6752_v50, %v991_v44  ;;  %v964_v34 = vadd.f32 %v950_v43, %v929_v16  ;;  %v1073_v49 = vpop.permute.xlu0 %1072  ;;  %1756 = vmatprep.mubr.f32.mxu1 %v8696_v48  ;;  %5594 = vmatprep.mubr.msk.f32.mxu0 %vm6145_vm1, %v8696_v48  ;;  %v8703_v44 = vld [vmem:[#allocation5_spill] sm:$0xff] }
 0x1dc   :  { %v1006_v42 = vmax.f32 %v999_v4, 0.0  ;;  %v1031_v30 = vadd.f32 %v6995_v9, %v8703_v44 }
 0x1dd   :  { %v1005_v46 = vmax.f32 %v998_v61, 0.0  ;;  %v993_v28 = vadd.f32 %v979_v25, %v964_v34  ;;  %1296 = vrot.lane.b32.xlu1 %v6732_v26, %s6147_s11 }
 0x1de   :  { %1263 = vrot.lane.b32.xlu0 %v6722_v23, %s6146_s3 }
 0x1df   :  { %v7078_v33 = vpop.permute.xlu1 %1018  ;;  %5079 = vmatmul.mubr.msk.f32.gmra.mrb[36].mxu1 %vm1444_vm2, %v1005_v46  ;;  %5595 = vmatmul.mubr.msk.f32.gmra.mrb[100].mxu0 %vm1444_vm2, %v1005_v46  ;;  %v7082_v39 = vpop.permute.xlu0 %1114  ;;  %v1000_v18 = vadd.f32 %v6752_v50, %v993_v28 }
 0x1e0   :  { %1762 = vmatprep.mubr.f32.mxu1 %v8696_v48  ;;  %5597 = vmatprep.mubr.msk.f32.mxu0 %vm6145_vm1, %v8696_v48 }
 0x1e1   :  { %1294 = vrot.lane.b32.xlu1 %v8697_v35, %s6147_s11  ;;  %v1007_v29 = vmax.f32 %v1000_v18, 0.0 }
 0x1e2   :  { %1332 = vrot.lane.b32.xlu0 %v6722_v23, %s6142_s30 }
 0x1e3   :  { %v1046_v38 = vpop.permute.xlu1 %1045  ;;  %5080 = vmatmul.mubr.msk.f32.gmra.mrb[38].mxu1 %vm1444_vm2, %v1006_v42  ;;  %5598 = vmatmul.mubr.msk.f32.gmra.mrb[102].mxu0 %vm1444_vm2, %v1006_v42  ;;  %v1044_v53 = vpop.permute.xlu0 %1043 }
 0x1e4   :  { %v1064_v25 = vadd.f32 %v1044_v53, %v1029_v55  ;;  %1768 = vmatprep.mubr.f32.mxu1 %v8696_v48  ;;  %5600 = vmatprep.mubr.msk.f32.mxu0 %vm6145_vm1, %v8696_v48 }
 0x1e5   :  { %1390 = vrot.lane.b32.xlu1 %v8699_v19, %s6147_s11 }
 0x1e6   :  { %v1093_v13 = vadd.f32 %v1073_v49, %v1064_v25  ;;  %1338 = vrot.lane.b32.xlu0 %v6732_v26, %s6142_s30  ;;  %v1065_v26 = vadd.f32 %v1046_v38, %v1030_v40  ;;  %v8704_v38 = vld [vmem:[#allocation4_spill] sm:$0xff]  ;;  %v1034_v40 = vadd.f32 %v8706_v32, %v7078_v33 }
 0x1e7   :  { %v1077_v21 = vpop.permute.xlu1 %1076  ;;  %5081 = vmatmul.mubr.msk.f32.gmra.mrb[40].mxu1 %vm1444_vm2, %v1007_v29  ;;  %5601 = vmatmul.mubr.msk.f32.gmra.mrb[104].mxu0 %vm1444_vm2, %v1007_v29  ;;  %v7105_v41 = vpop.permute.xlu0 %1118  ;;  %v1032_v53 = vadd.f32 %v8704_v38, %v7028_v24 }
 0x1e8   :  { %v1100_v20 = vadd.f32 %v6752_v50, %v1093_v13  ;;  %1774 = vmatprep.mubr.f32.mxu1 %v8696_v48  ;;  %5603 = vmatprep.mubr.msk.f32.mxu0 %vm6145_vm1, %v8696_v48  ;;  %v8705_v13 = vld [vmem:[#allocation7_spill] sm:$0xff] }
 0x1e9   :  { %1361 = vrot.lane.b32.xlu1 %v8701_v52, %s6146_s3 }
 0x1ea   :  { %v1107_v45 = vmax.f32 %v1100_v20, 0.0  ;;  %1267 = vrot.lane.b32.xlu0 %v8697_v35, %s6146_s3 }
 0x1eb   :  { %v1050_v36 = vpop.permute.xlu1 %1049  ;;  %v1075_v51 = vpop.permute.xlu0 %1074 }
 0x1ec   :  { %v1094_v16 = vadd.f32 %v1075_v51, %v1065_v26  ;;  %5082 = vmatmul.mubr.msk.f32.gmra.mrb[42].mxu1 %vm1444_vm2, %v1107_v45  ;;  %5604 = vmatmul.mubr.msk.f32.gmra.mrb[106].mxu0 %vm1444_vm2, %v1107_v45  ;;  %v1067_v25 = vadd.f32 %v1050_v36, %v1032_v53 }
 0x1ed   :  { %1394 = vrot.lane.b32.xlu1 %v8702_v6, %s6147_s11  ;;  %1780 = vmatprep.mubr.f32.mxu1 %v8696_v48 }
 0x1ee   :  { %v1101_v43 = vadd.f32 %v6752_v50, %v1094_v16  ;;  %1336 = vrot.lane.b32.xlu0 %v8697_v35, %s6142_s30  ;;  %5606 = vmatprep.mubr.msk.f32.mxu0 %vm6145_vm1, %v8696_v48 }
 0x1ef   :  { %v1054_v61 = vpop.permute.xlu1 %1053  ;;  %v1048_v34 = vpop.permute.xlu0 %1047 }
 0x1f0   :  { %v1108_v49 = vmax.f32 %v1101_v43, 0.0  ;;  %v1066_v46 = vadd.f32 %v1048_v34, %v1031_v30  ;;  %v1069_v26 = vadd.f32 %v1054_v61, %v1034_v40 }
 0x1f1   :  { %1365 = vrot.lane.b32.xlu1 %v6780_v37, %s6146_s3 }
 0x1f2   :  { %v1095_v4 = vadd.f32 %v1077_v21, %v1066_v46  ;;  %1363 = vrot.lane.b32.xlu0 %v8699_v19, %s6146_s3  ;;  %5083 = vmatmul.mubr.msk.f32.gmra.mrb[44].mxu1 %vm1444_vm2, %v1108_v49  ;;  %v1033_v21 = vadd.f32 %v7039_v54, %v8705_v13 }
 0x1f3   :  { %5607 = vmatmul.mubr.msk.f32.gmra.mrb[108].mxu0 %vm1444_vm2, %v1108_v49  ;;  %v7135_v9 = vpop.permute.xlu1 %1122  ;;  %v7137_v28 = vpop.permute.xlu0 %1116  ;;  %1786 = vmatprep.mubr.f32.mxu1 %v8696_v48 }
 0x1f4   :  { %v1102_v42 = vadd.f32 %v6752_v50, %v1095_v4  ;;  %5609 = vmatprep.mubr.msk.f32.mxu0 %vm6145_vm1, %v8696_v48 }
 0x1f5   :  { %1398 = vrot.lane.b32.xlu1 %v6790_v31, %s6147_s11 }
 0x1f6   :  { %v1109_v18 = vmax.f32 %v1102_v42, 0.0  ;;  %1367 = vrot.lane.b32.xlu0 %v8702_v6, %s6146_s3  ;;  %v8707_v6 = vld [vmem:[#allocation8_spill] sm:$0xff] }
 0x1f7   :  { %v1085_v27 = vpop.permute.xlu1 %1084  ;;  %v1081_v55 = vpop.permute.xlu0 %1080 }
 0x1f8   :  { %5084 = vmatmul.mubr.msk.f32.gmra.mrb[46].mxu1 %vm1444_vm2, %v1109_v18  ;;  %5610 = vmatmul.mubr.msk.f32.gmra.mrb[110].mxu0 %vm1444_vm2, %v1109_v18  ;;  %v8708_v18 = vld [vmem:[#allocation9_spill] sm:$0xff] }
 0x1f9   :  { %1369 = vrot.lane.b32.xlu1 %v6803_v47, %s6146_s3  ;;  %1792 = vmatprep.mubr.f32.mxu1 %v8696_v48 }
 0x1fa   :  { %1392 = vrot.lane.b32.xlu0 %v6780_v37, %s6147_s11  ;;  %5612 = vmatprep.mubr.msk.f32.mxu0 %vm6145_vm1, %v8696_v48 }
 0x1fb   :  { %v7158_v29 = vpop.permute.xlu1 %1126  ;;  %v1079_v19 = vpop.permute.xlu0 %1078 }
 0x1fc   :  { %v1096_v24 = vadd.f32 %v1079_v19, %v1067_v25 }
 0x1fd   :  { %1400 = vrot.lane.b32.xlu1 %v6820_v22, %s6147_s11 }
 0x1fe   :  { %v1103_v20 = vadd.f32 %v6752_v50, %v1096_v24  ;;  %1371 = vrot.lane.b32.xlu0 %v6790_v31, %s6146_s3 }
 0x1ff   :  { %v1083_v37 = vpop.permute.xlu1 %1082  ;;  %v1052_v52 = vpop.permute.xlu0 %1051 }
 0x200   :  { %v1110_v45 = vmax.f32 %v1103_v20, 0.0  ;;  %v1068_v36 = vadd.f32 %v1052_v52, %v1033_v21  ;;  %v1098_v51 = vadd.f32 %v1083_v37, %v1069_v26  ;;  %v1137_v21 = vadd.f32 %v7105_v41, %v6630_v58 }
 0x201   :  { %1373 = vrot.lane.b32.xlu1 %v6820_v22, %s6146_s3  ;;  %v1035_v22 = vadd.f32 %v7050_v3, %v8707_v6  ;;  %v1135_v3 = vadd.f32 %v7082_v39, %v6622_v56  ;;  %v1136_v56 = vadd.f32 %v8708_v18, %v7137_v28 }
 0x202   :  { %v1097_v16 = vadd.f32 %v1081_v55, %v1068_v36  ;;  %1396 = vrot.lane.b32.xlu0 %v6803_v47, %s6147_s11  ;;  %5085 = vmatmul.mubr.msk.f32.gmra.mrb[48].mxu1 %vm1444_vm2, %v1110_v45  ;;  %v1105_v44 = vadd.f32 %v6752_v50, %v1098_v51 }
 0x203   :  { %5613 = vmatmul.mubr.msk.f32.gmra.mrb[112].mxu0 %vm1444_vm2, %v1110_v45  ;;  %v1179_v54 = vpop.permute.xlu1 %1178  ;;  %v1121_v33 = vpop.permute.xlu0 %1120  ;;  %1798 = vmatprep.mubr.f32.mxu1 %v8696_v48 }
 0x204   :  { %v1104_v31 = vadd.f32 %v6752_v50, %v1097_v16  ;;  %5615 = vmatprep.mubr.msk.f32.mxu0 %vm6145_vm1, %v8696_v48  ;;  %v1112_v34 = vmax.f32 %v1105_v44, 0.0 }
 0x206   :  { %v1111_v30 = vmax.f32 %v1104_v31, 0.0  ;;  %1402 = vrot.lane.b32.xlu0 %v6818_v5, %s6147_s11  ;;  %v1139_v31 = vadd.f32 %v7135_v9, %v6638_v60 }
 0x207   :  { %v7184_v47 = vpop.permute.xlu1 %1220  ;;  %v1056_v43 = vpop.permute.xlu0 %1055 }
 0x208   :  { %v1070_v61 = vadd.f32 %v1056_v43, %v1035_v22  ;;  %5086 = vmatmul.mubr.msk.f32.gmra.mrb[50].mxu1 %vm1444_vm2, %v1111_v30  ;;  %5616 = vmatmul.mubr.msk.f32.gmra.mrb[114].mxu0 %vm1444_vm2, %v1111_v30 }
 0x209   :  { %1804 = vmatprep.mubr.f32.mxu1 %v8696_v48  ;;  %5618 = vmatprep.mubr.msk.f32.mxu0 %vm6145_vm1, %v8696_v48 }
 0x20a   :  { %v1099_v49 = vadd.f32 %v1085_v27, %v1070_v61 }
 0x20b   :  { %v1150_v46 = vpop.permute.xlu1 %1149  ;;  %v7193_v5 = vpop.permute.xlu0 %1124 }
 0x20c   :  { %v1106_v4 = vadd.f32 %v6752_v50, %v1099_v49  ;;  %v1170_v42 = vadd.f32 %v1150_v46, %v1135_v3  ;;  %5087 = vmatmul.mubr.msk.f32.gmra.mrb[52].mxu1 %vm1444_vm2, %v1112_v34  ;;  %5619 = vmatmul.mubr.msk.f32.gmra.mrb[116].mxu0 %vm1444_vm2, %v1112_v34  ;;  %v1141_v46 = vadd.f32 %v7158_v29, %v6646_v62 }
 0x20d   :  { %1810 = vmatprep.mubr.f32.mxu1 %v8696_v48  ;;  %5621 = vmatprep.mubr.msk.f32.mxu0 %vm6145_vm1, %v8696_v48 }
 0x20e   :  { %v1113_v39 = vmax.f32 %v1106_v4, 0.0  ;;  %v1199_v27 = vadd.f32 %v1179_v54, %v1170_v42  ;;  %v1138_v54 = vadd.f32 %v6626_v57, %v1121_v33  ;;  %v1140_v4 = vadd.f32 %v6634_v59, %v7193_v5 }
 0x20f   :  { %v1183_v55 = vpop.permute.xlu1 %1182  ;;  %v1152_v38 = vpop.permute.xlu0 %1151 }
 0x210   :  { %v1206_v53 = vadd.f32 %v6752_v50, %v1199_v27  ;;  %v1171_v25 = vadd.f32 %v1152_v38, %v1136_v56  ;;  %5088 = vmatmul.mubr.msk.f32.gmra.mrb[54].mxu1 %vm1444_vm2, %v1113_v39  ;;  %5622 = vmatmul.mubr.msk.f32.gmra.mrb[118].mxu0 %vm1444_vm2, %v1113_v39 }
 0x211   :  { %1816 = vmatprep.mubr.f32.mxu1 %v8696_v48  ;;  %5624 = vmatprep.mubr.msk.f32.mxu0 %vm6145_vm1, %v8696_v48 }
 0x212   :  { %v1213_v19 = vmax.f32 %v1206_v53, 0.0 }
 0x213   :  { %v1181_v24 = vpop.permute.xlu1 %1180  ;;  %v1156_v13 = vpop.permute.xlu0 %1155 }
 0x214   :  { %v1200_v28 = vadd.f32 %v1181_v24, %v1171_v25  ;;  %5089 = vmatmul.mubr.msk.f32.gmra.mrb[56].mxu1 %vm1444_vm2, %v1213_v19  ;;  %5625 = vmatmul.mubr.msk.f32.gmra.mrb[120].mxu0 %vm1444_vm2, %v1213_v19  ;;  %v1173_v6 = vadd.f32 %v1156_v13, %v1138_v54  ;;  %v1241_v13 = vadd.f32 %v7184_v47, %v6654_v0  ;;  %v7284_v47 = vld [vmem:[%s8652_s2] ss:$0 sm:$0xff] }
 0x215   :  { %1822 = vmatprep.mubr.f32.mxu1 %v8696_v48  ;;  %5627 = vmatprep.mubr.msk.f32.mxu0 %vm6145_vm1, %v8696_v48 }
 0x216   :  { %v1207_v32 = vadd.f32 %v6752_v50, %v1200_v28 }
 0x217   :  { %v1154_v40 = vpop.permute.xlu1 %1153  ;;  %v7217_v20 = vpop.permute.xlu0 %1224 }
 0x218   :  { %v1214_v37 = vmax.f32 %v1207_v32, 0.0  ;;  %v1172_v52 = vadd.f32 %v1154_v40, %v1137_v21 }
 0x21a   :  { %v1201_v26 = vadd.f32 %v1183_v55, %v1172_v52  ;;  %5090 = vmatmul.mubr.msk.f32.gmra.mrb[58].mxu1 %vm1444_vm2, %v1214_v37  ;;  %5628 = vmatmul.mubr.msk.f32.gmra.mrb[122].mxu0 %vm1444_vm2, %v1214_v37 }
 0x21b   :  { %v7221_v45 = vpop.permute.xlu1 %1222  ;;  %v1160_v36 = vpop.permute.xlu0 %1159  ;;  %1828 = vmatprep.mubr.f32.mxu1 %v8696_v48  ;;  %5630 = vmatprep.mubr.msk.f32.mxu0 %vm6145_vm1, %v8696_v48 }
 0x21c   :  { %v1208_v58 = vadd.f32 %v6752_v50, %v1201_v26  ;;  %v1175_v56 = vadd.f32 %v1160_v36, %v1140_v4  ;;  %v1242_v21 = vadd.f32 %v6650_v63, %v7221_v45  ;;  %v2392_v63 = vld [vmem:[%s8653_s5 + $0x20] sm:$0xff]  ;;  %v2393_v45 = vld [vmem:[%s8653_s5 + $0x28] sm:$0xff] }
 0x21e   :  { %v1215_v41 = vmax.f32 %v1208_v58, 0.0 }
 0x21f   :  { %v1187_v51 = vpop.permute.xlu1 %1186  ;;  %v7227_v16 = vpop.permute.xlu0 %1228 }
 0x220   :  { %5091 = vmatmul.mubr.msk.f32.gmra.mrb[60].mxu1 %vm1444_vm2, %v1215_v41  ;;  %5631 = vmatmul.mubr.msk.f32.gmra.mrb[124].mxu0 %vm1444_vm2, %v1215_v41 }
 0x221   :  { %1834 = vmatprep.mubr.f32.mxu1 %v8696_v48  ;;  %5633 = vmatprep.mubr.msk.f32.mxu0 %vm6145_vm1, %v8696_v48 }
 0x223   :  { %v1158_v22 = vpop.permute.xlu1 %1157  ;;  %v1185_v44 = vpop.permute.xlu0 %1184 }
 0x224   :  { %v1174_v30 = vadd.f32 %v1158_v22, %v1139_v31  ;;  %v1202_v43 = vadd.f32 %v1185_v44, %v1173_v6  ;;  %v5981_v31 = vpack.c.bf16 %v2393_v45, %v2392_v63  ;;  %v1243_v44 = vadd.f32 %v7217_v20, %v6662_v2 }
 0x226   :  { %v1203_v61 = vadd.f32 %v1187_v51, %v1174_v30  ;;  %v1209_v57 = vadd.f32 %v6752_v50, %v1202_v43  ;;  %5982 = vmatpush3.bf16.msra.mxu1 %v5981_v31 }
 0x227   :  { %v7238_v33 = vpop.permute.xlu1 %1226  ;;  %v1191_v3 = vpop.permute.xlu0 %1190 }
 0x228   :  { %v1210_v34 = vadd.f32 %v6752_v50, %v1203_v61  ;;  %v1216_v49 = vmax.f32 %v1209_v57, 0.0  ;;  %v1244_v2 = vadd.f32 %v6658_v1, %v7238_v33 }
 0x22a   :  { %5092 = vmatmul.mubr.msk.f32.gmra.mrb[62].mxu1 %vm1444_vm2, %v1216_v49  ;;  %5634 = vmatmul.mubr.msk.f32.gmra.mrb[126].mxu0 %vm1444_vm2, %v1216_v49  ;;  %v1217_v42 = vmax.f32 %v1210_v34, 0.0 }
 0x22b   :  { %v1162_v60 = vpop.permute.xlu1 %1161  ;;  %v7245_v9 = vpop.permute.xlu0 %1232  ;;  %1840 = vmatprep.mubr.f32.mxu1 %v8696_v48  ;;  %5636 = vmatprep.mubr.msk.f32.mxu0 %vm6145_vm1, %v8696_v48 }
 0x22c   :  { %v1176_v18 = vadd.f32 %v1162_v60, %v1141_v46 }
 0x22e   :  { %5093 = vmatmul.mubr.msk.f32.gmra.mrb[64].mxu1 %vm1444_vm2, %v1217_v42  ;;  %5637 = vmatmul.mubr.msk.f32.gmra.mrb[128].mxu0 %vm1444_vm2, %v1217_v42  ;;  %v1205_v39 = vadd.f32 %v1191_v3, %v1176_v18  ;;  %v8709_v3 = vmov 0.0|0.0  }
 0x22f   :  { %v7254_v62 = vpop.permute.xlu1 %1230  ;;  %v1189_v29 = vpop.permute.xlu0 %1188  ;;  %1846 = vmatprep.mubr.f32.mxu1 %v8696_v48  ;;  %5639 = vmatprep.mubr.msk.f32.mxu0 %vm6145_vm1, %v8696_v48 }
 0x230   :  { %v1204_v27 = vadd.f32 %v1189_v29, %v1175_v56  ;;  %v1212_v38 = vadd.f32 %v6752_v50, %v1205_v39  ;;  %5983 = vmatprep.subr.bf16.mxu1 %v8709_v3 }
 0x232   :  { %v1211_v55 = vadd.f32 %v6752_v50, %v1204_v27  ;;  %v1219_v24 = vmax.f32 %v1212_v38, 0.0 }
 0x233   :  { %v1258_v59 = vpop.permute.xlu1 %1257  ;;  %v1285_v5 = vpop.permute.xlu0 %1284 }
 0x234   :  { %v1218_v53 = vmax.f32 %v1211_v55, 0.0  ;;  %v1277_v40 = vadd.f32 %v1258_v59, %v1242_v21 }
 0x236   :  { %5094 = vmatmul.mubr.msk.f32.gmra.mrb[66].mxu1 %vm1444_vm2, %v1218_v53  ;;  %5640 = vmatmul.mubr.msk.f32.gmra.mrb[130].mxu0 %vm1444_vm2, %v1218_v53  ;;  %v1245_v53 = vadd.f32 %v7227_v16, %v6669_v8 }
 0x237   :  { %v1262_v25 = vpop.permute.xlu1 %1261  ;;  %v7263_v19 = vpop.permute.xlu0 %1326  ;;  %1852 = vmatprep.mubr.f32.mxu1 %v8696_v48  ;;  %5642 = vmatprep.mubr.msk.f32.mxu0 %vm6145_vm1, %v8696_v48 }
 0x238   :  { %v1279_v42 = vadd.f32 %v1262_v25, %v1244_v2  ;;  %v1347_v31 = vadd.f32 %v7263_v19, %v6690_v12 }
 0x23a   :  { %5095 = vmatmul.mubr.msk.f32.gmra.mrb[68].mxu1 %vm1444_vm2, %v1219_v24  ;;  %5643 = vmatmul.mubr.msk.f32.gmra.mrb[132].mxu0 %vm1444_vm2, %v1219_v24  ;;  %v1246_v24 = vadd.f32 %v6666_v7, %v7254_v62 }
 0x23b   :  { %v7272_v50 = vpop.permute.xlu1 %1330  ;;  %v1256_v28 = vpop.permute.xlu0 %1255  ;;  %1858 = vmatprep.mubr.f32.mxu1 %v8696_v48  ;;  %5645 = vmatprep.mubr.msk.f32.mxu0 %vm6145_vm1, %v8696_v48 }
 0x23c   :  { %v1276_v32 = vadd.f32 %v1256_v28, %v1241_v13 }
 0x23e   :  { %v1305_v37 = vadd.f32 %v1285_v5, %v1276_v32 }
 0x23f   :  { %v1287_v52 = vpop.permute.xlu1 %1286  ;;  %v7279_v0 = vpop.f32.mrb[0].mxu1 }
 0x240   :  { %v1312_v26 = vadd.f32 %v7284_v47, %v1305_v37  ;;  %v1306_v36 = vadd.f32 %v1287_v52, %v1277_v40  ;;  %v1289_v58 = vpop.permute.xlu0 %1288  ;;  %v1999_v41 = vpop.f32.mrb[64].mxu0 }
 0x241   :  { %v1660_v51 = vpop.f32.mrb[1].mxu1  ;;  %v5542_v54 = vpop.f32.mrb[65].mxu0 }
 0x242   :  { %v1319_v6 = vmax.f32 %v1312_v26, 0.0  ;;  %v1313_v22 = vadd.f32 %v7284_v47, %v1306_v36 }
 0x243   :  { %v1266_v30 = vpop.permute.xlu1 %1265 }
 0x244   :  { %v1260_v43 = vpop.permute.xlu0 %1259  ;;  %5096 = vmatmul.mubr.msk.f32.gmra.mrb[70].mxu1 %vm1444_vm2, %v1319_v6  ;;  %5646 = vmatmul.mubr.msk.f32.gmra.mrb[134].mxu0 %vm1444_vm2, %v1319_v6  ;;  %v1320_v57 = vmax.f32 %v1313_v22, 0.0  ;;  %v1281_v32 = vadd.f32 %v1266_v30, %v1246_v24 }
 0x245   :  { %v1278_v61 = vadd.f32 %v1260_v43, %v1243_v44  ;;  %1864 = vmatprep.mubr.f32.mxu1 %v8696_v48  ;;  %5648 = vmatprep.mubr.msk.f32.mxu0 %vm6145_vm1, %v8696_v48  ;;  %v1247_v44 = vadd.f32 %v7245_v9, %v6676_v10 }
 0x247   :  { %v1307_v34 = vadd.f32 %v1289_v58, %v1278_v61  ;;  %v7302_v49 = vpop.permute.xlu1 %1334 }
 0x248   :  { %v7306_v20 = vpop.permute.xlu0 %1328  ;;  %5097 = vmatmul.mubr.msk.f32.gmra.mrb[72].mxu1 %vm1444_vm2, %v1320_v57  ;;  %5649 = vmatmul.mubr.msk.f32.gmra.mrb[136].mxu0 %vm1444_vm2, %v1320_v57 }
 0x249   :  { %v1314_v46 = vadd.f32 %v7284_v47, %v1307_v34  ;;  %v7311_v60 = vpop.f32.mrb[2].mxu1  ;;  %v2003_v4 = vpop.f32.mrb[66].mxu0  ;;  %1870 = vmatprep.mubr.f32.mxu1 %v8696_v48  ;;  %5651 = vmatprep.mubr.msk.f32.mxu0 %vm6145_vm1, %v8696_v48 }
 0x24a   :  { %v1665_v18 = vpop.f32.mrb[3].mxu1  ;;  %2225 = vrot.lane.b32.xlu0 %v7311_v60, %s6142_s30  ;;  %v5545_v1 = vpop.f32.mrb[67].mxu0 }
 0x24b   :  { %v1321_v33 = vmax.f32 %v1314_v46, 0.0  ;;  %v1291_v56 = vpop.permute.xlu1 %1290 }
 0x24c   :  { %v1308_v29 = vadd.f32 %v1291_v56, %v1279_v42  ;;  %v1293_v39 = vpop.permute.xlu0 %1292 }
 0x24d   :  { %5098 = vmatmul.mubr.msk.f32.gmra.mrb[74].mxu1 %vm1444_vm2, %v1321_v33  ;;  %5652 = vmatmul.mubr.msk.f32.gmra.mrb[138].mxu0 %vm1444_vm2, %v1321_v33  ;;  %v7320_v27 = vpop.f32.mrb[4].mxu1  ;;  %v2007_v55 = vpop.f32.mrb[68].mxu0 }
 0x24e   :  { %v1315_v59 = vadd.f32 %v7284_v47, %v1308_v29  ;;  %v1670_v5 = vpop.f32.mrb[5].mxu1  ;;  %2246 = vrot.lane.b32.xlu0 %v7320_v27, %s6146_s3  ;;  %2227 = vrot.lane.b32.xlu1 %v7320_v27, %s6142_s30  ;;  %v5548_v38 = vpop.f32.mrb[69].mxu0 }
 0x24f   :  { %v1297_v25 = vpop.permute.xlu1 %1296  ;;  %1876 = vmatprep.mubr.f32.mxu1 %v8696_v48  ;;  %5654 = vmatprep.mubr.msk.f32.mxu0 %vm6145_vm1, %v8696_v48  ;;  %v1349_v38 = vadd.f32 %v7272_v50, %v6704_v15 }
 0x250   :  { %v1322_v13 = vmax.f32 %v1315_v59, 0.0  ;;  %v1264_v28 = vpop.permute.xlu0 %1263 }
 0x251   :  { %v1280_v21 = vadd.f32 %v1264_v28, %v1245_v53 }
 0x252   :  { %5099 = vmatmul.mubr.msk.f32.gmra.mrb[76].mxu1 %vm1444_vm2, %v1322_v13  ;;  %5655 = vmatmul.mubr.msk.f32.gmra.mrb[140].mxu0 %vm1444_vm2, %v1322_v13  ;;  %v1348_v13 = vadd.f32 %v6686_v11, %v7306_v20  ;;  %v1351_v11 = vadd.f32 %v7302_v49, %v6722_v23 }
 0x253   :  { %v1309_v40 = vadd.f32 %v1293_v39, %v1280_v21  ;;  %v1295_v37 = vpop.permute.xlu1 %1294  ;;  %1882 = vmatprep.mubr.f32.mxu1 %v8696_v48  ;;  %5657 = vmatprep.mubr.msk.f32.mxu0 %vm6145_vm1, %v8696_v48 }
 0x254   :  { %v1310_v8 = vadd.f32 %v1295_v37, %v1281_v32  ;;  %v7339_v16 = vpop.permute.xlu0 %1332 }
 0x255   :  { %v1316_v7 = vadd.f32 %v7284_v47, %v1309_v40  ;;  %v7342_v62 = vpop.f32.mrb[6].mxu1  ;;  %v2011_v52 = vpop.f32.mrb[70].mxu0 }
 0x256   :  { %v1675_v26 = vpop.f32.mrb[7].mxu1  ;;  %2248 = vrot.lane.b32.xlu0 %v7342_v62, %s6146_s3  ;;  %v5551_v36 = vpop.f32.mrb[71].mxu0  ;;  %v1317_v41 = vadd.f32 %v7284_v47, %v1310_v8  ;;  %v1350_v52 = vadd.f32 %v6694_v14, %v7339_v16 }
 0x257   :  { %v1323_v58 = vmax.f32 %v1316_v7, 0.0  ;;  %v1391_v63 = vpop.permute.xlu1 %1390 }
 0x258   :  { %v7347_v45 = vpop.permute.xlu0 %1338  ;;  %v1324_v30 = vmax.f32 %v1317_v41, 0.0 }
 0x259   :  { %5100 = vmatmul.mubr.msk.f32.gmra.mrb[78].mxu1 %vm1444_vm2, %v1323_v58  ;;  %5658 = vmatmul.mubr.msk.f32.gmra.mrb[142].mxu0 %vm1444_vm2, %v1323_v58  ;;  %v7351_v51 = vpop.f32.mrb[8].mxu1  ;;  %v2015_v54 = vpop.f32.mrb[72].mxu0 }
 0x25a   :  { %v1680_v6 = vpop.f32.mrb[9].mxu1  ;;  %2229 = vrot.lane.b32.xlu0 %v7342_v62, %s6142_s30  ;;  %v5554_v22 = vpop.f32.mrb[73].mxu0  ;;  %1888 = vmatprep.mubr.f32.mxu1 %v8696_v48 }
 0x25b   :  { %v1362_v43 = vpop.permute.xlu1 %1361  ;;  %5660 = vmatprep.mubr.msk.f32.mxu0 %vm6145_vm1, %v8696_v48 }
 0x25c   :  { %v1382_v61 = vadd.f32 %v1362_v43, %v1347_v31  ;;  %v1268_v57 = vpop.permute.xlu0 %1267 }
 0x25d   :  { %v1282_v34 = vadd.f32 %v1268_v57, %v1247_v44  ;;  %5101 = vmatmul.mubr.msk.f32.gmra.mrb[80].mxu1 %vm1444_vm2, %v1324_v30  ;;  %5661 = vmatmul.mubr.msk.f32.gmra.mrb[144].mxu0 %vm1444_vm2, %v1324_v30 }
 0x25e   :  { %2250 = vrot.lane.b32.xlu0 %v7351_v51, %s6146_s3  ;;  %1893 = vmatprep.mubr.f32.mxu1 %v8696_v48  ;;  %v1411_v12 = vadd.f32 %v1391_v63, %v1382_v61 }
 0x25f   :  { %v1311_v19 = vadd.f32 %v1297_v25, %v1282_v34  ;;  %v1395_v10 = vpop.permute.xlu1 %1394  ;;  %5663 = vmatprep.mubr.msk.f32.mxu0 %vm6145_vm1, %v8696_v48 }
 0x260   :  { %v1337_v9 = vpop.permute.xlu0 %1336  ;;  %v1418_v1 = vadd.f32 %v7284_v47, %v1411_v12 }
 0x261   :  { %v1318_v2 = vadd.f32 %v7284_v47, %v1311_v19  ;;  %v1683_v46 = vpop.f32.mrb[10].mxu1  ;;  %v2019_v4 = vpop.f32.mrb[74].mxu0  ;;  %v1352_v23 = vadd.f32 %v6708_v17, %v1337_v9 }
 0x262   :  { %v1685_v42 = vpop.f32.mrb[11].mxu1  ;;  %2231 = vrot.lane.b32.xlu0 %v7351_v51, %s6142_s30  ;;  %v5557_v18 = vpop.f32.mrb[75].mxu0  ;;  %v1425_v53 = vmax.f32 %v1418_v1, 0.0 }
 0x263   :  { %v1325_v33 = vmax.f32 %v1318_v2, 0.0  ;;  %v1366_v56 = vpop.permute.xlu1 %1365 }
 0x264   :  { %v1364_v29 = vpop.permute.xlu0 %1363  ;;  %v1384_v28 = vadd.f32 %v1366_v56, %v1349_v38 }
 0x265   :  { %5102 = vmatmul.mubr.msk.f32.gmra.mrb[82].mxu1 %vm1444_vm2, %v1325_v33  ;;  %5664 = vmatmul.mubr.msk.f32.gmra.mrb[146].mxu0 %vm1444_vm2, %v1325_v33  ;;  %v1688_v39 = vpop.f32.mrb[12].mxu1  ;;  %v2023_v55 = vpop.f32.mrb[76].mxu0  ;;  %v1383_v21 = vadd.f32 %v1364_v29, %v1348_v13 }
 0x266   :  { %v1690_v59 = vpop.f32.mrb[13].mxu1  ;;  %2252 = vrot.lane.b32.xlu0 %v1683_v46, %s6146_s3  ;;  %v5560_v5 = vpop.f32.mrb[77].mxu0  ;;  %1898 = vmatprep.mubr.f32.mxu1 %v8696_v48  ;;  %v1413_v32 = vadd.f32 %v1395_v10, %v1384_v28  ;;  %v1353_v10 = vadd.f32 %v7347_v45, %v8697_v35 }
 0x267   :  { %v1399_v25 = vpop.permute.xlu1 %1398  ;;  %5666 = vmatprep.mubr.msk.f32.mxu0 %vm6145_vm1, %v8696_v48 }
 0x268   :  { %v1368_v24 = vpop.permute.xlu0 %1367  ;;  %v1420_v26 = vadd.f32 %v7284_v47, %v1413_v32 }
 0x269   :  { %5103 = vmatmul.mubr.msk.f32.gmra.mrb[84].mxu1 %vm1444_vm2, %v1425_v53  ;;  %5667 = vmatmul.mubr.msk.f32.gmra.mrb[148].mxu0 %vm1444_vm2, %v1425_v53  ;;  %v1385_v49 = vadd.f32 %v1368_v24, %v1350_v52 }
 0x26a   :  { %2233 = vrot.lane.b32.xlu0 %v1683_v46, %s6142_s30  ;;  %1903 = vmatprep.mubr.f32.mxu1 %v8696_v48  ;;  %v1427_v6 = vmax.f32 %v1420_v26, 0.0 }
 0x26b   :  { %5669 = vmatprep.mubr.msk.f32.mxu0 %vm6145_vm1, %v8696_v48  ;;  %v1370_v15 = vpop.permute.xlu1 %1369 }
 0x26c   :  { %v1393_v50 = vpop.permute.xlu0 %1392  ;;  %v1386_v36 = vadd.f32 %v1370_v15, %v1351_v11 }
 0x26d   :  { %v1412_v40 = vadd.f32 %v1393_v50, %v1383_v21 }
 0x26e   :  { %2254 = vrot.lane.b32.xlu0 %v1688_v39, %s6146_s3  ;;  %v1415_v22 = vadd.f32 %v1399_v25, %v1386_v36 }
 0x26f   :  { %v1419_v20 = vadd.f32 %v7284_v47, %v1412_v40  ;;  %v7393_v37 = vpop.f32.mrb[14].mxu1  ;;  %v2027_v7 = vpop.f32.mrb[78].mxu0 }
 0x270   :  { %v1372_v8 = vpop.permute.xlu0 %1371  ;;  %v1695_v41 = vpop.f32.mrb[15].mxu1  ;;  %v1422_v9 = vadd.f32 %v7284_v47, %v1415_v22 }
 0x271   :  { %v1426_v58 = vmax.f32 %v1419_v20, 0.0  ;;  %v5563_v63 = vpop.f32.mrb[79].mxu0  ;;  %v1401_v54 = vpop.permute.xlu1 %1400  ;;  %v1387_v44 = vadd.f32 %v1372_v8, %v1352_v23  ;;  %v2395_v23 = vld [vmem:[%s8653_s5 + $0x38] sm:$0xff] }
 0x272   :  { %2271 = vrot.lane.b32.xlu0 %v7393_v37, %s6147_s11  ;;  %v1429_v56 = vmax.f32 %v1422_v9, 0.0 }
 0x273   :  { %5104 = vmatmul.mubr.msk.f32.gmra.mrb[86].mxu1 %vm1444_vm2, %v1426_v58  ;;  %5670 = vmatmul.mubr.msk.f32.gmra.mrb[150].mxu0 %vm1444_vm2, %v1426_v58  ;;  %v7403_v31 = vpop.f32.mrb[16].mxu1  ;;  %v2031_v16 = vpop.f32.mrb[80].mxu0  ;;  %v1416_v2 = vadd.f32 %v1401_v54, %v1387_v44  ;;  %v2394_v54 = vld [vmem:[%s8653_s5 + $0x30] sm:$0xff] }
 0x274   :  { %v1397_v14 = vpop.permute.xlu0 %1396  ;;  %2273 = vrot.lane.b32.xlu1 %v7403_v31, %s6147_s11  ;;  %1908 = vmatprep.mubr.f32.mxu1 %v8696_v48  ;;  %v7408_v43 = vpop.f32.mrb[17].mxu1  ;;  %v5984_v16 = vpack.c.bf16 %v2395_v23, %v2394_v54 }
 0x275   :  { %v1414_v30 = vadd.f32 %v1397_v14, %v1385_v49  ;;  %v5566_v17 = vpop.f32.mrb[81].mxu0  ;;  %5672 = vmatprep.mubr.msk.f32.mxu0 %vm6145_vm1, %v8696_v48  ;;  %v1374_v12 = vpop.permute.xlu1 %1373  ;;  %v1423_v29 = vadd.f32 %v7284_v47, %v1416_v2 }
 0x276   :  { %v1388_v18 = vadd.f32 %v1374_v12, %v1353_v10  ;;  %5985 = vmatpush3.bf16.msra.mxu1 %v5984_v16 }
 0x277   :  { %v1421_v61 = vadd.f32 %v7284_v47, %v1414_v30  ;;  %5105 = vmatmul.mubr.msk.f32.gmra.mrb[88].mxu1 %vm1444_vm2, %v1427_v6  ;;  %5673 = vmatmul.mubr.msk.f32.gmra.mrb[152].mxu0 %vm1444_vm2, %v1427_v6  ;;  %v7415_v57 = vpop.f32.mrb[18].mxu1  ;;  %v2035_v34 = vpop.f32.mrb[82].mxu0  ;;  %v1430_v55 = vmax.f32 %v1423_v29, 0.0 }
 0x278   :  { %v7417_v19 = vpop.f32.mrb[19].mxu1  ;;  %2275 = vrot.lane.b32.xlu0 %v7415_v57, %s6147_s11  ;;  %2777 = vrot.lane.b32.xlu1 %v7403_v31, %s6142_s30  ;;  %v5569_v4 = vpop.f32.mrb[83].mxu0 }
 0x279   :  { %v1428_v46 = vmax.f32 %v1421_v61, 0.0  ;;  %1913 = vmatprep.mubr.f32.mxu1 %v8696_v48  ;;  %5675 = vmatprep.mubr.msk.f32.mxu0 %vm6145_vm1, %v8696_v48  ;;  %v1403_v42 = vpop.permute.xlu0 %1402  ;;  %v4096_v4 = vld [vmem:[%s8653_s5 + $0x200] sm:$0xff] }
 0x27a   :  { %v1417_v39 = vadd.f32 %v1403_v42, %v1388_v18  ;;  %5986 = vmatprep.subr.bf16.mxu1 %v8709_v3  ;;  %v4097_v42 = vld [vmem:[%s8653_s5 + $0x208] sm:$0xff] }
 0x27b   :  { %5106 = vmatmul.mubr.msk.f32.gmra.mrb[90].mxu1 %vm1444_vm2, %v1428_v46  ;;  %5676 = vmatmul.mubr.msk.f32.gmra.mrb[154].mxu0 %vm1444_vm2, %v1428_v46  ;;  %v7431_v1 = vpop.f32.mrb[20].mxu1  ;;  %v2039_v33 = vpop.f32.mrb[84].mxu0 }
 0x27c   :  { %v7433_v35 = vpop.f32.mrb[21].mxu1  ;;  %2779 = vrot.lane.b32.xlu0 %v7415_v57, %s6142_s30  ;;  %2798 = vrot.lane.b32.xlu1 %v7415_v57, %s6146_s3  ;;  %v5572_v45 = vpop.f32.mrb[85].mxu0  ;;  %v1424_v59 = vadd.f32 %v7284_v47, %v1417_v39 }
 0x27d   :  { %1918 = vmatprep.mubr.f32.mxu1 %v8696_v48  ;;  %5678 = vmatprep.mubr.msk.f32.mxu0 %vm6145_vm1, %v8696_v48  ;;  %v6077_v45 = vpack.c.bf16 %v4097_v42, %v4096_v4 }
 0x27e   :  { %v1431_v5 = vmax.f32 %v1424_v59, 0.0 }
 0x27f   :  { %5107 = vmatmul.mubr.msk.f32.gmra.mrb[92].mxu1 %vm1444_vm2, %v1429_v56  ;;  %5679 = vmatmul.mubr.msk.f32.gmra.mrb[156].mxu0 %vm1444_vm2, %v1429_v56 }
 0x280   :  { %2277 = vrot.lane.b32.xlu0 %v7431_v1, %s6147_s11  ;;  %2301 = vrot.lane.b32.xlu1 %v7417_v19, %s6142_s30 }
 0x281   :  { %1923 = vmatprep.mubr.f32.mxu1 %v8696_v48  ;;  %5681 = vmatprep.mubr.msk.f32.mxu0 %vm6145_vm1, %v8696_v48 }
 0x282   :  { %6078 = vmatpush3.bf16.msra.mxu0 %v6077_v45 }
 0x283   :  { %5108 = vmatmul.mubr.msk.f32.gmra.mrb[94].mxu1 %vm1444_vm2, %v1430_v55  ;;  %5682 = vmatmul.mubr.msk.f32.gmra.mrb[158].mxu0 %vm1444_vm2, %v1430_v55 }
 0x284   :  { %2800 = vrot.lane.b32.xlu0 %v7431_v1, %s6146_s3  ;;  %2303 = vrot.lane.b32.xlu1 %v7433_v35, %s6142_s30 }
 0x285   :  { %1928 = vmatprep.mubr.f32.mxu1 %v8696_v48  ;;  %5684 = vmatprep.mubr.msk.f32.mxu0 %vm6145_vm1, %v8696_v48 }
 0x286   :  { %6079 = vmatprep.subr.bf16.mxu0 %v8709_v3 }
 0x287   :  { %5109 = vmatmul.mubr.msk.f32.gmra.mrb[96].mxu1 %vm1444_vm2, %v1431_v5  ;;  %5685 = vmatmul.mubr.msk.f32.gmra.mrb[160].mxu0 %vm1444_vm2, %v1431_v5  ;;  %v7464_v47 = vpop.f32.mrb[22].mxu1  ;;  %v2043_v38 = vpop.f32.mrb[86].mxu0 }
 0x288   :  { %v7466_v53 = vpop.f32.mrb[23].mxu1  ;;  %2781 = vrot.lane.b32.xlu0 %v7431_v1, %s6142_s30  ;;  %v5575_v25 = vpop.f32.mrb[87].mxu0  ;;  %5695 = vmatprep.mubr.msk.f32.mxu1 %vm6145_vm1, %v8696_v48 }
 0x289   :  { %2305 = vrot.lane.b32.xlu1 %v7466_v53, %s6142_s30  ;;  %5871 = vmatprep.mubr.msk.f32.mxu0 %vm6145_vm1, %v8696_v48 }
 0x28b   :  { %v1722_v24 = vpop.f32.mrb[24].mxu1  ;;  %v2047_v13 = vpop.f32.mrb[88].mxu0 }
 0x28c   :  { %v7476_v28 = vpop.f32.mrb[25].mxu1  ;;  %2279 = vrot.lane.b32.xlu0 %v7464_v47, %s6147_s11  ;;  %v5578_v21 = vpop.f32.mrb[89].mxu0 }
 0x28d   :  { %2307 = vrot.lane.b32.xlu1 %v7476_v28, %s6142_s30 }
 0x28f   :  { %v1728_v15 = vpop.f32.mrb[26].mxu1  ;;  %v2051_v50 = vpop.f32.mrb[90].mxu0 }
 0x290   :  { %v1730_v32 = vpop.f32.mrb[27].mxu1  ;;  %2802 = vrot.lane.b32.xlu0 %v7464_v47, %s6146_s3  ;;  %v5581_v40 = vpop.f32.mrb[91].mxu0 }
 0x294   :  { %2783 = vrot.lane.b32.xlu0 %v7464_v47, %s6142_s30 }
 0x296   :  { %v7486_v11 = vpop.f32.mrb[28].mxu1  ;;  %v2055_v20 = vpop.f32.mrb[92].mxu0 }
 0x297   :  { %v1736_v8 = vpop.f32.mrb[29].mxu1  ;;  %2823 = vrot.lane.b32.xlu1 %v7486_v11, %s6147_s11  ;;  %v5584_v7 = vpop.f32.mrb[93].mxu0 }
 0x298   :  { %2804 = vrot.lane.b32.xlu0 %v1722_v24, %s6146_s3 }
 0x29b   :  { %2326 = vrot.lane.b32.xlu1 %v1736_v8, %s6146_s3 }
 0x29c   :  { %2785 = vrot.lane.b32.xlu0 %v1722_v24, %s6142_s30 }
 0x29d   :  { %v7493_v52 = vpop.f32.mrb[30].mxu1  ;;  %v2059_v26 = vpop.f32.mrb[94].mxu0 }
 0x29e   :  { %8710 = vst [vmem:[#allocation10_spill] sm:$0xff] %v7493_v52  ;;  %v7495_v36 = vpop.f32.mrb[31].mxu1  ;;  %v5587_v58 = vpop.f32.mrb[95].mxu0 }
 0x29f   :  { %3321 = vrot.lane.b32.xlu1 %v7493_v52, %s6142_s30 }
 0x2a0   :  { %2806 = vrot.lane.b32.xlu0 %v1728_v15, %s6146_s3 }
 0x2a1   :  { %v7500_v41 = vpop.f32.mrb[32].mxu1  ;;  %v7502_v63 = vpop.f32.mrb[96].mxu0 }
 0x2a2   :  { %v7510_v49 = vpop.f32.mrb[33].mxu1  ;;  %v5590_v14 = vpop.f32.mrb[97].mxu0 }
 0x2a3   :  { %2328 = vrot.lane.b32.xlu1 %v7495_v36, %s6146_s3 }
 0x2a4   :  { %2309 = vrot.lane.b32.xlu0 %v1730_v32, %s6142_s30 }
 0x2a7   :  { %2347 = vrot.lane.b32.xlu1 %v7495_v36, %s6147_s11 }
 0x2a8   :  { %2825 = vrot.lane.b32.xlu0 %v7493_v52, %s6147_s11 }
 0x2ab   :  { %3342 = vrot.lane.b32.xlu1 %v7500_v41, %s6146_s3 }
 0x2ac   :  { %v7522_v6 = vpop.f32.mrb[34].mxu1  ;;  %2827 = vrot.lane.b32.xlu0 %v7500_v41, %s6147_s11 }
 0x2ad   :  { %v7526_v22 = vpop.f32.mrb[98].mxu0  ;;  %v7528_v44 = vpop.f32.mrb[35].mxu1 }
 0x2ae   :  { %v5593_v30 = vpop.f32.mrb[99].mxu0 }
 0x2af   :  { %2349 = vrot.lane.b32.xlu1 %v7510_v49, %s6147_s11 }
 0x2b0   :  { %3323 = vrot.lane.b32.xlu0 %v7500_v41, %s6142_s30 }
 0x2b2   :  { %v7534_v17 = vpop.f32.mrb[36].mxu1  ;;  %v7536_v61 = vpop.f32.mrb[100].mxu0 }
 0x2b3   :  { %v7538_v34 = vpop.f32.mrb[37].mxu1  ;;  %2330 = vrot.lane.b32.xlu1 %v7510_v49, %s6146_s3  ;;  %v5596_v12 = vpop.f32.mrb[101].mxu0 }
 0x2b4   :  { %2829 = vrot.lane.b32.xlu0 %v7522_v6, %s6147_s11 }
 0x2b6   :  { %v1764_v10 = vpop.f32.mrb[38].mxu1  ;;  %v7544_v9 = vpop.f32.mrb[102].mxu0 }
 0x2b7   :  { %v7546_v2 = vpop.f32.mrb[39].mxu1  ;;  %2849 = vrot.lane.b32.xlu1 %v7510_v49, %s6142_s30  ;;  %v5599_v46 = vpop.f32.mrb[103].mxu0 }
 0x2b8   :  { %3344 = vrot.lane.b32.xlu0 %v7522_v6, %s6146_s3 }
 0x2ba   :  { %v1770_v18 = vpop.f32.mrb[40].mxu1  ;;  %v7558_v33 = vpop.f32.mrb[104].mxu0 }
 0x2bb   :  { %8711 = vst [vmem:[#allocation3_spill] sm:$0xff] %v7558_v33  ;;  %v1772_v56 = vpop.f32.mrb[41].mxu1  ;;  %2351 = vrot.lane.b32.xlu1 %v7528_v44, %s6147_s11  ;;  %v5602_v29 = vpop.f32.mrb[105].mxu0 }
 0x2bc   :  { %3325 = vrot.lane.b32.xlu0 %v7522_v6, %s6142_s30  ;;  %v2226_v39 = vpop.permute.xlu0 %2225 }
 0x2bf   :  { %v7565_v55 = vpop.f32.mrb[42].mxu1  ;;  %2332 = vrot.lane.b32.xlu1 %v7528_v44, %s6146_s3  ;;  %v2088_v59 = vpop.f32.mrb[106].mxu0 }
 0x2c0   :  { %8712 = vst [vmem:[#allocation11_spill] sm:$0xff] %v7565_v55  ;;  %v1778_v5 = vpop.f32.mrb[43].mxu1  ;;  %2831 = vrot.lane.b32.xlu0 %v7534_v17, %s6147_s11  ;;  %v5605_v38 = vpop.f32.mrb[107].mxu0 }
 0x2c1   :  { %v2247_v25 = vpop.permute.xlu0 %2246  ;;  %v2228_v45 = vpop.permute.xlu1 %2227 }
 0x2c3   :  { %2851 = vrot.lane.b32.xlu1 %v7528_v44, %s6142_s30 }
 0x2c4   :  { %3346 = vrot.lane.b32.xlu0 %v7534_v17, %s6146_s3 }
 0x2c5   :  { %v7575_v24 = vpop.f32.mrb[44].mxu1 }
 0x2c6   :  { %8713 = vst [vmem:[#allocation2_spill] sm:$0xff] %v7575_v24  ;;  %v2092_v13 = vpop.f32.mrb[108].mxu0  ;;  %v7577_v21 = vpop.f32.mrb[45].mxu1 }
 0x2c7   :  { %v5608_v15 = vpop.f32.mrb[109].mxu0  ;;  %2353 = vrot.lane.b32.xlu1 %v7538_v34, %s6147_s11  ;;  %v2240_v13 = vadd.f32 %v2226_v39, %v7279_v0 }
 0x2c8   :  { %3327 = vrot.lane.b32.xlu0 %v7534_v17, %s6142_s30  ;;  %v2249_v50 = vpop.permute.xlu0 %2248 }
 0x2cb   :  { %v7583_v32 = vpop.f32.mrb[46].mxu1  ;;  %2853 = vrot.lane.b32.xlu1 %v7538_v34, %s6142_s30  ;;  %v7587_v40 = vpop.f32.mrb[110].mxu0 }
 0x2cc   :  { %8714 = vst [vmem:[#allocation12_spill] sm:$0xff] %v7583_v32  ;;  %8715 = vst [vmem:[#allocation13_spill] sm:$0xff] %v7587_v40  ;;  %v7589_v20 = vpop.f32.mrb[47].mxu1  ;;  %2334 = vrot.lane.b32.xlu0 %v7538_v34, %s6146_s3  ;;  %v2230_v8 = vpop.permute.xlu0 %2229 }
 0x2cd   :  { %8716 = vst [vmem:[#allocation5_spill] sm:$0xff] %v7589_v20  ;;  %v5611_v7 = vpop.f32.mrb[111].mxu0 }
 0x2ce   :  { %v2241_v7 = vadd.f32 %v2228_v45, %v7311_v60 }
 0x2cf   :  { %2855 = vrot.lane.b32.xlu1 %v7546_v2, %s6142_s30 }
 0x2d0   :  { %3348 = vrot.lane.b32.xlu0 %v1764_v10, %s6146_s3  ;;  %v2251_v26 = vpop.permute.xlu0 %2250 }
 0x2d3   :  { %3367 = vrot.lane.b32.xlu1 %v7565_v55, %s6147_s11 }
 0x2d4   :  { %3329 = vrot.lane.b32.xlu0 %v1764_v10, %s6142_s30  ;;  %v2232_v58 = vpop.permute.xlu0 %2231 }
 0x2d5   :  { %v7599_v54 = vpop.f32.mrb[48].mxu1 }
 0x2d6   :  { %8717 = vst [vmem:[#allocation4_spill] sm:$0xff] %v7599_v54  ;;  %v7601_v23 = vpop.f32.mrb[112].mxu0  ;;  %v7603_v14 = vpop.f32.mrb[49].mxu1 }
 0x2d7   :  { %8718 = vst [vmem:[#allocation7_spill] sm:$0xff] %v7601_v23  ;;  %8719 = vst [vmem:[#allocation6_spill] sm:$0xff] %v7603_v14  ;;  %v5614_v16 = vpop.f32.mrb[113].mxu0  ;;  %2874 = vrot.lane.b32.xlu1 %v1778_v5, %s6146_s3 }
 0x2d8   :  { %2355 = vrot.lane.b32.xlu0 %v7546_v2, %s6147_s11  ;;  %v2253_v30 = vpop.permute.xlu0 %2252 }
 0x2db   :  { %v7608_v12 = vpop.f32.mrb[50].mxu1  ;;  %3865 = vrot.lane.b32.xlu1 %v7575_v24, %s6142_s30  ;;  %v7612_v10 = vpop.f32.mrb[114].mxu0 }
 0x2dc   :  { %8720 = vst [vmem:[#allocation8_spill] sm:$0xff] %v7608_v12  ;;  %8721 = vst [vmem:[#allocation9_spill] sm:$0xff] %v7612_v10  ;;  %v7614_v46 = vpop.f32.mrb[51].mxu1  ;;  %3350 = vrot.lane.b32.xlu0 %v1770_v18, %s6146_s3  ;;  %v7617_v4 = vpop.permute.xlu0 %2233  ;;  %v2261_v18 = vadd.f32 %v2247_v25, %v2240_v13  ;;  %v2242_v25 = vadd.f32 %v2230_v8, %v7320_v27 }
 0x2dd   :  { %8722 = vst [vmem:[#allocation14_spill] sm:$0xff] %v7614_v46  ;;  %v5617_v42 = vpop.f32.mrb[115].mxu0 }
 0x2df   :  { %v7619_v29 = vpop.f32.mrb[52].mxu1  ;;  %2895 = vrot.lane.b32.xlu1 %v7577_v21, %s6147_s11  ;;  %v7623_v59 = vpop.f32.mrb[116].mxu0 }
 0x2e0   :  { %8723 = vst [vmem:[#allocation15_spill] sm:$0xff] %v7623_v59  ;;  %v7625_v5 = vpop.f32.mrb[53].mxu1  ;;  %2857 = vrot.lane.b32.xlu0 %v1772_v56, %s6142_s30  ;;  %v2255_v38 = vpop.permute.xlu0 %2254  ;;  %v2262_v59 = vadd.f32 %v2249_v50, %v2241_v7 }
 0x2e1   :  { %v5620_v15 = vpop.f32.mrb[117].mxu0 }
 0x2e3   :  { %v7630_v16 = vpop.f32.mrb[54].mxu1  ;;  %2876 = vrot.lane.b32.xlu1 %v7577_v21, %s6146_s3  ;;  %v7634_v42 = vpop.f32.mrb[118].mxu0 }
 0x2e4   :  { %8724 = vst [vmem:[#allocation16_spill] sm:$0xff] %v7634_v42  ;;  %v7636_v10 = vpop.f32.mrb[55].mxu1  ;;  %3369 = vrot.lane.b32.xlu0 %v7575_v24, %s6147_s11  ;;  %v2272_v56 = vpop.permute.xlu0 %2271 }
 0x2e5   :  { %v2286_v23 = vadd.f32 %v2272_v56, %v2261_v18  ;;  %v5623_v0 = vpop.f32.mrb[119].mxu0  ;;  %v2263_v18 = vadd.f32 %v2251_v26, %v2242_v25  ;;  %v2243_v25 = vadd.f32 %v2232_v58, %v7342_v62 }
 0x2e6   :  { %v2274_v39 = vpop.permute.xlu1 %2273 }
 0x2e7   :  { %v2287_v60 = vadd.f32 %v2274_v39, %v2262_v59  ;;  %v7641_v45 = vpop.f32.mrb[56].mxu1  ;;  %3867 = vrot.lane.b32.xlu1 %v7583_v32, %s6142_s30  ;;  %v2121_v13 = vpop.f32.mrb[120].mxu0  ;;  %v7646_v15 = vadd.f32 %v2286_v23, %v7408_v43 }
 0x2e8   :  { %v7648_v42 = vpop.f32.mrb[57].mxu1  ;;  %3371 = vrot.lane.b32.xlu0 %v7583_v32, %s6147_s11  ;;  %v5626_v50 = vpop.f32.mrb[121].mxu0 }
 0x2e9   :  { %v7653_v7 = vadd.f32 %v2287_v60, %v7417_v19  ;;  %v2264_v60 = vadd.f32 %v2253_v30, %v2243_v25  ;;  %v2244_v25 = vadd.f32 %v7617_v4, %v7351_v51 }
 0x2ea   :  { %v2276_v27 = vpop.permute.xlu0 %2275  ;;  %v2778_v8 = vpop.permute.xlu1 %2777 }
 0x2eb   :  { %v2288_v59 = vadd.f32 %v2276_v27, %v2263_v18  ;;  %2897 = vrot.lane.b32.xlu1 %v7589_v20, %s6147_s11 }
 0x2ec   :  { %3886 = vrot.lane.b32.xlu0 %v7583_v32, %s6146_s3 }
 0x2ed   :  { %v7659_v43 = vpop.f32.mrb[58].mxu1  ;;  %v2125_v23 = vpop.f32.mrb[122].mxu0  ;;  %v7662_v56 = vadd.f32 %v2288_v59, %v7433_v35 }
 0x2ee   :  { %8725 = vst [vmem:[#allocation17_spill] sm:$0xff] %v7659_v43  ;;  %v7664_v0 = vpop.f32.mrb[59].mxu1  ;;  %v5629_v26 = vpop.f32.mrb[123].mxu0 }
 0x2ef   :  { %v7666_v19 = vpop.permute.xlu0 %2779  ;;  %v2799_v39 = vpop.permute.xlu1 %2798  ;;  %2878 = vrot.lane.b32.xlu1 %v7589_v20, %s6146_s3 }
 0x2f0   :  { %3373 = vrot.lane.b32.xlu0 %v7599_v54, %s6147_s11 }
 0x2f3   :  { %v7673_v13 = vpop.f32.mrb[60].mxu1  ;;  %v2278_v50 = vpop.permute.xlu0 %2277  ;;  %3393 = vrot.lane.b32.xlu1 %v7589_v20, %s6142_s30 }
 0x2f4   :  { %v2289_v35 = vadd.f32 %v2278_v50, %v2264_v60  ;;  %v2302_v18 = vpop.permute.xlu1 %2301  ;;  %v7677_v27 = vpop.f32.mrb[124].mxu0  ;;  %3888 = vrot.lane.b32.xlu0 %v7599_v54, %s6146_s3  ;;  %v2265_v50 = vadd.f32 %v2255_v38, %v2244_v25 }
 0x2f5   :  { %8726 = vst [vmem:[#allocation18_spill] sm:$0xff] %v7677_v27  ;;  %v7681_v59 = vpop.f32.mrb[61].mxu1  ;;  %v5632_v62 = vpop.f32.mrb[125].mxu0 }
 0x2f6   :  { %v7684_v58 = vadd.f32 %v2289_v35, %v7466_v53 }
 0x2f7   :  { %v7686_v30 = vpop.permute.xlu0 %2800  ;;  %3869 = vrot.lane.b32.xlu1 %v7599_v54, %s6142_s30 }
 0x2f8   :  { %3375 = vrot.lane.b32.xlu0 %v7608_v12, %s6147_s11  ;;  %v7692_v23 = vpop.permute.xlu1 %2303 }
 0x2fb   :  { %v7694_v26 = vpop.permute.xlu0 %2781  ;;  %2899 = vrot.lane.b32.xlu1 %v7603_v14, %s6147_s11 }
 0x2fc   :  { %3890 = vrot.lane.b32.xlu0 %v7608_v12, %s6146_s3  ;;  %v7708_v27 = vpop.permute.xlu1 %2305 }
 0x2fd   :  { %v7702_v53 = vpop.f32.mrb[62].mxu1  ;;  %v7704_v60 = vpop.f32.mrb[126].mxu0 }
 0x2fe   :  { %8727 = vst [vmem:[#allocation19_spill] sm:$0xff] %v7704_v60  ;;  %v7706_v35 = vpop.f32.mrb[63].mxu1  ;;  %v5635_v62 = vpop.f32.mrb[127].mxu0 }
 0x2ff   :  { %v2280_v54 = vpop.permute.xlu0 %2279  ;;  %2880 = vrot.lane.b32.xlu1 %v7603_v14, %s6146_s3 }
 0x300   :  { %v2290_v32 = vadd.f32 %v2280_v54, %v2265_v50  ;;  %2882 = vrot.lane.b32.xlu0 %v7614_v46, %s6146_s3  ;;  %v7727_v54 = vpop.permute.xlu1 %2307  ;;  %v2792_v50 = vadd.f32 %v2778_v8, %v7393_v37 }
 0x301   :  { %v7714_v51 = vpop.f32.mrb[64].mxu1  ;;  %v7716_v4 = vpop.f32.mrb[128].mxu0 }
 0x302   :  { %8728 = vst [vmem:[#allocation20_spill] sm:$0xff] %v7716_v4  ;;  %v7718_v55 = vpop.f32.mrb[65].mxu1  ;;  %v5638_v38 = vpop.f32.mrb[129].mxu0  ;;  %v7721_v25 = vadd.f32 %v2290_v32, %v7476_v28 }
 0x303   :  { %v2803_v62 = vpop.permute.xlu0 %2802  ;;  %3395 = vrot.lane.b32.xlu1 %v7603_v14, %s6142_s30  ;;  %v2813_v38 = vadd.f32 %v2799_v39, %v2792_v50 }
 0x304   :  { %2903 = vrot.lane.b32.xlu0 %v7625_v5, %s6147_s11 }
 0x307   :  { %v7730_v60 = vpop.permute.xlu0 %2783  ;;  %3871 = vrot.lane.b32.xlu1 %v7608_v12, %s6142_s30 }
 0x308   :  { %3401 = vrot.lane.b32.xlu0 %v7636_v10, %s6142_s30 }
 0x309   :  { %v7736_v28 = vpop.f32.mrb[66].mxu1  ;;  %v2824_v32 = vpop.permute.xlu1 %2823 }
 0x30a   :  { %v2838_v4 = vadd.f32 %v2824_v32, %v2813_v38  ;;  %v7738_v14 = vpop.f32.mrb[130].mxu0  ;;  %v7740_v20 = vpop.f32.mrb[67].mxu1 }
 0x30b   :  { %8729 = vst [vmem:[#allocation21_spill] sm:$0xff] %v7738_v14  ;;  %v7742_v24 = vpop.permute.xlu0 %2804  ;;  %v5641_v37 = vpop.f32.mrb[131].mxu0  ;;  %2901 = vrot.lane.b32.xlu1 %v7614_v46, %s6147_s11 }
 0x30c   :  { %3913 = vrot.lane.b32.xlu0 %v7659_v43, %s6147_s11  ;;  %v7749_v8 = vadd.f32 %v2838_v4, %v7495_v36 }
 0x30d   :  { %v7751_v10 = vpop.f32.mrb[68].mxu1  ;;  %v2327_v39 = vpop.permute.xlu1 %2326 }
 0x30e   :  { %8730 = vst [vmem:[#allocation22_spill] sm:$0xff] %v7749_v8  ;;  %8731 = vst [vmem:[#allocation23_spill] sm:$0xff] %v7751_v10  ;;  %v7753_v50 = vpop.f32.mrb[132].mxu0  ;;  %v7755_v38 = vpop.f32.mrb[69].mxu1 }
 0x30f   :  { %8732 = vst [vmem:[#allocation24_spill] sm:$0xff] %v7753_v50  ;;  %8733 = vst [vmem:[#allocation25_spill] sm:$0xff] %v7755_v38  ;;  %v7757_v32 = vpop.permute.xlu0 %2785  ;;  %v5644_v14 = vpop.f32.mrb[133].mxu0  ;;  %3397 = vrot.lane.b32.xlu1 %v7614_v46, %s6142_s30  ;;  %v2316_v50 = vadd.f32 %v2302_v18, %v7646_v15 }
 0x310   :  { %4409 = vrot.lane.b32.xlu0 %v7659_v43, %s6142_s30  ;;  %v2793_v43 = vadd.f32 %v7666_v19, %v7403_v31  ;;  %v2794_v31 = vadd.f32 %v7694_v26, %v7415_v57  ;;  %v4099_v57 = vld [vmem:[%s8653_s5 + $0x218] sm:$0xff] }
 0x311   :  { %v7763_v37 = vpop.permute.xlu1 %3321  ;;  %v2341_v46 = vadd.f32 %v2327_v39, %v2316_v50 }
 0x312   :  { %v2814_v15 = vadd.f32 %v7686_v30, %v2793_v43  ;;  %v2815_v43 = vadd.f32 %v2803_v62, %v2794_v31  ;;  %v2317_v30 = vadd.f32 %v7692_v23, %v7653_v7 }
 0x313   :  { %v7765_v36 = vpop.permute.xlu0 %2806  ;;  %3892 = vrot.lane.b32.xlu1 %v7619_v29, %s6146_s3 }
 0x314   :  { %3915 = vrot.lane.b32.xlu0 %v7673_v13, %s6147_s11 }
 0x315   :  { %v2329_v4 = vpop.permute.xlu1 %2328 }
 0x316   :  { %v2342_v62 = vadd.f32 %v2329_v4, %v2317_v30 }
 0x317   :  { %v7772_v14 = vpop.permute.xlu0 %2309  ;;  %v7774_v12 = vpop.f32.mrb[70].mxu1  ;;  %3873 = vrot.lane.b32.xlu1 %v7619_v29, %s6142_s30 }
 0x318   :  { %v2154_v38 = vpop.f32.mrb[134].mxu0  ;;  %v7780_v10 = vpop.f32.mrb[71].mxu1  ;;  %4430 = vrot.lane.b32.xlu0 %v7673_v13, %s6146_s3 }
 0x319   :  { %v5647_v40 = vpop.f32.mrb[135].mxu0  ;;  %v2348_v52 = vpop.permute.xlu1 %2347 }
 0x31a   :  { %v2362_v18 = vadd.f32 %v2348_v52, %v2341_v46  ;;  %v4098_v46 = vld [vmem:[%s8653_s5 + $0x210] sm:$0xff] }
 0x31b   :  { %v2826_v33 = vpop.permute.xlu0 %2825  ;;  %v7785_v8 = vpop.f32.mrb[72].mxu1  ;;  %3399 = vrot.lane.b32.xlu1 %v7625_v5, %s6142_s30 }
 0x31c   :  { %v2367_v29 = vadd.f32 %v2362_v18, %v7502_v63  ;;  %v2839_v19 = vadd.f32 %v2826_v33, %v2814_v15  ;;  %v2158_v39 = vpop.f32.mrb[136].mxu0  ;;  %v7792_v50 = vpop.f32.mrb[73].mxu1  ;;  %4411 = vrot.lane.b32.xlu0 %v7673_v13, %s6142_s30  ;;  %v6080_v33 = vpack.c.bf16 %v4099_v57, %v4098_v46  ;;  %v2389_v57 = vld [vmem:[%s8653_s5 + $0x8] sm:$0xff] }
 0x31d   :  { %v5650_v40 = vpop.f32.mrb[137].mxu0  ;;  %v7796_v52 = vpop.permute.xlu1 %3342  ;;  %v2795_v39 = vadd.f32 %v7730_v60, %v7431_v1  ;;  %v7846_v1 = vld [vmem:[%s8654_s4] ss:$0 sm:$0xff] }
 0x31e   :  { %v7805_v63 = vadd.f32 %v2839_v19, %v7510_v49  ;;  %6081 = vmatpush3.bf16.msra.mxu0 %v6080_v33 }
 0x31f   :  { %v2828_v26 = vpop.permute.xlu0 %2827  ;;  %3894 = vrot.lane.b32.xlu1 %v7630_v16, %s6146_s3  ;;  %6088 = vmatprep.subr.bf16.mxu0 %v8709_v3 }
 0x320   :  { %v2840_v38 = vadd.f32 %v2828_v26, %v2815_v43  ;;  %v7811_v15 = vpop.f32.mrb[74].mxu1  ;;  %v7813_v18 = vpop.f32.mrb[138].mxu0  ;;  %3937 = vrot.lane.b32.xlu0 %v7681_v59, %s6142_s30  ;;  %v2816_v43 = vadd.f32 %v7742_v24, %v2795_v39 }
 0x321   :  { %v7817_v49 = vpop.f32.mrb[75].mxu1  ;;  %v5653_v31 = vpop.f32.mrb[139].mxu0 }
 0x322   :  { %v2350_v7 = vpop.permute.xlu1 %2349  ;;  %v7821_v23 = vadd.f32 %v2840_v38, %v7528_v44  ;;  %v2388_v44 = vld [vmem:[%s8653_s5] sm:$0xff]  ;;  %v2390_v31 = vld [vmem:[%s8653_s5 + $0x10] sm:$0xff] }
 0x323   :  { %v2363_v16 = vadd.f32 %v2350_v7, %v2342_v62  ;;  %v7823_v19 = vpop.permute.xlu0 %3323  ;;  %3911 = vrot.lane.b32.xlu1 %v7641_v45, %s6147_s11  ;;  %v5987_v24 = vpack.c.bf16 %v2389_v57, %v2388_v44  ;;  %v2391_v7 = vld [vmem:[%s8653_s5 + $0x18] sm:$0xff] }
 0x324   :  { %4413 = vrot.lane.b32.xlu0 %v7702_v53, %s6142_s30 }
 0x325   :  { %v2368_v4 = vadd.f32 %v2363_v16, %v7526_v22  ;;  %v7832_v40 = vpop.f32.mrb[76].mxu1  ;;  %v7834_v46 = vpop.f32.mrb[140].mxu0 }
 0x326   :  { %v7848_v22 = vpop.f32.mrb[77].mxu1  ;;  %v2331_v60 = vpop.permute.xlu1 %2330 }
 0x327   :  { %v2379_v33 = vadd.f32 %v7846_v1, %v2368_v4  ;;  %v5656_v30 = vpop.f32.mrb[141].mxu0  ;;  %v2830_v26 = vpop.permute.xlu0 %2829  ;;  %3418 = vrot.lane.b32.xlu1 %v7648_v42, %s6146_s3  ;;  %v2318_v42 = vadd.f32 %v7708_v27, %v7662_v56 }
 0x328   :  { %v2841_v38 = vadd.f32 %v2830_v26, %v2816_v43  ;;  %4434 = vrot.lane.b32.xlu0 %v7714_v51, %s6146_s3  ;;  %v2378_v43 = vadd.f32 %v7846_v1, %v2367_v29  ;;  %v2542_v30 = vld [vmem:[%s8653_s5 + $0x40] sm:$0xff]  ;;  %v2543_v26 = vld [vmem:[%s8653_s5 + $0x48] sm:$0xff] }
 0x329   :  { %v2384_v62 = vmax.f32 %v2379_v33, 0.0  ;;  %v2343_v33 = vadd.f32 %v2331_v60, %v2318_v42  ;;  %v2796_v60 = vadd.f32 %v7757_v32, %v7464_v47  ;;  %v5993_v42 = vpack.c.bf16 %v2543_v26, %v2542_v30  ;;  %v2544_v47 = vld [vmem:[%s8653_s5 + $0x50] sm:$0xff]  ;;  %v2621_v26 = vld [vmem:[%s8653_s5 + $0x68] sm:$0xff] }
 0x32a   :  { %v7861_v16 = vpop.permute.xlu1 %2849  ;;  %v7864_v39 = vadd.f32 %v2841_v38, %v7538_v34  ;;  %v5990_v34 = vpack.c.bf16 %v2391_v7, %v2390_v31 }
 0x32b   :  { %v7868_v4 = vpop.permute.xlu0 %3344  ;;  %5696 = vmatmul.mubr.msk.f32.vlgmr.msra.gmra.mrb[98].mxu1 %vm1444_vm2, %v2384_v62  ;;  %3439 = vrot.lane.b32.xlu1 %v7664_v0, %s6147_s11  ;;  %v2817_v32 = vadd.f32 %v7765_v36, %v2796_v60  ;;  %v2620_v36 = vld [vmem:[%s8653_s5 + $0x60] sm:$0xff]  ;;  %v2319_v60 = vadd.f32 %v7727_v54, %v7684_v58  ;;  %v2622_v58 = vld [vmem:[%s8653_s5 + $0x70] sm:$0xff]  ;;  %v2623_v54 = vld [vmem:[%s8653_s5 + $0x78] sm:$0xff] }
 0x32c   :  { %5988 = vmatpush3.bf16.msra.mxu1 %v5987_v24  ;;  %v7873_v44 = vpop.f32.mrb[78].mxu1  ;;  %v7875_v57 = vpop.f32.mrb[142].mxu0  ;;  %3426 = vrot.lane.b32.xlu0 %v7718_v55, %s6146_s3 }
 0x32d   :  { %8734 = vst [vmem:[#allocation26_spill] sm:$0xff] %v7875_v57  ;;  %v7880_v56 = vpop.f32.mrb[79].mxu1  ;;  %v5659_v27 = vpop.f32.mrb[143].mxu0  ;;  %5989 = vmatprep.subr.bf16.mxu1 %v8709_v3  ;;  %5706 = vmatprep.mubr.msk.f32.mxu1 %vm6145_vm1, %v8696_v48 }
 0x32e   :  { %v2352_v38 = vpop.permute.xlu1 %2351  ;;  %v2383_v27 = vmax.f32 %v2378_v43, 0.0 }
 0x32f   :  { %v2364_v24 = vadd.f32 %v2352_v38, %v2343_v33  ;;  %v3326_v29 = vpop.permute.xlu0 %3325  ;;  %3420 = vrot.lane.b32.xlu1 %v7664_v0, %s6146_s3 }
 0x330   :  { %v3338_v62 = vadd.f32 %v3326_v29, %v7500_v41  ;;  %5991 = vmatpush3.bf16.msra.mxu1 %v5990_v34  ;;  %v1890_v31 = vpop.f32.mrb[80].mxu1  ;;  %v7896_v7 = vpop.f32.mrb[144].mxu0  ;;  %3941 = vrot.lane.b32.xlu0 %v7718_v55, %s6142_s30  ;;  %v2545_v41 = vld [vmem:[%s8653_s5 + $0x58] sm:$0xff] }
 0x331   :  { %8735 = vst [vmem:[#allocation27_spill] sm:$0xff] %v7896_v7  ;;  %v2369_v33 = vadd.f32 %v2364_v24, %v7536_v61  ;;  %v7901_v38 = vpop.f32.mrb[81].mxu1  ;;  %v5662_v57 = vpop.f32.mrb[145].mxu0  ;;  %5992 = vmatprep.subr.bf16.mxu1 %v8709_v3 }
 0x332   :  { %v2333_v34 = vpop.permute.xlu1 %2332  ;;  %v5996_v57 = vpack.c.bf16 %v2545_v41, %v2544_v47  ;;  %v5999_v47 = vpack.c.bf16 %v2621_v26, %v2620_v36  ;;  %v6002_v26 = vpack.c.bf16 %v2623_v54, %v2622_v58  ;;  %v2700_v58 = vld [vmem:[%s8653_s5 + $0x90] sm:$0xff]  ;;  %v2701_v54 = vld [vmem:[%s8653_s5 + $0x98] sm:$0xff] }
 0x333   :  { %5707 = vmatmul.mubr.msk.f32.vlgmr.msra.gmra.mrb[100].mxu1 %vm1444_vm2, %v2383_v27  ;;  %v2832_v43 = vpop.permute.xlu0 %2831  ;;  %3441 = vrot.lane.b32.xlu1 %v7681_v59, %s6147_s11  ;;  %v2380_v30 = vadd.f32 %v7846_v1, %v2369_v33 }
 0x334   :  { %v2842_v61 = vadd.f32 %v2832_v43, %v2817_v32  ;;  %5994 = vmatpush3.bf16.msra.mxu1 %v5993_v42  ;;  %4436 = vrot.lane.b32.xlu0 %v7736_v28, %s6146_s3 }
 0x335   :  { %5995 = vmatprep.subr.bf16.mxu1 %v8709_v3  ;;  %5717 = vmatprep.mubr.msk.f32.mxu1 %vm6145_vm1, %v8696_v48  ;;  %v2385_v41 = vmax.f32 %v2380_v30, 0.0 }
 0x336   :  { %v7926_v24 = vpop.permute.xlu1 %2851  ;;  %v7929_v29 = vadd.f32 %v2842_v61, %v7546_v2  ;;  %v2344_v2 = vadd.f32 %v2333_v34, %v2319_v60 }
 0x337   :  { %v3347_v31 = vpop.permute.xlu0 %3346  ;;  %3422 = vrot.lane.b32.xlu1 %v7681_v59, %s6146_s3 }
 0x338   :  { %v7935_v42 = vadd.f32 %v3347_v31, %v3338_v62  ;;  %5997 = vmatpush3.bf16.msra.mxu1 %v5996_v57  ;;  %v1895_v27 = vpop.f32.mrb[82].mxu1  ;;  %v7937_v33 = vpop.f32.mrb[146].mxu0  ;;  %3943 = vrot.lane.b32.xlu0 %v7740_v20, %s6142_s30 }
 0x339   :  { %8736 = vst [vmem:[#allocation28_spill] sm:$0xff] %v7937_v33  ;;  %v7941_v32 = vpop.f32.mrb[83].mxu1  ;;  %v5665_v43 = vpop.f32.mrb[147].mxu0  ;;  %5998 = vmatprep.subr.bf16.mxu1 %v8709_v3 }
 0x33a   :  { %v2354_v62 = vpop.permute.xlu1 %2353 }
 0x33b   :  { %v2365_v61 = vadd.f32 %v2354_v62, %v2344_v2  ;;  %5718 = vmatmul.mubr.msk.f32.vlgmr.msra.gmra.mrb[102].mxu1 %vm1444_vm2, %v2385_v41  ;;  %v3328_v57 = vpop.permute.xlu0 %3327  ;;  %3917 = vrot.lane.b32.xlu1 %v7702_v53, %s6147_s11 }
 0x33c   :  { %v3339_v34 = vadd.f32 %v3328_v57, %v7522_v6  ;;  %v1900_v30 = vpop.f32.mrb[84].mxu1  ;;  %v2187_v36 = vpop.f32.mrb[148].mxu0  ;;  %6000 = vmatpush3.bf16.msra.mxu1 %v5999_v47  ;;  %4455 = vrot.lane.b32.xlu0 %v7774_v12, %s6147_s11  ;;  %v2698_v6 = vld [vmem:[%s8653_s5 + $0x80] sm:$0xff]  ;;  %v2699_v47 = vld [vmem:[%s8653_s5 + $0x88] sm:$0xff] }
 0x33d   :  { %v2370_v60 = vadd.f32 %v2365_v61, %v7544_v9  ;;  %v7957_v31 = vpop.f32.mrb[85].mxu1  ;;  %v5668_v27 = vpop.f32.mrb[149].mxu0  ;;  %6001 = vmatprep.subr.bf16.mxu1 %v8709_v3  ;;  %5728 = vmatprep.mubr.msk.f32.mxu1 %vm6145_vm1, %v8696_v48  ;;  %v6005_v2 = vpack.c.bf16 %v2699_v47, %v2698_v6  ;;  %v3336_v61 = vadd.f32 %v7763_v37, %v7486_v11 }
 0x33e   :  { %v7968_v12 = vpop.permute.xlu1 %2853  ;;  %v6008_v30 = vpack.c.bf16 %v2701_v54, %v2700_v58 }
 0x33f   :  { %v2381_v9 = vadd.f32 %v7846_v1, %v2370_v60  ;;  %v2335_v41 = vpop.permute.xlu0 %2334  ;;  %4432 = vrot.lane.b32.xlu1 %v7702_v53, %s6146_s3  ;;  %v3357_v36 = vadd.f32 %v7796_v52, %v3336_v61  ;;  %v2320_v52 = vadd.f32 %v7772_v14, %v7721_v25 }
 0x340   :  { %6003 = vmatpush3.bf16.msra.mxu1 %v6002_v26  ;;  %3962 = vrot.lane.b32.xlu0 %v7780_v10, %s6146_s3 }
 0x341   :  { %v2386_v43 = vmax.f32 %v2381_v9, 0.0  ;;  %6004 = vmatprep.subr.bf16.mxu1 %v8709_v3  ;;  %v2345_v58 = vadd.f32 %v2335_v41, %v2320_v52  ;;  %v8738_v41 = vld [vmem:[#allocation3_spill] sm:$0xff] }
 0x342   :  { %v7982_v62 = vpop.permute.xlu1 %2855 }
 0x343   :  { %v3349_v57 = vpop.permute.xlu0 %3348  ;;  %5729 = vmatmul.mubr.msk.f32.vlgmr.msra.gmra.mrb[104].mxu1 %vm1444_vm2, %v2386_v43  ;;  %3443 = vrot.lane.b32.xlu1 %v7706_v35, %s6147_s11 }
 0x344   :  { %v7989_v10 = vadd.f32 %v3349_v57, %v3339_v34  ;;  %3983 = vrot.lane.b32.xlu0 %v7792_v50, %s6147_s11  ;;  %6006 = vmatpush3.bf16.msra.mxu1 %v6005_v2 }
 0x345   :  { %6007 = vmatprep.subr.bf16.mxu1 %v8709_v3  ;;  %5739 = vmatprep.mubr.msk.f32.mxu1 %vm6145_vm1, %v8696_v48 }
 0x346   :  { %v1905_v11 = vpop.f32.mrb[86].mxu1  ;;  %v3368_v37 = vpop.permute.xlu1 %3367 }
 0x347   :  { %v3382_v26 = vadd.f32 %v3368_v37, %v3357_v36  ;;  %v2191_v60 = vpop.f32.mrb[150].mxu0  ;;  %v7997_v27 = vpop.f32.mrb[87].mxu1  ;;  %3424 = vrot.lane.b32.xlu1 %v7706_v35, %s6146_s3 }
 0x348   :  { %v3330_v34 = vpop.permute.xlu0 %3329  ;;  %v5671_v6 = vpop.f32.mrb[151].mxu0  ;;  %3985 = vrot.lane.b32.xlu0 %v7817_v49, %s6147_s11  ;;  %6009 = vmatpush3.bf16.msra.mxu1 %v6008_v30  ;;  %v2930_v60 = vld [vmem:[%s8653_s5 + $0xa0] sm:$0xff] }
 0x349   :  { %v3340_v47 = vadd.f32 %v3330_v34, %v7534_v17  ;;  %6010 = vmatprep.subr.bf16.mxu1 %v8709_v3  ;;  %v8008_v9 = vadd.f32 %v3382_v26, %v7577_v21  ;;  %v8737_v21 = vld [vmem:[#allocation22_spill] sm:$0xff]  ;;  %v2931_v34 = vld [vmem:[%s8653_s5 + $0xa8] sm:$0xff] }
 0x34a   :  { %v1910_v2 = vpop.f32.mrb[88].mxu1  ;;  %v2875_v43 = vpop.permute.xlu1 %2874  ;;  %v2864_v36 = vadd.f32 %v7861_v16, %v8737_v21 }
 0x34b   :  { %v8010_v54 = vpop.f32.mrb[152].mxu0  ;;  %v8012_v61 = vpop.f32.mrb[89].mxu1  ;;  %3939 = vrot.lane.b32.xlu1 %v7706_v35, %s6142_s30 }
 0x34c   :  { %v2356_v57 = vpop.permute.xlu0 %2355  ;;  %v5674_v30 = vpop.f32.mrb[153].mxu0  ;;  %4481 = vrot.lane.b32.xlu0 %v7817_v49, %s6142_s30  ;;  %v2889_v16 = vadd.f32 %v2875_v43, %v2864_v36 }
 0x34d   :  { %v2366_v17 = vadd.f32 %v2356_v57, %v2345_v58 }
 0x34e   :  { %v1915_v25 = vpop.f32.mrb[90].mxu1  ;;  %v8018_v14 = vpop.permute.xlu1 %3865 }
 0x34f   :  { %v2371_v11 = vadd.f32 %v2366_v17, %v8738_v41  ;;  %v8023_v37 = vpop.f32.mrb[154].mxu0  ;;  %v8025_v26 = vpop.f32.mrb[91].mxu1  ;;  %3919 = vrot.lane.b32.xlu1 %v7714_v51, %s6147_s11  ;;  %v6011_v17 = vpack.c.bf16 %v2931_v34, %v2930_v60  ;;  %v8741_v34 = vld [vmem:[#allocation13_spill] sm:$0xff] }
 0x350   :  { %v3351_v6 = vpop.permute.xlu0 %3350  ;;  %v5677_v52 = vpop.f32.mrb[155].mxu0  ;;  %4461 = vrot.lane.b32.xlu0 %v7832_v40, %s6147_s11  ;;  %v2932_v40 = vld [vmem:[%s8653_s5 + $0xb0] sm:$0xff] }
 0x351   :  { %v2382_v2 = vadd.f32 %v7846_v1, %v2371_v11  ;;  %v8038_v58 = vadd.f32 %v3351_v6, %v3340_v47  ;;  %v2933_v47 = vld [vmem:[%s8653_s5 + $0xb8] sm:$0xff]  ;;  %v8740_v11 = vld [vmem:[#allocation10_spill] sm:$0xff] }
 0x352   :  { %v1920_v57 = vpop.f32.mrb[92].mxu1  ;;  %v2896_v30 = vpop.permute.xlu1 %2895  ;;  %v3337_v60 = vadd.f32 %v7823_v19, %v8740_v11  ;;  %v3008_v19 = vld [vmem:[%s8653_s5 + $0xc0] sm:$0xff] }
 0x353   :  { %v2387_v25 = vmax.f32 %v2382_v2, 0.0  ;;  %v2910_v21 = vadd.f32 %v2896_v30, %v2889_v16  ;;  %v8040_v41 = vpop.f32.mrb[156].mxu0  ;;  %v8042_v33 = vpop.f32.mrb[93].mxu1  ;;  %4415 = vrot.lane.b32.xlu1 %v7714_v51, %s6142_s30  ;;  %v6014_v2 = vpack.c.bf16 %v2933_v47, %v2932_v40 }
 0x354   :  { %8739 = vst [vmem:[#allocation22_spill] sm:$0xff] %v8040_v41  ;;  %v8052_v43 = vpop.permute.xlu0 %2857  ;;  %v5680_v36 = vpop.f32.mrb[157].mxu0  ;;  %3968 = vrot.lane.b32.xlu0 %v7848_v22, %s6146_s3  ;;  %v3358_v57 = vadd.f32 %v7868_v4, %v3337_v60 }
 0x355   :  { %v2915_v6 = vadd.f32 %v2910_v21, %v8741_v34  ;;  %5740 = vmatmul.mubr.msk.f32.vlgmr.msra.gmra.mrb[106].mxu1 %vm1444_vm2, %v2387_v25  ;;  %v2865_v34 = vadd.f32 %v7926_v24, %v7805_v63 }
 0x356   :  { %6012 = vmatpush3.bf16.msra.mxu1 %v6011_v17  ;;  %v1925_v52 = vpop.f32.mrb[94].mxu1  ;;  %v2877_v16 = vpop.permute.xlu1 %2876  ;;  %5750 = vmatprep.mubr.msk.f32.mxu1 %vm6145_vm1, %v8696_v48  ;;  %v3009_v17 = vld [vmem:[%s8653_s5 + $0xc8] sm:$0xff] }
 0x357   :  { %v2920_v30 = vadd.f32 %v7846_v1, %v2915_v6  ;;  %v8064_v36 = vpop.f32.mrb[158].mxu0  ;;  %v8066_v41 = vpop.f32.mrb[95].mxu1  ;;  %6013 = vmatprep.subr.bf16.mxu1 %v8709_v3  ;;  %3445 = vrot.lane.b32.xlu1 %v7718_v55, %s6147_s11  ;;  %v6017_v60 = vpack.c.bf16 %v3009_v17, %v3008_v19  ;;  %v8743_v6 = vld [vmem:[#allocation2_spill] sm:$0xff] }
 0x358   :  { %8742 = vst [vmem:[#allocation3_spill] sm:$0xff] %v8064_v36  ;;  %v3370_v4 = vpop.permute.xlu0 %3369  ;;  %v5683_v25 = vpop.f32.mrb[159].mxu0  ;;  %4483 = vrot.lane.b32.xlu0 %v7848_v22, %s6142_s30 }
 0x359   :  { %v2925_v21 = vmax.f32 %v2920_v30, 0.0  ;;  %v3383_v40 = vadd.f32 %v3370_v4, %v3358_v57  ;;  %v3011_v57 = vld [vmem:[%s8653_s5 + $0xd8] sm:$0xff]  ;;  %v8745_v25 = vld [vmem:[#allocation11_spill] sm:$0xff] }
 0x35a   :  { %6015 = vmatpush3.bf16.msra.mxu1 %v6014_v2  ;;  %v1930_v47 = vpop.f32.mrb[96].mxu1  ;;  %v3868_v11 = vpop.permute.xlu1 %3867  ;;  %v3010_v2 = vld [vmem:[%s8653_s5 + $0xd0] sm:$0xff]  ;;  %v8744_v30 = vld [vmem:[#allocation5_spill] sm:$0xff] }
 0x35b   :  { %v3881_v52 = vadd.f32 %v3868_v11, %v8743_v6  ;;  %v8082_v36 = vpop.f32.mrb[160].mxu0  ;;  %v1931_v7 = vpop.f32.mrb[97].mxu1  ;;  %4417 = vrot.lane.b32.xlu1 %v7736_v28, %s6142_s30  ;;  %6016 = vmatprep.subr.bf16.mxu1 %v8709_v3  ;;  %v8094_v63 = vadd.f32 %v3383_v40, %v8744_v30  ;;  %v6020_v4 = vpack.c.bf16 %v3011_v57, %v3010_v2  ;;  %v8748_v57 = vld [vmem:[#allocation23_spill] sm:$0xff] }
 0x35c   :  { %v3372_v24 = vpop.permute.xlu0 %3371  ;;  %v5686_v19 = vpop.f32.mrb[161].mxu0  ;;  %4489 = vrot.lane.b32.xlu0 %v7941_v32, %s6142_s30  ;;  %v2890_v7 = vadd.f32 %v2877_v16, %v2865_v34  ;;  %v3880_v40 = vadd.f32 %v8018_v14, %v8745_v25  ;;  %v8746_v32 = vld [vmem:[#allocation6_spill] sm:$0xff]  ;;  %v3087_v34 = vld [vmem:[%s8653_s5 + $0xe8] sm:$0xff] }
 0x35d   :  { %v3384_v28 = vadd.f32 %v3372_v24, %v7935_v42  ;;  %5751 = vmatmul.mubr.msk.f32.vlgmr.msra.gmra.mrb[108].mxu1 %vm1444_vm2, %v2925_v21  ;;  %v8747_v21 = vld [vmem:[#allocation7_spill] sm:$0xff]  ;;  %v3086_v14 = vld [vmem:[%s8653_s5 + $0xe0] sm:$0xff] }
 0x35e   :  { %v2898_v17 = vpop.permute.xlu1 %2897  ;;  %6018 = vmatpush3.bf16.msra.mxu1 %v6017_v60  ;;  %5761 = vmatprep.mubr.msk.f32.mxu1 %vm6145_vm1, %v8696_v48  ;;  %v6023_v30 = vpack.c.bf16 %v3087_v34, %v3086_v14  ;;  %v8750_v25 = vld [vmem:[#allocation14_spill] sm:$0xff] }
 0x35f   :  { %v2911_v47 = vadd.f32 %v2898_v17, %v2890_v7  ;;  %3447 = vrot.lane.b32.xlu1 %v7740_v20, %s6147_s11  ;;  %6019 = vmatprep.subr.bf16.mxu1 %v8709_v3  ;;  %v8108_v16 = vadd.f32 %v3384_v28, %v8746_v32  ;;  %v3088_v7 = vld [vmem:[%s8653_s5 + $0xf0] sm:$0xff]  ;;  %v3089_v28 = vld [vmem:[%s8653_s5 + $0xf8] sm:$0xff] }
 0x360   :  { %v3887_v42 = vpop.permute.xlu0 %3886  ;;  %4506 = vrot.lane.b32.xlu0 %v7957_v31, %s6146_s3 }
 0x361   :  { %v2916_v11 = vadd.f32 %v2911_v47, %v8747_v21  ;;  %v8113_v60 = vadd.f32 %v3887_v42, %v3880_v40  ;;  %v2866_v21 = vadd.f32 %v7968_v12, %v7821_v23 }
 0x362   :  { %v2879_v6 = vpop.permute.xlu1 %2878  ;;  %6021 = vmatpush3.bf16.msra.mxu1 %v6020_v4  ;;  %v8749_v4 = vld [vmem:[#allocation25_spill] sm:$0xff] }
 0x363   :  { %v2921_v2 = vadd.f32 %v7846_v1, %v2916_v11  ;;  %4438 = vrot.lane.b32.xlu1 %v8748_v57, %s6146_s3  ;;  %6022 = vmatprep.subr.bf16.mxu1 %v8709_v3  ;;  %v8751_v11 = vld [vmem:[#allocation12_spill] sm:$0xff] }
 0x364   :  { %v3374_v31 = vpop.permute.xlu0 %3373  ;;  %4527 = vrot.lane.b32.xlu0 %v7997_v27, %s6147_s11 }
 0x365   :  { %v2926_v24 = vmax.f32 %v2921_v2, 0.0  ;;  %v3385_v19 = vadd.f32 %v3374_v31, %v7989_v10  ;;  %v6026_v10 = vpack.c.bf16 %v3089_v28, %v3088_v7  ;;  %v2868_v28 = vadd.f32 %v8052_v43, %v7929_v29 }
 0x366   :  { %v8134_v17 = vpop.permute.xlu1 %3393 }
 0x367   :  { %5762 = vmatmul.mubr.msk.f32.vlgmr.msra.gmra.mrb[110].mxu1 %vm1444_vm2, %v2926_v24  ;;  %3945 = vrot.lane.b32.xlu1 %v8749_v4, %s6142_s30  ;;  %v8140_v40 = vadd.f32 %v3385_v19, %v8750_v25  ;;  %v3166_v25 = vld [vmem:[%s8653_s5 + $0x110] sm:$0xff] }
 0x368   :  { %v3889_v47 = vpop.permute.xlu0 %3888  ;;  %4508 = vrot.lane.b32.xlu0 %v7997_v27, %s6146_s3  ;;  %6024 = vmatpush3.bf16.msra.mxu1 %v6023_v30  ;;  %v2891_v27 = vadd.f32 %v2879_v6, %v2866_v21  ;;  %v3165_v6 = vld [vmem:[%s8653_s5 + $0x108] sm:$0xff] }
 0x369   :  { %v3902_v32 = vadd.f32 %v3889_v47, %v3881_v52  ;;  %6025 = vmatprep.subr.bf16.mxu1 %v8709_v3  ;;  %5772 = vmatprep.mubr.msk.f32.mxu1 %vm6145_vm1, %v8696_v48  ;;  %v3167_v47 = vld [vmem:[%s8653_s5 + $0x118] sm:$0xff] }
 0x36a   :  { %v3870_v42 = vpop.permute.xlu1 %3869  ;;  %v6032_v29 = vpack.c.bf16 %v3167_v47, %v3166_v25  ;;  %v3245_v25 = vld [vmem:[%s8653_s5 + $0x138] sm:$0xff] }
 0x36b   :  { %v3882_v14 = vadd.f32 %v3870_v42, %v8751_v11  ;;  %4457 = vrot.lane.b32.xlu1 %v7785_v8, %s6147_s11  ;;  %v8752_v8 = vld [vmem:[#allocation9_spill] sm:$0xff]  ;;  %v2867_v11 = vadd.f32 %v7982_v62, %v7864_v39  ;;  %v8755_v39 = vld [vmem:[#allocation15_spill] sm:$0xff] }
 0x36c   :  { %v3376_v34 = vpop.permute.xlu0 %3375  ;;  %4529 = vrot.lane.b32.xlu0 %v8012_v61, %s6147_s11  ;;  %6027 = vmatpush3.bf16.msra.mxu1 %v6026_v10 }
 0x36d   :  { %v3386_v52 = vadd.f32 %v3376_v34, %v8038_v58  ;;  %6028 = vmatprep.subr.bf16.mxu1 %v8709_v3  ;;  %v3164_v58 = vld [vmem:[%s8653_s5 + $0x100] sm:$0xff] }
 0x36e   :  { %v2900_v2 = vpop.permute.xlu1 %2899  ;;  %v6029_v7 = vpack.c.bf16 %v3165_v6, %v3164_v58  ;;  %v3242_v58 = vld [vmem:[%s8653_s5 + $0x120] sm:$0xff]  ;;  %v3243_v6 = vld [vmem:[%s8653_s5 + $0x128] sm:$0xff] }
 0x36f   :  { %v2912_v57 = vadd.f32 %v2900_v2, %v2891_v27  ;;  %3964 = vrot.lane.b32.xlu1 %v7792_v50, %s6146_s3  ;;  %v8159_v23 = vadd.f32 %v3386_v52, %v7625_v5  ;;  %v8754_v27 = vld [vmem:[#allocation4_spill] sm:$0xff] }
 0x370   :  { %v3891_v12 = vpop.permute.xlu0 %3890  ;;  %4531 = vrot.lane.b32.xlu0 %v8025_v26, %s6147_s11 }
 0x371   :  { %v2917_v31 = vadd.f32 %v2912_v57, %v8752_v8  ;;  %v3903_v30 = vadd.f32 %v3891_v12, %v3882_v14  ;;  %v8753_v14 = vld [vmem:[#allocation16_spill] sm:$0xff] }
 0x372   :  { %v2881_v24 = vpop.permute.xlu1 %2880 }
 0x373   :  { %v2922_v19 = vadd.f32 %v7846_v1, %v2917_v31  ;;  %4459 = vrot.lane.b32.xlu1 %v7811_v15, %s6147_s11  ;;  %v2892_v2 = vadd.f32 %v2881_v24, %v2867_v11 }
 0x374   :  { %v2883_v5 = vpop.permute.xlu0 %2882  ;;  %4514 = vrot.lane.b32.xlu0 %v8042_v33, %s6146_s3 }
 0x375   :  { %v2927_v4 = vmax.f32 %v2922_v19, 0.0  ;;  %v2893_v15 = vadd.f32 %v2883_v5, %v2868_v28 }
 0x376   :  { %v8183_v10 = vpop.permute.xlu1 %3395 }
 0x377   :  { %5773 = vmatmul.mubr.msk.f32.vlgmr.msra.gmra.mrb[112].mxu1 %vm1444_vm2, %v2927_v4  ;;  %3966 = vrot.lane.b32.xlu1 %v7817_v49, %s6146_s3  ;;  %v3244_v4 = vld [vmem:[%s8653_s5 + $0x130] sm:$0xff] }
 0x378   :  { %v2904_v42 = vpop.permute.xlu0 %2903  ;;  %4535 = vrot.lane.b32.xlu0 %v8066_v41, %s6147_s11  ;;  %6030 = vmatpush3.bf16.msra.mxu1 %v6029_v7 }
 0x379   :  { %v2914_v43 = vadd.f32 %v2904_v42, %v2893_v15  ;;  %6031 = vmatprep.subr.bf16.mxu1 %v8709_v3  ;;  %5783 = vmatprep.mubr.msk.f32.mxu1 %vm6145_vm1, %v8696_v48  ;;  %v6038_v42 = vpack.c.bf16 %v3245_v25, %v3244_v4 }
 0x37a   :  { %v3872_v21 = vpop.permute.xlu1 %3871 }
 0x37b   :  { %v2919_v34 = vadd.f32 %v2914_v43, %v8753_v14  ;;  %v3883_v52 = vadd.f32 %v3872_v21, %v8754_v27  ;;  %3987 = vrot.lane.b32.xlu1 %v7848_v22, %s6147_s11  ;;  %v3474_v43 = vld [vmem:[%s8653_s5 + $0x140] sm:$0xff]  ;;  %v3475_v21 = vld [vmem:[%s8653_s5 + $0x148] sm:$0xff]  ;;  %v8756_v14 = vld [vmem:[#allocation8_spill] sm:$0xff] }
 0x37c   :  { %v8199_v41 = vpop.permute.xlu0 %3401  ;;  %6033 = vmatpush3.bf16.msra.mxu1 %v6032_v29 }
 0x37d   :  { %6034 = vmatprep.subr.bf16.mxu1 %v8709_v3 }
 0x37e   :  { %v2902_v57 = vpop.permute.xlu1 %2901 }
 0x37f   :  { %v2913_v12 = vadd.f32 %v2902_v57, %v2892_v2  ;;  %4463 = vrot.lane.b32.xlu1 %v7873_v44, %s6147_s11 }
 0x380   :  { %v3914_v8 = vpop.permute.xlu0 %3913 }
 0x381   :  { %v2918_v62 = vadd.f32 %v2913_v12, %v8755_v39  ;;  %v3927_v31 = vadd.f32 %v3914_v8, %v3902_v32  ;;  %v6035_v32 = vpack.c.bf16 %v3243_v6, %v3242_v58  ;;  %v3476_v12 = vld [vmem:[%s8653_s5 + $0x150] sm:$0xff]  ;;  %v3477_v8 = vld [vmem:[%s8653_s5 + $0x158] sm:$0xff] }
 0x382   :  { %v8211_v24 = vpop.permute.xlu1 %3397 }
 0x383   :  { %v2923_v19 = vadd.f32 %v7846_v1, %v2918_v62  ;;  %3989 = vrot.lane.b32.xlu1 %v7880_v56, %s6147_s11  ;;  %v8217_v44 = vadd.f32 %v3927_v31, %v7681_v59  ;;  %v6044_v62 = vpack.c.bf16 %v3477_v8, %v3476_v12  ;;  %v8757_v31 = vld [vmem:[#allocation17_spill] sm:$0xff] }
 0x384   :  { %v4410_v5 = vpop.permute.xlu0 %4409 }
 0x385   :  { %v2928_v7 = vmax.f32 %v2923_v19, 0.0  ;;  %v4424_v28 = vadd.f32 %v4410_v5, %v7641_v45  ;;  %v2924_v45 = vadd.f32 %v7846_v1, %v2919_v34  ;;  %v6041_v34 = vpack.c.bf16 %v3475_v21, %v3474_v43 }
 0x386   :  { %v3893_v47 = vpop.permute.xlu1 %3892  ;;  %v3409_v21 = vadd.f32 %v8183_v10, %v8094_v63 }
 0x387   :  { %v8226_v15 = vadd.f32 %v3893_v47, %v3883_v52  ;;  %5784 = vmatmul.mubr.msk.f32.vlgmr.msra.gmra.mrb[114].mxu1 %vm1444_vm2, %v2928_v7  ;;  %3970 = vrot.lane.b32.xlu1 %v7880_v56, %s6146_s3  ;;  %v2929_v2 = vmax.f32 %v2924_v45, 0.0 }
 0x388   :  { %v3916_v59 = vpop.permute.xlu0 %3915  ;;  %6036 = vmatpush3.bf16.msra.mxu1 %v6035_v32  ;;  %5794 = vmatprep.mubr.msk.f32.mxu1 %vm6145_vm1, %v8696_v48 }
 0x389   :  { %v3928_v29 = vadd.f32 %v3916_v59, %v3903_v30  ;;  %6037 = vmatprep.subr.bf16.mxu1 %v8709_v3  ;;  %v3408_v59 = vadd.f32 %v8134_v17, %v8008_v9  ;;  %v3552_v9 = vld [vmem:[%s8653_s5 + $0x160] sm:$0xff] }
 0x38a   :  { %v3874_v11 = vpop.permute.xlu1 %3873 }
 0x38b   :  { %v3884_v27 = vadd.f32 %v3874_v11, %v8756_v14  ;;  %4485 = vrot.lane.b32.xlu1 %v7880_v56, %s6142_s30  ;;  %v8245_v52 = vadd.f32 %v3928_v29, %v7706_v35 }
 0x38c   :  { %v4431_v30 = vpop.permute.xlu0 %4430  ;;  %6039 = vmatpush3.bf16.msra.mxu1 %v6038_v42 }
 0x38d   :  { %v8247_v57 = vadd.f32 %v4431_v30, %v4424_v28  ;;  %6040 = vmatprep.subr.bf16.mxu1 %v8709_v3 }
 0x38e   :  { %v8256_v39 = vpop.permute.xlu1 %3399 }
 0x38f   :  { %5795 = vmatmul.mubr.msk.f32.vlgmr.msra.gmra.mrb[116].mxu1 %vm1444_vm2, %v2929_v2  ;;  %3991 = vrot.lane.b32.xlu1 %v7901_v38, %s6147_s11  ;;  %v3555_v2 = vld [vmem:[%s8653_s5 + $0x178] sm:$0xff] }
 0x390   :  { %v4412_v35 = vpop.permute.xlu0 %4411  ;;  %6042 = vmatpush3.bf16.msra.mxu1 %v6041_v34  ;;  %5805 = vmatprep.mubr.msk.f32.mxu1 %vm6145_vm1, %v8696_v48  ;;  %v3554_v34 = vld [vmem:[%s8653_s5 + $0x170] sm:$0xff] }
 0x391   :  { %v8264_v58 = vadd.f32 %v4412_v35, %v8757_v31  ;;  %6043 = vmatprep.subr.bf16.mxu1 %v8709_v3  ;;  %v6050_v10 = vpack.c.bf16 %v3555_v2, %v3554_v34  ;;  %v8759_v35 = vld [vmem:[#allocation19_spill] sm:$0xff]  ;;  %v3630_v31 = vld [vmem:[%s8653_s5 + $0x180] sm:$0xff]  ;;  %v8760_v2 = vld [vmem:[#allocation20_spill] sm:$0xff] }
 0x392   :  { %v3895_v6 = vpop.permute.xlu1 %3894 }
 0x393   :  { %v8267_v19 = vadd.f32 %v3895_v6, %v3884_v27  ;;  %4487 = vrot.lane.b32.xlu1 %v7901_v38, %s6142_s30  ;;  %v3631_v6 = vld [vmem:[%s8653_s5 + $0x188] sm:$0xff] }
 0x394   :  { %v8271_v5 = vpop.permute.xlu0 %3937  ;;  %6045 = vmatpush3.bf16.msra.mxu1 %v6044_v62 }
 0x395   :  { %6046 = vmatprep.subr.bf16.mxu1 %v8709_v3 }
 0x396   :  { %v3912_v32 = vpop.permute.xlu1 %3911 }
 0x397   :  { %v3926_v7 = vadd.f32 %v3912_v32, %v8113_v60  ;;  %4510 = vrot.lane.b32.xlu1 %v8012_v61, %s6146_s3 }
 0x398   :  { %v4414_v28 = vpop.permute.xlu0 %4413 }
 0x399   :  { %v3931_v4 = vadd.f32 %v3926_v7, %v7664_v0  ;;  %v4426_v25 = vadd.f32 %v4414_v28, %v7673_v13  ;;  %v8758_v0 = vld [vmem:[#allocation18_spill] sm:$0xff] }
 0x39a   :  { %v3419_v47 = vpop.permute.xlu1 %3418 }
 0x39b   :  { %4512 = vrot.lane.b32.xlu1 %v8025_v26, %s6146_s3  ;;  %v3433_v45 = vadd.f32 %v3419_v47, %v3408_v59  ;;  %v3553_v26 = vld [vmem:[%s8653_s5 + $0x168] sm:$0xff]  ;;  %v3632_v59 = vld [vmem:[%s8653_s5 + $0x190] sm:$0xff] }
 0x39c   :  { %v4435_v42 = vpop.permute.xlu0 %4434 }
 0x39d   :  { %v8283_v29 = vadd.f32 %v4435_v42, %v4426_v25  ;;  %v6053_v25 = vpack.c.bf16 %v3631_v6, %v3630_v31  ;;  %v3633_v42 = vld [vmem:[%s8653_s5 + $0x198] sm:$0xff] }
 0x39e   :  { %v3440_v60 = vpop.permute.xlu1 %3439  ;;  %v3711_v31 = vld [vmem:[%s8653_s5 + $0x1b8] sm:$0xff] }
 0x39f   :  { %v3454_v43 = vadd.f32 %v3440_v60, %v3433_v45  ;;  %4533 = vrot.lane.b32.xlu1 %v8042_v33, %s6147_s11  ;;  %v6047_v33 = vpack.c.bf16 %v3553_v26, %v3552_v9 }
 0x3a0   :  { %v8287_v61 = vpop.permute.xlu0 %3426 }
 0x3a1   :  { %v3459_v13 = vadd.f32 %v3454_v43, %v8758_v0  ;;  %v6056_v0 = vpack.c.bf16 %v3633_v42, %v3632_v59 }
 0x3a2   :  { %v3421_v17 = vpop.permute.xlu1 %3420 }
 0x3a3   :  { %v3464_v11 = vadd.f32 %v7846_v1, %v3459_v13  ;;  %v3434_v30 = vadd.f32 %v3421_v17, %v3409_v21  ;;  %v3410_v17 = vadd.f32 %v8211_v24, %v8108_v16  ;;  %v3708_v24 = vld [vmem:[%s8653_s5 + $0x1a0] sm:$0xff] }
 0x3a4   :  { %v8299_v14 = vpop.permute.xlu0 %3941 }
 0x3a5   :  { %v3469_v27 = vmax.f32 %v3464_v11, 0.0 }
 0x3a6   :  { %v3442_v12 = vpop.permute.xlu1 %3441 }
 0x3a7   :  { %v3455_v8 = vadd.f32 %v3442_v12, %v3434_v30  ;;  %5806 = vmatmul.mubr.msk.f32.vlgmr.msra.gmra.mrb[118].mxu1 %vm1444_vm2, %v3469_v27 }
 0x3a8   :  { %v8308_v63 = vpop.permute.xlu0 %4436  ;;  %6048 = vmatpush3.bf16.msra.mxu1 %v6047_v33  ;;  %5816 = vmatprep.mubr.msk.f32.mxu1 %vm6145_vm1, %v8696_v48 }
 0x3a9   :  { %v3460_v62 = vadd.f32 %v3455_v8, %v8759_v35  ;;  %6049 = vmatprep.subr.bf16.mxu1 %v8709_v3 }
 0x3aa   :  { %v3423_v32 = vpop.permute.xlu1 %3422 }
 0x3ab   :  { %v3465_v7 = vadd.f32 %v7846_v1, %v3460_v62  ;;  %v3435_v33 = vadd.f32 %v3423_v32, %v3410_v17  ;;  %v3710_v62 = vld [vmem:[%s8653_s5 + $0x1b0] sm:$0xff] }
 0x3ac   :  { %v8321_v28 = vpop.permute.xlu0 %3943  ;;  %6051 = vmatpush3.bf16.msra.mxu1 %v6050_v10 }
 0x3ad   :  { %v3470_v47 = vmax.f32 %v3465_v7, 0.0  ;;  %6052 = vmatprep.subr.bf16.mxu1 %v8709_v3 }
 0x3ae   :  { %v3918_v45 = vpop.permute.xlu1 %3917 }
 0x3af   :  { %v3929_v60 = vadd.f32 %v3918_v45, %v8226_v15  ;;  %5817 = vmatmul.mubr.msk.f32.vlgmr.msra.gmra.mrb[120].mxu1 %vm1444_vm2, %v3470_v47  ;;  %v3411_v45 = vadd.f32 %v8256_v39, %v8140_v40  ;;  %v3787_v40 = vld [vmem:[%s8653_s5 + $0x1c8] sm:$0xff] }
 0x3b0   :  { %v4456_v43 = vpop.permute.xlu0 %4455  ;;  %6054 = vmatpush3.bf16.msra.mxu1 %v6053_v25  ;;  %5827 = vmatprep.mubr.msk.f32.mxu1 %vm6145_vm1, %v8696_v48 }
 0x3b1   :  { %v8335_v13 = vadd.f32 %v3929_v60, %v7718_v55  ;;  %v4470_v9 = vadd.f32 %v4456_v43, %v8247_v57  ;;  %6055 = vmatprep.subr.bf16.mxu1 %v8709_v3  ;;  %v3952_v55 = vadd.f32 %v8271_v5, %v3931_v4 }
 0x3b2   :  { %v4433_v26 = vpop.permute.xlu1 %4432 }
 0x3b3   :  { %v8342_v15 = vadd.f32 %v4433_v26, %v8264_v58  ;;  %v8345_v21 = vadd.f32 %v4470_v9, %v7792_v50  ;;  %v3709_v50 = vld [vmem:[%s8653_s5 + $0x1a8] sm:$0xff] }
 0x3b4   :  { %v3963_v11 = vpop.permute.xlu0 %3962  ;;  %6057 = vmatpush3.bf16.msra.mxu1 %v6056_v0  ;;  %v6059_v10 = vpack.c.bf16 %v3709_v50, %v3708_v24  ;;  %v8762_v50 = vld [vmem:[#allocation24_spill] sm:$0xff] }
 0x3b5   :  { %6058 = vmatprep.subr.bf16.mxu1 %v8709_v3  ;;  %v3977_v27 = vadd.f32 %v3963_v11, %v3952_v55 }
 0x3b6   :  { %v3444_v57 = vpop.permute.xlu1 %3443 }
 0x3b7   :  { %v3456_v30 = vadd.f32 %v3444_v57, %v3435_v33  ;;  %v8761_v33 = vld [vmem:[#allocation21_spill] sm:$0xff] }
 0x3b8   :  { %v3984_v34 = vpop.permute.xlu0 %3983 }
 0x3b9   :  { %v3461_v12 = vadd.f32 %v3456_v30, %v8760_v2  ;;  %v3998_v16 = vadd.f32 %v3984_v34, %v3977_v27 }
 0x3ba   :  { %v3425_v58 = vpop.permute.xlu1 %3424 }
 0x3bb   :  { %v3466_v5 = vadd.f32 %v7846_v1, %v3461_v12  ;;  %v8358_v4 = vadd.f32 %v3998_v16, %v7813_v18  ;;  %v6062_v18 = vpack.c.bf16 %v3711_v31, %v3710_v62  ;;  %v3436_v0 = vadd.f32 %v3425_v58, %v3411_v45  ;;  %v3788_v12 = vld [vmem:[%s8653_s5 + $0x1d0] sm:$0xff] }
 0x3bc   :  { %v8360_v8 = vpop.permute.xlu0 %3985 }
 0x3bd   :  { %v3471_v35 = vmax.f32 %v3466_v5, 0.0  ;;  %v4018_v5 = vld [vmem:[%s8653_s5 + $0x1e0] sm:$0xff] }
 0x3be   :  { %v8368_v6 = vpop.permute.xlu1 %3939 }
 0x3bf   :  { %5828 = vmatmul.mubr.msk.f32.vlgmr.msra.gmra.mrb[122].mxu1 %vm1444_vm2, %v3471_v35 }
 0x3c0   :  { %v4482_v32 = vpop.permute.xlu0 %4481  ;;  %6060 = vmatpush3.bf16.msra.mxu1 %v6059_v10  ;;  %5838 = vmatprep.mubr.msk.f32.mxu1 %vm6145_vm1, %v8696_v48  ;;  %v4019_v10 = vld [vmem:[%s8653_s5 + $0x1e8] sm:$0xff] }
 0x3c1   :  { %6061 = vmatprep.subr.bf16.mxu1 %v8709_v3 }
 0x3c2   :  { %v3920_v7 = vpop.permute.xlu1 %3919 }
 0x3c3   :  { %v3930_v25 = vadd.f32 %v3920_v7, %v8267_v19 }
 0x3c4   :  { %v4462_v47 = vpop.permute.xlu0 %4461  ;;  %6063 = vmatpush3.bf16.msra.mxu1 %v6062_v18 }
 0x3c5   :  { %6064 = vmatprep.subr.bf16.mxu1 %v8709_v3  ;;  %v8377_v59 = vadd.f32 %v3930_v25, %v7740_v20  ;;  %v3786_v20 = vld [vmem:[%s8653_s5 + $0x1c0] sm:$0xff]  ;;  %v4020_v25 = vld [vmem:[%s8653_s5 + $0x1f0] sm:$0xff] }
 0x3c6   :  { %v4416_v42 = vpop.permute.xlu1 %4415  ;;  %v6065_v30 = vpack.c.bf16 %v3787_v40, %v3786_v20  ;;  %v4176_v20 = vld [vmem:[%s8653_s5 + $0x230] sm:$0xff]  ;;  %v4177_v40 = vld [vmem:[%s8653_s5 + $0x238] sm:$0xff] }
 0x3c7   :  { %v4427_v60 = vadd.f32 %v4416_v42, %v7702_v53 }
 0x3c8   :  { %v8382_v43 = vpop.permute.xlu0 %3968 }
 0x3c9   :  { %v4448_v9 = vadd.f32 %v8308_v63, %v4427_v60  ;;  %v3412_v63 = vadd.f32 %v8199_v41, %v8159_v23 }
 0x3ca   :  { %v3446_v26 = vpop.permute.xlu1 %3445 }
 0x3cb   :  { %v3457_v19 = vadd.f32 %v3446_v26, %v3436_v0  ;;  %v4473_v17 = vadd.f32 %v4462_v47, %v4448_v9  ;;  %v3437_v34 = vadd.f32 %v8287_v61, %v3412_v63  ;;  %v4496_v61 = vadd.f32 %v4482_v32, %v8345_v21  ;;  %v4021_v47 = vld [vmem:[%s8653_s5 + $0x1f8] sm:$0xff]  ;;  %v4174_v9 = vld [vmem:[%s8653_s5 + $0x220] sm:$0xff] }
 0x3cc   :  { %v4484_v11 = vpop.permute.xlu0 %4483  ;;  %v6071_v21 = vpack.c.bf16 %v4019_v10, %v4018_v5  ;;  %v6074_v60 = vpack.c.bf16 %v4021_v47, %v4020_v25  ;;  %v4008_v0 = vadd.f32 %v7846_v1, %v8358_v4 }
 0x3cd   :  { %v3462_v55 = vadd.f32 %v3457_v19, %v8761_v33  ;;  %v8393_v53 = vadd.f32 %v4473_v17, %v7880_v56  ;;  %v3789_v56 = vld [vmem:[%s8653_s5 + $0x1d8] sm:$0xff] }
 0x3ce   :  { %v8395_v39 = vpop.permute.xlu1 %4417  ;;  %v6068_v41 = vpack.c.bf16 %v3789_v56, %v3788_v12  ;;  %v4252_v56 = vld [vmem:[%s8653_s5 + $0x240] sm:$0xff] }
 0x3cf   :  { %v3467_v57 = vadd.f32 %v7846_v1, %v3462_v55  ;;  %v4013_v55 = vmax.f32 %v4008_v0, 0.0 }
 0x3d0   :  { %v8400_v27 = vpop.permute.xlu0 %4489 }
 0x3d1   :  { %v3472_v2 = vmax.f32 %v3467_v57, 0.0 }
 0x3d2   :  { %v3448_v16 = vpop.permute.xlu1 %3447 }
 0x3d3   :  { %v3458_v24 = vadd.f32 %v3448_v16, %v3437_v34  ;;  %5839 = vmatmul.mubr.msk.f32.vlgmr.msra.gmra.mrb[124].mxu1 %vm1444_vm2, %v3472_v2  ;;  %v4253_v16 = vld [vmem:[%s8653_s5 + $0x248] sm:$0xff] }
 0x3d4   :  { %v4507_v23 = vpop.permute.xlu0 %4506  ;;  %6066 = vmatpush3.bf16.msra.mxu1 %v6065_v30  ;;  %5849 = vmatprep.mubr.msk.f32.mxu1 %vm6145_vm1, %v8696_v48  ;;  %v6086_v30 = vpack.c.bf16 %v4177_v40, %v4176_v20 }
 0x3d5   :  { %v3463_v58 = vadd.f32 %v3458_v24, %v8762_v50  ;;  %6067 = vmatprep.subr.bf16.mxu1 %v8709_v3  ;;  %v4521_v31 = vadd.f32 %v4507_v23, %v4496_v61  ;;  %v8478_v24 = vld [vmem:[%s8654_s4] ss:$0 sm:$0xff]  ;;  %v3954_v61 = vadd.f32 %v8299_v14, %v8245_v52  ;;  %v4428_v52 = vadd.f32 %v8395_v39, %v7714_v51 }
 0x3d6   :  { %v8421_v35 = vpop.permute.xlu1 %4438  ;;  %v3955_v51 = vadd.f32 %v8321_v28, %v8335_v13  ;;  %v4333_v28 = vld [vmem:[%s8653_s5 + $0x278] sm:$0xff] }
 0x3d7   :  { %v3468_v62 = vadd.f32 %v7846_v1, %v3463_v58  ;;  %v3953_v1 = vadd.f32 %v8368_v6, %v8217_v44  ;;  %v4255_v58 = vld [vmem:[%s8653_s5 + $0x258] sm:$0xff] }
 0x3d8   :  { %v4528_v18 = vpop.permute.xlu0 %4527  ;;  %6069 = vmatpush3.bf16.msra.mxu1 %v6068_v41  ;;  %v6089_v41 = vpack.c.bf16 %v4253_v16, %v4252_v56  ;;  %v3980_v0 = vadd.f32 %v8382_v43, %v3955_v51  ;;  %v8764_v43 = vld [vmem:[#allocation27_spill] sm:$0xff]  ;;  %v4718_v16 = vld [vmem:[%s8653_s5 + $0x2c0] sm:$0xff] }
 0x3d9   :  { %v3473_v32 = vmax.f32 %v3468_v62, 0.0  ;;  %v4542_v7 = vadd.f32 %v4528_v18, %v4521_v31  ;;  %6070 = vmatprep.subr.bf16.mxu1 %v8709_v3  ;;  %v4449_v31 = vadd.f32 %v8421_v35, %v4428_v52  ;;  %v8763_v18 = vld [vmem:[#allocation26_spill] sm:$0xff] }
 0x3da   :  { %v8431_v42 = vpop.permute.xlu1 %3945 }
 0x3db   :  { %v8434_v45 = vadd.f32 %v4542_v7, %v8010_v54  ;;  %5850 = vmatmul.mubr.msk.f32.vlgmr.msra.gmra.mrb[126].mxu1 %vm1444_vm2, %v3473_v32  ;;  %v4175_v54 = vld [vmem:[%s8653_s5 + $0x228] sm:$0xff]  ;;  %v4330_v32 = vld [vmem:[%s8653_s5 + $0x260] sm:$0xff] }
 0x3dc   :  { %6072 = vmatpush3.bf16.msra.mxu1 %v6071_v21  ;;  %5860 = vmatprep.mubr.msk.f32.mxu1 %vm6145_vm1, %v8696_v48  ;;  %v4509_v17 = vpop.permute.xlu0 %4508  ;;  %v6083_v33 = vpack.c.bf16 %v4175_v54, %v4174_v9  ;;  %v4331_v7 = vld [vmem:[%s8653_s5 + $0x268] sm:$0xff] }
 0x3dd   :  { %6073 = vmatprep.subr.bf16.mxu1 %v8709_v3 }
 0x3de   :  { %v4458_v26 = vpop.permute.xlu1 %4457 }
 0x3df   :  { %v4471_v19 = vadd.f32 %v4458_v26, %v8342_v15  ;;  %v4332_v26 = vld [vmem:[%s8653_s5 + $0x270] sm:$0xff] }
 0x3e0   :  { %6075 = vmatpush3.bf16.msra.mxu1 %v6074_v60  ;;  %v4530_v6 = vpop.permute.xlu0 %4529  ;;  %v6095_v60 = vpack.c.bf16 %v4331_v7, %v4330_v32  ;;  %v4642_v7 = vld [vmem:[%s8653_s5 + $0x2b0] sm:$0xff] }
 0x3e1   :  { %v4476_v4 = vadd.f32 %v4471_v19, %v7817_v49  ;;  %6082 = vmatprep.subr.bf16.mxu1 %v8709_v3 }
 0x3e2   :  { %v3965_v15 = vpop.permute.xlu1 %3964 }
 0x3e3   :  { %v4497_v63 = vadd.f32 %v4484_v11, %v4476_v4  ;;  %v3978_v57 = vadd.f32 %v3965_v15, %v3953_v1  ;;  %5861 = vmatmul.mubr.msk.f32.vlgmr.msra.gmra.mrb[128].mxu1 %vm1444_vm2, %v4013_v55  ;;  %v4562_v1 = vld [vmem:[%s8653_s5 + $0x280] sm:$0xff]  ;;  %v4563_v4 = vld [vmem:[%s8653_s5 + $0x288] sm:$0xff] }
 0x3e4   :  { %6084 = vmatpush3.bf16.msra.mxu1 %v6083_v33  ;;  %5882 = vmatprep.mubr.msk.f32.mxu1 %vm6145_vm1, %v8696_v48  ;;  %v6098_v33 = vpack.c.bf16 %v4333_v28, %v4332_v26 }
 0x3e5   :  { %v4522_v49 = vadd.f32 %v4509_v17, %v4497_v63  ;;  %v3999_v44 = vadd.f32 %v8360_v8, %v3978_v57  ;;  %6085 = vmatprep.subr.bf16.mxu1 %v8709_v3  ;;  %v6101_v63 = vpack.c.bf16 %v4563_v4, %v4562_v1  ;;  %v4799_v4 = vld [vmem:[%s8653_s5 + $0x2f8] sm:$0xff] }
 0x3e6   :  { %v4460_v34 = vpop.permute.xlu1 %4459 }
 0x3e7   :  { %v4543_v2 = vadd.f32 %v4530_v6, %v4522_v49  ;;  %v4004_v12 = vadd.f32 %v3999_v44, %v7834_v46  ;;  %v4472_v11 = vadd.f32 %v4460_v34, %v8283_v29  ;;  %v4564_v49 = vld [vmem:[%s8653_s5 + $0x290] sm:$0xff]  ;;  %v4565_v44 = vld [vmem:[%s8653_s5 + $0x298] sm:$0xff] }
 0x3e8   :  { %6087 = vmatpush3.bf16.msra.mxu1 %v6086_v30 }
 0x3e9   :  { %v8473_v8 = vadd.f32 %v4543_v2, %v8023_v37  ;;  %v4009_v46 = vadd.f32 %v8478_v24, %v4004_v12  ;;  %v8482_v29 = vadd.f32 %v4472_v11, %v7848_v22  ;;  %6094 = vmatprep.subr.bf16.mxu1 %v8709_v3  ;;  %v4254_v37 = vld [vmem:[%s8653_s5 + $0x250] sm:$0xff]  ;;  %v8494_v22 = vpop.permute.xlu0 %4531  ;;  %v3956_v2 = vadd.f32 %v8431_v42, %v8377_v59  ;;  %v4719_v59 = vld [vmem:[%s8653_s5 + $0x2c8] sm:$0xff] }
 0x3ea   :  { %v3967_v23 = vpop.permute.xlu1 %3966  ;;  %v6092_v62 = vpack.c.bf16 %v4255_v58, %v4254_v37  ;;  %v4552_v11 = vadd.f32 %v8478_v24, %v8434_v45  ;;  %v4640_v45 = vld [vmem:[%s8653_s5 + $0x2a0] sm:$0xff]  ;;  %v4641_v37 = vld [vmem:[%s8653_s5 + $0x2a8] sm:$0xff] }
 0x3eb   :  { %v4014_v50 = vmax.f32 %v4009_v46, 0.0  ;;  %v3979_v5 = vadd.f32 %v3967_v23, %v3954_v61  ;;  %v6113_v23 = vpack.c.bf16 %v4719_v59, %v4718_v16  ;;  %v8765_v61 = vld [vmem:[#allocation28_spill] sm:$0xff] }
 0x3ed   :  { %5872 = vmatmul.mubr.msk.f32.vlgmr.msra.gmra.mrb[162].mxu0 %vm1444_vm2, %v4014_v50  ;;  %v4515_v35 = vpop.permute.xlu0 %4514 }
 0x3ee   :  { %v3988_v10 = vpop.permute.xlu1 %3987  ;;  %6090 = vmatpush3.bf16.msra.mxu0 %v6089_v41  ;;  %5893 = vmatprep.mubr.msk.f32.mxu0 %vm6145_vm1, %v8696_v48  ;;  %v4557_v41 = vmax.f32 %v4552_v11, 0.0 }
 0x3ef   :  { %v4000_v14 = vadd.f32 %v3988_v10, %v3979_v5  ;;  %6091 = vmatprep.subr.bf16.mxu0 %v8709_v3  ;;  %v4720_v10 = vld [vmem:[%s8653_s5 + $0x2d0] sm:$0xff] }
 0x3f1   :  { %v4005_v21 = vadd.f32 %v4000_v14, %v8763_v18  ;;  %v6107_v18 = vpack.c.bf16 %v4641_v37, %v4640_v45 }
 0x3f2   :  { %v4464_v25 = vpop.permute.xlu1 %4463  ;;  %6093 = vmatpush3.bf16.msra.mxu0 %v6092_v62  ;;  %v4721_v62 = vld [vmem:[%s8653_s5 + $0x2d8] sm:$0xff] }
 0x3f3   :  { %v4010_v39 = vadd.f32 %v8478_v24, %v4005_v21  ;;  %v4474_v47 = vadd.f32 %v4464_v25, %v4449_v31  ;;  %6100 = vmatprep.subr.bf16.mxu0 %v8709_v3  ;;  %v4643_v25 = vld [vmem:[%s8653_s5 + $0x2b8] sm:$0xff]  ;;  %v6116_v51 = vpack.c.bf16 %v4721_v62, %v4720_v10 }
 0x3f5   :  { %v4015_v9 = vmax.f32 %v4010_v39, 0.0  ;;  %v4479_v54 = vadd.f32 %v4474_v47, %v7901_v38 }
 0x3f6   :  { %v3990_v13 = vpop.permute.xlu1 %3989 }
 0x3f7   :  { %v4500_v19 = vadd.f32 %v8400_v27, %v4479_v54  ;;  %v4001_v17 = vadd.f32 %v3990_v13, %v3980_v0  ;;  %5883 = vmatmul.mubr.msk.f32.vlgmr.msra.gmra.mrb[130].mxu1 %vm1444_vm2, %v4015_v9  ;;  %v4536_v27 = vpop.permute.xlu0 %4535  ;;  %v4796_v0 = vld [vmem:[%s8653_s5 + $0x2e0] sm:$0xff]  ;;  %v4797_v9 = vld [vmem:[%s8653_s5 + $0x2e8] sm:$0xff] }
 0x3f8   :  { %6096 = vmatpush3.bf16.msra.mxu1 %v6095_v60  ;;  %5904 = vmatprep.mubr.msk.f32.mxu1 %vm6145_vm1, %v8696_v48 }
 0x3f9   :  { %v4525_v38 = vadd.f32 %v4515_v35, %v4500_v19  ;;  %v4006_v55 = vadd.f32 %v4001_v17, %v8764_v43  ;;  %6097 = vmatprep.subr.bf16.mxu1 %v8709_v3  ;;  %v6110_v35 = vpack.c.bf16 %v4643_v25, %v4642_v7  ;;  %v4874_v17 = vld [vmem:[%s8653_s5 + $0x300] sm:$0xff] }
 0x3fa   :  { %v3971_v20 = vpop.permute.xlu1 %3970 }
 0x3fb   :  { %v4546_v40 = vadd.f32 %v4536_v27, %v4525_v38  ;;  %v4011_v15 = vadd.f32 %v8478_v24, %v4006_v55  ;;  %v3981_v56 = vadd.f32 %v3971_v20, %v3956_v2  ;;  %v6119_v38 = vpack.c.bf16 %v4797_v9, %v4796_v0 }
 0x3fc   :  { %6099 = vmatpush3.bf16.msra.mxu1 %v6098_v33  ;;  %v4875_v33 = vld [vmem:[%s8653_s5 + $0x308] sm:$0xff] }
 0x3fd   :  { %v8535_v57 = vadd.f32 %v4546_v40, %v8082_v36  ;;  %v4016_v30 = vmax.f32 %v4011_v15, 0.0  ;;  %6106 = vmatprep.subr.bf16.mxu1 %v8709_v3  ;;  %v6104_v36 = vpack.c.bf16 %v4565_v44, %v4564_v49  ;;  %v6125_v20 = vpack.c.bf16 %v4875_v33, %v4874_v17  ;;  %v8767_v44 = vld [vmem:[#allocation3_spill] sm:$0xff] }
 0x3fe   :  { %v4486_v6 = vpop.permute.xlu1 %4485  ;;  %v2465_v34 = vpop.f32.mrb[98].mxu1 }
 0x3ff   :  { %v5697_v12 = vpop.f32.mrb[99].mxu1  ;;  %5894 = vmatmul.mubr.msk.f32.vlgmr.msra.gmra.mrb[164].mxu0 %vm1444_vm2, %v4016_v30  ;;  %v4498_v21 = vadd.f32 %v4486_v6, %v8482_v29  ;;  %v4553_v29 = vadd.f32 %v8478_v24, %v8473_v8  ;;  %v8766_v8 = vld [vmem:[#allocation22_spill] sm:$0xff]  ;;  %v4877_v30 = vld [vmem:[%s8653_s5 + $0x318] sm:$0xff] }
 0x400   :  { %6102 = vmatpush3.bf16.msra.mxu0 %v6101_v63  ;;  %5915 = vmatprep.mubr.msk.f32.mxu0 %vm6145_vm1, %v8696_v48  ;;  %v4876_v63 = vld [vmem:[%s8653_s5 + $0x310] sm:$0xff] }
 0x401   :  { %6103 = vmatprep.subr.bf16.mxu0 %v8709_v3  ;;  %v4558_v43 = vmax.f32 %v4553_v29, 0.0  ;;  %v6128_v2 = vpack.c.bf16 %v4877_v30, %v4876_v63 }
 0x402   :  { %v3992_v42 = vpop.permute.xlu1 %3991 }
 0x403   :  { %v4002_v46 = vadd.f32 %v3992_v42, %v3981_v56  ;;  %v4556_v56 = vadd.f32 %v8478_v24, %v8535_v57 }
 0x404   :  { %6105 = vmatpush3.bf16.msra.mxu0 %v6104_v36 }
 0x405   :  { %v4007_v50 = vadd.f32 %v4002_v46, %v8765_v61  ;;  %6112 = vmatprep.subr.bf16.mxu0 %v8709_v3  ;;  %v4561_v59 = vmax.f32 %v4556_v56, 0.0  ;;  %v5185_v56 = vld [vmem:[%s8655_s6] ss:$0 sm:$0xff] }
 0x406   :  { %v2538_v58 = vpop.f32.mrb[100].mxu1  ;;  %v4488_v5 = vpop.permute.xlu1 %4487 }
 0x407   :  { %v4012_v52 = vadd.f32 %v8478_v24, %v4007_v50  ;;  %v2539_v14 = vadd.f32 %v2538_v58, %v2465_v34  ;;  %v5708_v31 = vpop.f32.mrb[101].mxu1  ;;  %5916 = vmatmul.mubr.msk.f32.vlgmr.msra.gmra.mrb[166].mxu0 %vm1444_vm2, %v4557_v41  ;;  %v4499_v28 = vadd.f32 %v4488_v5, %v8393_v53  ;;  %v4798_v53 = vld [vmem:[%s8653_s5 + $0x2f0] sm:$0xff] }
 0x408   :  { %6114 = vmatpush3.bf16.msra.mxu0 %v6113_v23  ;;  %5937 = vmatprep.mubr.msk.f32.mxu0 %vm6145_vm1, %v8696_v48  ;;  %v6122_v49 = vpack.c.bf16 %v4799_v4, %v4798_v53 }
 0x409   :  { %v4017_v32 = vmax.f32 %v4012_v52, 0.0  ;;  %6115 = vmatprep.subr.bf16.mxu0 %v8709_v3 }
 0x40a   :  { %v4511_v39 = vpop.permute.xlu1 %4510 }
 0x40b   :  { %v4523_v47 = vadd.f32 %v4511_v39, %v4498_v21  ;;  %5905 = vmatmul.mubr.msk.f32.vlgmr.msra.gmra.mrb[132].mxu1 %vm1444_vm2, %v4017_v32 }
 0x40c   :  { %6108 = vmatpush3.bf16.msra.mxu1 %v6107_v18  ;;  %5926 = vmatprep.mubr.msk.f32.mxu1 %vm6145_vm1, %v8696_v48 }
 0x40d   :  { %v4544_v60 = vadd.f32 %v8494_v22, %v4523_v47  ;;  %6109 = vmatprep.subr.bf16.mxu1 %v8709_v3  ;;  %6117 = vmatpush3.bf16.msra.mxu0 %v6116_v51 }
 0x40e   :  { %v2615_v54 = vpop.f32.mrb[102].mxu1  ;;  %v4513_v26 = vpop.permute.xlu1 %4512  ;;  %6124 = vmatprep.subr.bf16.mxu0 %v8709_v3 }
 0x40f   :  { %v4549_v13 = vadd.f32 %v4544_v60, %v8766_v8  ;;  %v2619_v22 = vadd.f32 %v2615_v54, %v2539_v14  ;;  %v5719_v19 = vpop.f32.mrb[103].mxu1  ;;  %v4524_v1 = vadd.f32 %v4513_v26, %v4499_v28 }
 0x410   :  { %6111 = vmatpush3.bf16.msra.mxu1 %v6110_v35 }
 0x411   :  { %v4554_v55 = vadd.f32 %v8478_v24, %v4549_v13  ;;  %6118 = vmatprep.subr.bf16.mxu1 %v8709_v3 }
 0x412   :  { %v4534_v27 = vpop.permute.xlu1 %4533 }
 0x413   :  { %v4559_v40 = vmax.f32 %v4554_v55, 0.0  ;;  %v4545_v15 = vadd.f32 %v4534_v27, %v4524_v1  ;;  %5927 = vmatmul.mubr.msk.f32.vlgmr.msra.gmra.mrb[134].mxu1 %vm1444_vm2, %v4558_v43 }
 0x414   :  { %6120 = vmatpush3.bf16.msra.mxu1 %v6119_v38  ;;  %5948 = vmatprep.mubr.msk.f32.mxu1 %vm6145_vm1, %v8696_v48 }
 0x415   :  { %v4550_v6 = vadd.f32 %v4545_v15, %v8767_v44  ;;  %5938 = vmatmul.mubr.msk.f32.vlgmr.msra.gmra.mrb[168].mxu0 %vm1444_vm2, %v4559_v40  ;;  %6121 = vmatprep.subr.bf16.mxu1 %v8709_v3 }
 0x416   :  { %6126 = vmatpush3.bf16.msra.mxu0 %v6125_v20  ;;  %v2693_v34 = vpop.f32.mrb[104].mxu1  ;;  %5959 = vmatprep.mubr.msk.f32.mxu0 %vm6145_vm1, %v8696_v48 }
 0x417   :  { %v4555_v12 = vadd.f32 %v8478_v24, %v4550_v6  ;;  %v2697_v36 = vadd.f32 %v2693_v34, %v2619_v22  ;;  %v5730_v11 = vpop.f32.mrb[105].mxu1  ;;  %6127 = vmatprep.subr.bf16.mxu0 %v8709_v3 }
 0x418   :  { %6123 = vmatpush3.bf16.msra.mxu1 %v6122_v49 }
 0x419   :  { %v4560_v16 = vmax.f32 %v4555_v12, 0.0 }
 0x41a   :  { %6129 = vmatpush3.bf16.msra.mxu0 %v6128_v2 }
 0x41b   :  { %5949 = vmatmul.mubr.msk.f32.vlgmr.msra.gmra.mrb[136].mxu1 %vm1444_vm2, %v4560_v16 }
 0x41d   :  { %5960 = vmatmul.mubr.msk.f32.vlgmr.msra.gmra.mrb[170].mxu0 %vm1444_vm2, %v4561_v59 }
 0x428   :  { %v2771_v42 = vpop.f32.mrb[106].mxu1 }
 0x429   :  { %v2775_v46 = vadd.f32 %v2771_v42, %v2697_v36  ;;  %v5741_v48 = vpop.f32.mrb[107].mxu1 }
 0x430   :  { %v3003_v23 = vpop.f32.mrb[108].mxu1 }
 0x431   :  { %v3007_v41 = vadd.f32 %v3003_v23, %v2775_v46  ;;  %v5752_v61 = vpop.f32.mrb[109].mxu1 }
 0x43a   :  { %v3081_v50 = vpop.f32.mrb[110].mxu1 }
 0x43b   :  { %v3085_v45 = vadd.f32 %v3081_v50, %v3007_v41  ;;  %v5763_v3 = vpop.f32.mrb[111].mxu1 }
 0x44a   :  { %v3159_v37 = vpop.f32.mrb[112].mxu1 }
 0x44b   :  { %v3163_v58 = vadd.f32 %v3159_v37, %v3085_v45  ;;  %v5774_v24 = vpop.f32.mrb[113].mxu1 }
 0x44c   :  { %v5186_v24 = vld [vmem:[%s8656_s7] ss:$0 sm:$0xff] }
 0x45a   :  { %v3237_v57 = vpop.f32.mrb[114].mxu1 }
 0x45b   :  { %v3241_v5 = vadd.f32 %v3237_v57, %v3163_v58  ;;  %v5785_v10 = vpop.f32.mrb[115].mxu1 }
 0x462   :  { %v3315_v62 = vpop.f32.mrb[116].mxu1 }
 0x463   :  { %v3319_v52 = vadd.f32 %v3315_v62, %v3241_v5  ;;  %v5796_v14 = vpop.f32.mrb[117].mxu1  ;;  %v5187_v5 = vld [vmem:[%s8657_s8] ss:$0 sm:$0xff] }
 0x47a   :  { %v3547_v31 = vpop.f32.mrb[118].mxu1 }
 0x47b   :  { %v3551_v18 = vadd.f32 %v3547_v31, %v3319_v52  ;;  %v5807_v21 = vpop.f32.mrb[119].mxu1 }
 0x482   :  { %v3625_v32 = vpop.f32.mrb[120].mxu1 }
 0x483   :  { %v3629_v7 = vadd.f32 %v3625_v32, %v3551_v18  ;;  %v5818_v25 = vpop.f32.mrb[121].mxu1 }
 0x492   :  { %v3703_v51 = vpop.f32.mrb[122].mxu1 }
 0x493   :  { %v3707_v39 = vadd.f32 %v3703_v51, %v3629_v7  ;;  %v5829_v47 = vpop.f32.mrb[123].mxu1 }
 0x4a6   :  { %v3781_v35 = vpop.f32.mrb[124].mxu1 }
 0x4a7   :  { %v3785_v29 = vadd.f32 %v3781_v35, %v3707_v39  ;;  %v5840_v60 = vpop.f32.mrb[125].mxu1 }
 0x4ae   :  { %v3859_v0 = vpop.f32.mrb[126].mxu1 }
 0x4af   :  { %v3863_v9 = vadd.f32 %v3859_v0, %v3785_v29  ;;  %v5851_v54 = vpop.f32.mrb[127].mxu1 }
 0x4b6   :  { %v4091_v26 = vpop.f32.mrb[128].mxu1 }
 0x4b7   :  { %v4095_v28 = vadd.f32 %v4091_v26, %v3863_v9  ;;  %v5862_v8 = vpop.f32.mrb[129].mxu1 }
 0x4c0   :  { %v4169_v13 = vpop.f32.mrb[162].mxu0 }
 0x4c1   :  { %v4173_v22 = vadd.f32 %v4169_v13, %v4095_v28  ;;  %v5873_v19 = vpop.f32.mrb[163].mxu0 }
 0x4ca   :  { %v4247_v17 = vpop.f32.mrb[130].mxu1 }
 0x4cb   :  { %v4251_v33 = vadd.f32 %v4247_v17, %v4173_v22  ;;  %v5884_v38 = vpop.f32.mrb[131].mxu1 }
 0x4d2   :  { %v4325_v43 = vpop.f32.mrb[164].mxu0 }
 0x4d3   :  { %v4329_v55 = vadd.f32 %v4325_v43, %v4251_v33  ;;  %v5895_v1 = vpop.f32.mrb[165].mxu0 }
 0x4da   :  { %v4635_v53 = vpop.f32.mrb[166].mxu0 }
 0x4db   :  { %v5917_v4 = vpop.f32.mrb[167].mxu0 }
 0x4de   :  { %v4403_v27 = vpop.f32.mrb[132].mxu1 }
 0x4df   :  { %v4407_v20 = vadd.f32 %v4403_v27, %v4329_v55  ;;  %v5906_v40 = vpop.f32.mrb[133].mxu1 }
 0x4e1   :  { %v4639_v15 = vadd.f32 %v4635_v53, %v4407_v20 }
 0x4e6   :  { %v4713_v63 = vpop.f32.mrb[134].mxu1 }
 0x4e7   :  { %v4717_v30 = vadd.f32 %v4713_v63, %v4639_v15  ;;  %v5928_v49 = vpop.f32.mrb[135].mxu1 }
 0x4e8   :  { %v4791_v44 = vpop.f32.mrb[168].mxu0 }
 0x4e9   :  { %v4795_v6 = vadd.f32 %v4791_v44, %v4717_v30  ;;  %v5939_v34 = vpop.f32.mrb[169].mxu0 }
 0x4ee   :  { %v4869_v2 = vpop.f32.mrb[136].mxu1 }
 0x4ef   :  { %v4873_v12 = vadd.f32 %v4869_v2, %v4795_v6  ;;  %v5950_v36 = vpop.f32.mrb[137].mxu1 }
 0x4f0   :  { %v4947_v11 = vpop.f32.mrb[170].mxu0 }
 0x4f1   :  { %v4951_v16 = vadd.f32 %v4947_v11, %v4873_v12  ;;  %v5961_v59 = vpop.f32.mrb[171].mxu0 }
 0x4f3   :  { %v4959_v42 = vadd.f32 %v5185_v56, %v4951_v16 }
 0x4f5   :  { %v4960_v46 = vsel %vm1444_vm2, %v4959_v42, 0.0 }
 0x4f6   :  { %4961 = vadd.xlane.f32.xlu1 %v4960_v46 }
 0x583   :  { %v4962_v48 = vpop.xlane.xlu1 %4961 }
 0x584   :  { %v4964_v23 = vmul.f32 0.03125, %v4962_v48 }
 0x586   :  { %v4965_v41 = vsub.f32 %v4959_v42, %v4964_v23 }
 0x588   :  { %v4966_v61 = vmul.f32 %v4965_v41, %v4965_v41 }
 0x58a   :  { %v4967_v50 = vsel %vm1444_vm2, %v4966_v61, 0.0 }
 0x58b   :  { %4968 = vadd.xlane.f32.xlu0 %v4967_v50 }
 0x618   :  { %v4969_v45 = vpop.xlane.xlu0 %4968 }
 0x619   :  { %v4970_v3 = vmul.f32 0.03125, %v4969_v45 }
 0x61b   :  { %v4971_v37 = vadd.f32 1e-05, %v4970_v3 }
 0x61d   :  { %6136 = vrsqrt.f32 %v4971_v37 }
 0x627   :  { %v6137_v58 = vpop.eup %6136 }
 0x628   :  { %v4973_v57 = vmul.f32 %v6137_v58, %v4965_v41 }
 0x62a   :  { %v4981_v10 = vmul.f32 %v5186_v24, %v4973_v57 }
 0x62c   :  { %v4989_v62 = vadd.f32 %v5187_v5, %v4981_v10 }
 0x62e   :  { %6138 = vtanh.f32 %v4989_v62 }
 0x638   :  { %v6139_v52 = vpop.eup %6138 }
 0x639   :  { %4991 = vst.msk [vmem:[%s8658_s9] sm:$0xff] %vm1444_vm2, %v6139_v52 }

</bundles_post_ra>
